<compile_context>
chip_gen: v7x
topology: tpu7x:2x2x1
jax: 0.10.0
libtpu: 0.0.40
codegen_flags: <defaults>
</compile_context>

<pallas_src>
import jax
import jax.numpy as jnp
from jax.experimental import pallas as pl
from jax.experimental.pallas import tpu as pltpu

LATENT_DIM = 32
LABEL_DIM = 10
H1, H2, H3 = 256, 512, 1024
OUT_DIM = 28 * 28          # 784
OUT_PAD = 896              # 7 * 128 : lane-dense last matmul + output store
BN_EPS = 1e-5


def _make_kernel(b_real, b_pad):
    """Builds the kernel with the real/padded batch sizes baked in."""
    needs_mask = (b_pad != b_real)
    inv_b = 1.0 / float(b_real)

    def kernel(z_ref, lab_ref,
               w1z_ref, w1l_ref, g1_ref, be1_ref,
               w2_ref, g2_ref, be2_ref,
               w3_hbm, g3_ref, be3_ref,
               w4_hbm, b4_ref,
               out_ref,
               w3_vmem, w4_vmem, dma_sem):
        # w3 is needed first (layer 3 stall point): give it full HBM bandwidth.
        # w4's copy starts only after w3 has landed and overlaps layer-3 work.
        w3_cp = pltpu.make_async_copy(w3_hbm, w3_vmem, dma_sem.at[0])
        w4_cp = pltpu.make_async_copy(w4_hbm, w4_vmem, dma_sem.at[1])
        w3_cp.start()

        # Row-validity mask (hoisted: computed once, reused by every BN layer).
        if needs_mask:
            row = jax.lax.broadcasted_iota(jnp.int32, (b_pad, 1), 0)
            mask = (row < b_real).astype(jnp.float32)      # (b_pad, 1)
        else:
            mask = None

        def linear(h_f32, w_bf16):
            # bf16 MXU operands, f32 accumulate. No bias: b1/b2/b3 cancel
            # exactly under training-mode BatchNorm.
            return jnp.dot(h_f32.astype(jnp.bfloat16), w_bf16,
                           preferred_element_type=jnp.float32)

        def bn_relu(h, g_ref, be_ref):
            # BatchNorm1d (training mode) fused into one scale/shift.
            # Single pass: mu and E[h^2] over the REAL batch rows only.
            if mask is None:
                mu = jnp.mean(h, axis=0, keepdims=True)
                ms = jnp.mean(h * h, axis=0, keepdims=True)
            else:
                hm = h * mask
                mu = jnp.sum(hm, axis=0, keepdims=True) * inv_b
                ms = jnp.sum(hm * h, axis=0, keepdims=True) * inv_b
            var = jnp.maximum(ms - mu * mu, 0.0)           # guard cancellation
            scale = g_ref[...] * jax.lax.rsqrt(var + BN_EPS)
            shift = be_ref[...] - mu * scale
            return jnp.maximum(h * scale + shift, 0.0)     # ReLU

        # Layer 1: cat([z, onehot]) @ W1  ==  z @ W1_z + onehot @ W1_lab
        h = linear(z_ref[...], w1z_ref[...]) + linear(lab_ref[...], w1l_ref[...])
        h = bn_relu(h, g1_ref, be1_ref)

        # Layer 2
        h = linear(h, w2_ref[...])
        h = bn_relu(h, g2_ref, be2_ref)

        # Layer 3 (streamed weights; w4 stream starts once w3 has arrived)
        w3_cp.wait()
        w4_cp.start()
        h = linear(h, w3_vmem[...])
        h = bn_relu(h, g3_ref, be3_ref)

        # Layer 4 + Tanh (N padded to 896; padded cols are tanh(0) = 0)
        w4_cp.wait()
        h = linear(h, w4_vmem[...]) + b4_ref[...]
        out_ref[...] = jnp.tanh(h)

    return kernel


def init_params(key):
    """Deterministic synthetic f32 parameters (shapes match the PyTorch module)."""
    ks = jax.random.split(key, 8)
    dims = [(LATENT_DIM + LABEL_DIM, H1), (H1, H2), (H2, H3), (H3, OUT_DIM)]
    params = []
    for i, (din, dout) in enumerate(dims):
        w = 0.02 * jax.random.normal(ks[2 * i], (din, dout), dtype=jnp.float32)
        b = 0.01 * jax.random.normal(ks[2 * i + 1], (1, dout), dtype=jnp.float32)
        params.append((w, b))
    # BatchNorm affine params: PyTorch default init (gamma=1, beta=0).
    bn = [(jnp.ones((1, d), jnp.float32), jnp.zeros((1, d), jnp.float32))
          for d in (H1, H2, H3)]
    return params, bn


def pack_params(params, bn):
    """One-time conversion to kernel layout.

    bf16 weights, W1 split into z/label parts, layer-4 N padded to 896.
    b1/b2/b3 are DROPPED: a per-feature constant added before training-mode
    BatchNorm cancels exactly (mean shifts by b, variance unchanged), so the
    normalized output is identical for any gamma/beta.
    """
    (w1, _b1), (w2, _b2), (w3, _b3), (w4, b4) = params
    (g1, be1), (g2, be2), (g3, be3) = bn

    w1z = w1[:LATENT_DIM].astype(jnp.bfloat16)        # (32, 256)
    w1l = w1[LATENT_DIM:].astype(jnp.bfloat16)        # (10, 256)
    w2b = w2.astype(jnp.bfloat16)                     # (256, 512)
    w3b = w3.astype(jnp.bfloat16)                     # (512, 1024)  streamed
    w4b = jnp.pad(w4, ((0, 0), (0, OUT_PAD - OUT_DIM))).astype(jnp.bfloat16)
    b4p = jnp.pad(b4, ((0, 0), (0, OUT_PAD - OUT_DIM)))

    return (w1z, w1l, g1, be1,
            w2b, g2, be2,
            w3b, g3, be3,
            w4b, b4p)


def generator_forward(z, labels_onehot, packed):
    (w1z, w1l, g1, be1,
     w2b, g2, be2,
     w3b, g3, be3,
     w4b, b4p) = packed

    B = z.shape[0]
    # Pad the batch (MXU M dim) to a multiple of 16 so bf16 activation tiles
    # are full; BN stats inside the kernel are masked to the real B rows.
    B_pad = max(16, ((B + 15) // 16) * 16)

    z_f32 = z.astype(jnp.float32)
    lab_f32 = labels_onehot.astype(jnp.float32)
    if B_pad != B:
        z_f32 = jnp.pad(z_f32, ((0, B_pad - B), (0, 0)))
        lab_f32 = jnp.pad(lab_f32, ((0, B_pad - B), (0, 0)))

    vmem = pl.BlockSpec(memory_space=pltpu.MemorySpace.VMEM)
    hbm = pl.BlockSpec(memory_space=pl.ANY)

    matmul_macs = ((LATENT_DIM + LABEL_DIM) * H1 + H1 * H2 + H2 * H3
                   + H3 * OUT_PAD)
    weight_bytes = 2 * matmul_macs                     # bf16 weights
    act_bytes = 4 * B_pad * (LATENT_DIM + LABEL_DIM + OUT_PAD)
    cost = pl.CostEstimate(
        flops=2 * B_pad * matmul_macs,
        transcendentals=B_pad * OUT_PAD + (H1 + H2 + H3),  # tanh + rsqrt
        bytes_accessed=weight_bytes + act_bytes
        + 4 * (2 * (H1 + H2 + H3) + OUT_PAD))

    out_flat = pl.pallas_call(
        _make_kernel(B, B_pad),
        out_shape=jax.ShapeDtypeStruct((B_pad, OUT_PAD), jnp.float32),
        in_specs=[vmem, vmem,                       # z, labels
                  vmem, vmem, vmem, vmem,           # w1z, w1l, g1, be1
                  vmem, vmem, vmem,                 # w2, g2, be2
                  hbm, vmem, vmem,                  # w3 (HBM, streamed), g3, be3
                  hbm, vmem],                       # w4 (HBM, streamed), b4
        out_specs=vmem,
        scratch_shapes=[pltpu.VMEM((H2, H3), jnp.bfloat16),       # w3 buffer
                        pltpu.VMEM((H3, OUT_PAD), jnp.bfloat16),  # w4 buffer
                        pltpu.SemaphoreType.DMA((2,))],
        cost_estimate=cost,
    )(z_f32, lab_f32,
      w1z, w1l, g1, be1,
      w2b, g2, be2,
      w3b, g3, be3,
      w4b, b4p)

    # Glue: drop batch/lane padding, then .view(-1, 1, 28, 28)
    return out_flat[:B, :OUT_DIM].reshape(B, 1, 28, 28)


if __name__ == "__main__":
    key = jax.random.PRNGKey(0)
    k_param, k_z, k_lab = jax.random.split(key, 3)

    params, bn = init_params(k_param)
    packed = pack_params(params, bn)

    # Small example batch (wrapper pads to 16 internally; larger B = better MXU use).
    B = 8
    z = jax.random.normal(k_z, (B, LATENT_DIM), dtype=jnp.float32)
    labels = jax.nn.one_hot(
        jax.random.randint(k_lab, (B,), 0, LABEL_DIM), LABEL_DIM
    ).astype(jnp.float32)

    fwd = jax.jit(generator_forward)
    out = fwd(z, labels, packed)
    out = jax.block_until_ready(out)

    assert out.shape == (B, 1, 28, 28), out.shape
    assert bool(jnp.all(jnp.isfinite(out)))
    print("KERNEL_OK")
</pallas_src>

<mosaic_0001>
module attributes {stable_mosaic.version = 11 : i64} {
  func.func @kernel(%arg0: memref<16x32xf32, #tpu.memory_space<vmem>>, %arg1: memref<16x10xf32, #tpu.memory_space<vmem>>, %arg2: memref<32x256xbf16, #tpu.memory_space<vmem>>, %arg3: memref<10x256xbf16, #tpu.memory_space<vmem>>, %arg4: memref<1x256xf32, #tpu.memory_space<vmem>>, %arg5: memref<1x256xf32, #tpu.memory_space<vmem>>, %arg6: memref<256x512xbf16, #tpu.memory_space<vmem>>, %arg7: memref<1x512xf32, #tpu.memory_space<vmem>>, %arg8: memref<1x512xf32, #tpu.memory_space<vmem>>, %arg9: memref<512x1024xbf16, #tpu.memory_space<any>>, %arg10: memref<1x1024xf32, #tpu.memory_space<vmem>>, %arg11: memref<1x1024xf32, #tpu.memory_space<vmem>>, %arg12: memref<1024x896xbf16, #tpu.memory_space<any>>, %arg13: memref<1x896xf32, #tpu.memory_space<vmem>>, %arg14: memref<16x896xf32, #tpu.memory_space<vmem>>, %arg15: memref<512x1024xbf16, #tpu.memory_space<vmem>>, %arg16: memref<1024x896xbf16, #tpu.memory_space<vmem>>, %arg17: memref<2x!tpu.dma_semaphore, #tpu.memory_space<semaphore_mem>>) attributes {dimension_semantics = [], scalar_prefetch = 0 : i64, scratch_operands = 3 : i64, tpu.core_type = #tpu.core_type<tc>} {
    %c0_i32 = arith.constant 0 : i32
    %0 = tpu.memref_slice %arg17[%c0_i32] : memref<2x!tpu.dma_semaphore, #tpu.memory_space<semaphore_mem>> -> memref<1x!tpu.dma_semaphore, #tpu.memory_space<semaphore_mem>>
    %1 = tpu.memref_squeeze %0 : memref<1x!tpu.dma_semaphore, #tpu.memory_space<semaphore_mem>> -> memref<!tpu.dma_semaphore, #tpu.memory_space<semaphore_mem>>
    tpu.enqueue_dma source(%arg9 : memref<512x1024xbf16, #tpu.memory_space<any>>) target(%arg15 : memref<512x1024xbf16, #tpu.memory_space<vmem>>) target_semaphore(%1 : memref<!tpu.dma_semaphore, #tpu.memory_space<semaphore_mem>>)
    %2 = tpu.iota {dimensions = array<i32: 0>} : vector<16x1xi32>
    %c8_i32 = arith.constant 8 : i32
    %3 = vector.broadcast %c8_i32 : i32 to vector<16x1xi32>
    %4 = arith.cmpi slt, %2, %3 : vector<16x1xi32>
    %5 = arith.extui %4 : vector<16x1xi1> to vector<16x1xi32>
    %6 = arith.sitofp %5 : vector<16x1xi32> to vector<16x1xf32>
    %c0 = arith.constant 0 : index
    %c0_0 = arith.constant 0 : index
    %7 = vector.load %arg0[%c0, %c0_0] : memref<16x32xf32, #tpu.memory_space<vmem>>, vector<16x32xf32>
    %c0_1 = arith.constant 0 : index
    %c0_2 = arith.constant 0 : index
    %8 = vector.load %arg2[%c0_1, %c0_2] : memref<32x256xbf16, #tpu.memory_space<vmem>>, vector<32x256xbf16>
    %9 = arith.truncf %7 : vector<16x32xf32> to vector<16x32xbf16>
    %cst = arith.constant dense<0.000000e+00> : vector<16x256xf32>
    %10 = tpu.matmul %9, %8, %cst {dimension_numbers = #tpu.dot_dimension_numbers<[1], [0], [0], [1], [0, 0, 1, 1], [], []>} : vector<16x32xbf16>, vector<32x256xbf16>, vector<16x256xf32> -> vector<16x256xf32>
    %c0_3 = arith.constant 0 : index
    %c0_4 = arith.constant 0 : index
    %11 = vector.load %arg1[%c0_3, %c0_4] : memref<16x10xf32, #tpu.memory_space<vmem>>, vector<16x10xf32>
    %c0_5 = arith.constant 0 : index
    %c0_6 = arith.constant 0 : index
    %12 = vector.load %arg3[%c0_5, %c0_6] : memref<10x256xbf16, #tpu.memory_space<vmem>>, vector<10x256xbf16>
    %13 = arith.truncf %11 : vector<16x10xf32> to vector<16x10xbf16>
    %cst_7 = arith.constant dense<0.000000e+00> : vector<16x256xf32>
    %14 = tpu.matmul %13, %12, %cst_7 {dimension_numbers = #tpu.dot_dimension_numbers<[1], [0], [0], [1], [0, 0, 1, 1], [], []>} : vector<16x10xbf16>, vector<10x256xbf16>, vector<16x256xf32> -> vector<16x256xf32>
    %15 = arith.addf %10, %14 : vector<16x256xf32>
    %16 = vector.broadcast %6 : vector<16x1xf32> to vector<16x256xf32>
    %17 = arith.mulf %15, %16 : vector<16x256xf32>
    %cst_8 = arith.constant dense<0.000000e+00> : vector<256xf32>
    %18 = vector.multi_reduction <add>, %17, %cst_8 [0] : vector<16x256xf32> to vector<256xf32>
    %19 = vector.shape_cast %18 : vector<256xf32> to vector<1x256xf32>
    %cst_9 = arith.constant 1.250000e-01 : f32
    %20 = vector.broadcast %cst_9 : f32 to vector<1x256xf32>
    %21 = arith.mulf %19, %20 : vector<1x256xf32>
    %22 = arith.mulf %17, %15 : vector<16x256xf32>
    %cst_10 = arith.constant dense<0.000000e+00> : vector<256xf32>
    %23 = vector.multi_reduction <add>, %22, %cst_10 [0] : vector<16x256xf32> to vector<256xf32>
    %24 = vector.shape_cast %23 : vector<256xf32> to vector<1x256xf32>
    %cst_11 = arith.constant 1.250000e-01 : f32
    %25 = vector.broadcast %cst_11 : f32 to vector<1x256xf32>
    %26 = arith.mulf %24, %25 : vector<1x256xf32>
    %27 = arith.mulf %21, %21 : vector<1x256xf32>
    %28 = arith.subf %26, %27 : vector<1x256xf32>
    %cst_12 = arith.constant 0.000000e+00 : f32
    %29 = vector.broadcast %cst_12 : f32 to vector<1x256xf32>
    %30 = arith.maximumf %28, %29 : vector<1x256xf32>
    %c0_13 = arith.constant 0 : index
    %c0_14 = arith.constant 0 : index
    %31 = vector.load %arg4[%c0_13, %c0_14] : memref<1x256xf32, #tpu.memory_space<vmem>>, vector<1x256xf32>
    %cst_15 = arith.constant 9.99999974E-6 : f32
    %32 = vector.broadcast %cst_15 : f32 to vector<1x256xf32>
    %33 = arith.addf %30, %32 : vector<1x256xf32>
    %34 = math.rsqrt %33 : vector<1x256xf32>
    %35 = arith.mulf %31, %34 : vector<1x256xf32>
    %c0_16 = arith.constant 0 : index
    %c0_17 = arith.constant 0 : index
    %36 = vector.load %arg5[%c0_16, %c0_17] : memref<1x256xf32, #tpu.memory_space<vmem>>, vector<1x256xf32>
    %37 = arith.mulf %21, %35 : vector<1x256xf32>
    %38 = arith.subf %36, %37 : vector<1x256xf32>
    %39 = vector.broadcast %35 : vector<1x256xf32> to vector<16x256xf32>
    %40 = arith.mulf %15, %39 : vector<16x256xf32>
    %41 = vector.broadcast %38 : vector<1x256xf32> to vector<16x256xf32>
    %42 = arith.addf %40, %41 : vector<16x256xf32>
    %cst_18 = arith.constant 0.000000e+00 : f32
    %43 = vector.broadcast %cst_18 : f32 to vector<16x256xf32>
    %44 = arith.maximumf %42, %43 : vector<16x256xf32>
    %c0_19 = arith.constant 0 : index
    %c0_20 = arith.constant 0 : index
    %45 = vector.load %arg6[%c0_19, %c0_20] : memref<256x512xbf16, #tpu.memory_space<vmem>>, vector<256x512xbf16>
    %46 = arith.truncf %44 : vector<16x256xf32> to vector<16x256xbf16>
    %cst_21 = arith.constant dense<0.000000e+00> : vector<16x512xf32>
    %47 = tpu.matmul %46, %45, %cst_21 {dimension_numbers = #tpu.dot_dimension_numbers<[1], [0], [0], [1], [0, 0, 1, 1], [], []>} : vector<16x256xbf16>, vector<256x512xbf16>, vector<16x512xf32> -> vector<16x512xf32>
    %48 = vector.broadcast %6 : vector<16x1xf32> to vector<16x512xf32>
    %49 = arith.mulf %47, %48 : vector<16x512xf32>
    %cst_22 = arith.constant dense<0.000000e+00> : vector<512xf32>
    %50 = vector.multi_reduction <add>, %49, %cst_22 [0] : vector<16x512xf32> to vector<512xf32>
    %51 = vector.shape_cast %50 : vector<512xf32> to vector<1x512xf32>
    %cst_23 = arith.constant 1.250000e-01 : f32
    %52 = vector.broadcast %cst_23 : f32 to vector<1x512xf32>
    %53 = arith.mulf %51, %52 : vector<1x512xf32>
    %54 = arith.mulf %49, %47 : vector<16x512xf32>
    %cst_24 = arith.constant dense<0.000000e+00> : vector<512xf32>
    %55 = vector.multi_reduction <add>, %54, %cst_24 [0] : vector<16x512xf32> to vector<512xf32>
    %56 = vector.shape_cast %55 : vector<512xf32> to vector<1x512xf32>
    %cst_25 = arith.constant 1.250000e-01 : f32
    %57 = vector.broadcast %cst_25 : f32 to vector<1x512xf32>
    %58 = arith.mulf %56, %57 : vector<1x512xf32>
    %59 = arith.mulf %53, %53 : vector<1x512xf32>
    %60 = arith.subf %58, %59 : vector<1x512xf32>
    %cst_26 = arith.constant 0.000000e+00 : f32
    %61 = vector.broadcast %cst_26 : f32 to vector<1x512xf32>
    %62 = arith.maximumf %60, %61 : vector<1x512xf32>
    %c0_27 = arith.constant 0 : index
    %c0_28 = arith.constant 0 : index
    %63 = vector.load %arg7[%c0_27, %c0_28] : memref<1x512xf32, #tpu.memory_space<vmem>>, vector<1x512xf32>
    %cst_29 = arith.constant 9.99999974E-6 : f32
    %64 = vector.broadcast %cst_29 : f32 to vector<1x512xf32>
    %65 = arith.addf %62, %64 : vector<1x512xf32>
    %66 = math.rsqrt %65 : vector<1x512xf32>
    %67 = arith.mulf %63, %66 : vector<1x512xf32>
    %c0_30 = arith.constant 0 : index
    %c0_31 = arith.constant 0 : index
    %68 = vector.load %arg8[%c0_30, %c0_31] : memref<1x512xf32, #tpu.memory_space<vmem>>, vector<1x512xf32>
    %69 = arith.mulf %53, %67 : vector<1x512xf32>
    %70 = arith.subf %68, %69 : vector<1x512xf32>
    %71 = vector.broadcast %67 : vector<1x512xf32> to vector<16x512xf32>
    %72 = arith.mulf %47, %71 : vector<16x512xf32>
    %73 = vector.broadcast %70 : vector<1x512xf32> to vector<16x512xf32>
    %74 = arith.addf %72, %73 : vector<16x512xf32>
    %cst_32 = arith.constant 0.000000e+00 : f32
    %75 = vector.broadcast %cst_32 : f32 to vector<16x512xf32>
    %76 = arith.maximumf %74, %75 : vector<16x512xf32>
    %c0_i32_33 = arith.constant 0 : i32
    %77 = tpu.memref_slice %arg17[%c0_i32_33] : memref<2x!tpu.dma_semaphore, #tpu.memory_space<semaphore_mem>> -> memref<1x!tpu.dma_semaphore, #tpu.memory_space<semaphore_mem>>
    %78 = tpu.memref_squeeze %77 : memref<1x!tpu.dma_semaphore, #tpu.memory_space<semaphore_mem>> -> memref<!tpu.dma_semaphore, #tpu.memory_space<semaphore_mem>>
    tpu.wait_dma2 semaphore(%78 : memref<!tpu.dma_semaphore, #tpu.memory_space<semaphore_mem>>) src(%arg9 : memref<512x1024xbf16, #tpu.memory_space<any>>) dst(%arg15 : memref<512x1024xbf16, #tpu.memory_space<vmem>>)
    %c1_i32 = arith.constant 1 : i32
    %79 = tpu.memref_slice %arg17[%c1_i32] : memref<2x!tpu.dma_semaphore, #tpu.memory_space<semaphore_mem>> -> memref<1x!tpu.dma_semaphore, #tpu.memory_space<semaphore_mem>>
    %80 = tpu.memref_squeeze %79 : memref<1x!tpu.dma_semaphore, #tpu.memory_space<semaphore_mem>> -> memref<!tpu.dma_semaphore, #tpu.memory_space<semaphore_mem>>
    tpu.enqueue_dma source(%arg12 : memref<1024x896xbf16, #tpu.memory_space<any>>) target(%arg16 : memref<1024x896xbf16, #tpu.memory_space<vmem>>) target_semaphore(%80 : memref<!tpu.dma_semaphore, #tpu.memory_space<semaphore_mem>>)
    %c0_34 = arith.constant 0 : index
    %c0_35 = arith.constant 0 : index
    %81 = vector.load %arg15[%c0_34, %c0_35] : memref<512x1024xbf16, #tpu.memory_space<vmem>>, vector<512x1024xbf16>
    %82 = arith.truncf %76 : vector<16x512xf32> to vector<16x512xbf16>
    %cst_36 = arith.constant dense<0.000000e+00> : vector<16x1024xf32>
    %83 = tpu.matmul %82, %81, %cst_36 {dimension_numbers = #tpu.dot_dimension_numbers<[1], [0], [0], [1], [0, 0, 1, 1], [], []>} : vector<16x512xbf16>, vector<512x1024xbf16>, vector<16x1024xf32> -> vector<16x1024xf32>
    %84 = vector.broadcast %6 : vector<16x1xf32> to vector<16x1024xf32>
    %85 = arith.mulf %83, %84 : vector<16x1024xf32>
    %cst_37 = arith.constant dense<0.000000e+00> : vector<1024xf32>
    %86 = vector.multi_reduction <add>, %85, %cst_37 [0] : vector<16x1024xf32> to vector<1024xf32>
    %87 = vector.shape_cast %86 : vector<1024xf32> to vector<1x1024xf32>
    %cst_38 = arith.constant 1.250000e-01 : f32
    %88 = vector.broadcast %cst_38 : f32 to vector<1x1024xf32>
    %89 = arith.mulf %87, %88 : vector<1x1024xf32>
    %90 = arith.mulf %85, %83 : vector<16x1024xf32>
    %cst_39 = arith.constant dense<0.000000e+00> : vector<1024xf32>
    %91 = vector.multi_reduction <add>, %90, %cst_39 [0] : vector<16x1024xf32> to vector<1024xf32>
    %92 = vector.shape_cast %91 : vector<1024xf32> to vector<1x1024xf32>
    %cst_40 = arith.constant 1.250000e-01 : f32
    %93 = vector.broadcast %cst_40 : f32 to vector<1x1024xf32>
    %94 = arith.mulf %92, %93 : vector<1x1024xf32>
    %95 = arith.mulf %89, %89 : vector<1x1024xf32>
    %96 = arith.subf %94, %95 : vector<1x1024xf32>
    %cst_41 = arith.constant 0.000000e+00 : f32
    %97 = vector.broadcast %cst_41 : f32 to vector<1x1024xf32>
    %98 = arith.maximumf %96, %97 : vector<1x1024xf32>
    %c0_42 = arith.constant 0 : index
    %c0_43 = arith.constant 0 : index
    %99 = vector.load %arg10[%c0_42, %c0_43] : memref<1x1024xf32, #tpu.memory_space<vmem>>, vector<1x1024xf32>
    %cst_44 = arith.constant 9.99999974E-6 : f32
    %100 = vector.broadcast %cst_44 : f32 to vector<1x1024xf32>
    %101 = arith.addf %98, %100 : vector<1x1024xf32>
    %102 = math.rsqrt %101 : vector<1x1024xf32>
    %103 = arith.mulf %99, %102 : vector<1x1024xf32>
    %c0_45 = arith.constant 0 : index
    %c0_46 = arith.constant 0 : index
    %104 = vector.load %arg11[%c0_45, %c0_46] : memref<1x1024xf32, #tpu.memory_space<vmem>>, vector<1x1024xf32>
    %105 = arith.mulf %89, %103 : vector<1x1024xf32>
    %106 = arith.subf %104, %105 : vector<1x1024xf32>
    %107 = vector.broadcast %103 : vector<1x1024xf32> to vector<16x1024xf32>
    %108 = arith.mulf %83, %107 : vector<16x1024xf32>
    %109 = vector.broadcast %106 : vector<1x1024xf32> to vector<16x1024xf32>
    %110 = arith.addf %108, %109 : vector<16x1024xf32>
    %cst_47 = arith.constant 0.000000e+00 : f32
    %111 = vector.broadcast %cst_47 : f32 to vector<16x1024xf32>
    %112 = arith.maximumf %110, %111 : vector<16x1024xf32>
    %c1_i32_48 = arith.constant 1 : i32
    %113 = tpu.memref_slice %arg17[%c1_i32_48] : memref<2x!tpu.dma_semaphore, #tpu.memory_space<semaphore_mem>> -> memref<1x!tpu.dma_semaphore, #tpu.memory_space<semaphore_mem>>
    %114 = tpu.memref_squeeze %113 : memref<1x!tpu.dma_semaphore, #tpu.memory_space<semaphore_mem>> -> memref<!tpu.dma_semaphore, #tpu.memory_space<semaphore_mem>>
    tpu.wait_dma2 semaphore(%114 : memref<!tpu.dma_semaphore, #tpu.memory_space<semaphore_mem>>) src(%arg12 : memref<1024x896xbf16, #tpu.memory_space<any>>) dst(%arg16 : memref<1024x896xbf16, #tpu.memory_space<vmem>>)
    %c0_49 = arith.constant 0 : index
    %c0_50 = arith.constant 0 : index
    %115 = vector.load %arg16[%c0_49, %c0_50] : memref<1024x896xbf16, #tpu.memory_space<vmem>>, vector<1024x896xbf16>
    %116 = arith.truncf %112 : vector<16x1024xf32> to vector<16x1024xbf16>
    %cst_51 = arith.constant dense<0.000000e+00> : vector<16x896xf32>
    %117 = tpu.matmul %116, %115, %cst_51 {dimension_numbers = #tpu.dot_dimension_numbers<[1], [0], [0], [1], [0, 0, 1, 1], [], []>} : vector<16x1024xbf16>, vector<1024x896xbf16>, vector<16x896xf32> -> vector<16x896xf32>
    %c0_52 = arith.constant 0 : index
    %c0_53 = arith.constant 0 : index
    %118 = vector.load %arg13[%c0_52, %c0_53] : memref<1x896xf32, #tpu.memory_space<vmem>>, vector<1x896xf32>
    %119 = vector.broadcast %118 : vector<1x896xf32> to vector<16x896xf32>
    %120 = arith.addf %117, %119 : vector<16x896xf32>
    %121 = math.tanh %120 : vector<16x896xf32>
    %c0_54 = arith.constant 0 : index
    %c0_55 = arith.constant 0 : index
    %122 = vector.load %arg14[%c0_54, %c0_55] : memref<16x896xf32, #tpu.memory_space<vmem>>, vector<16x896xf32>
    tpu.vector_store %arg14[%c0_54, %c0_55], %121 {strides = array<i32>} : memref<16x896xf32, #tpu.memory_space<vmem>>, vector<16x896xf32>,
    return
  }
}

</mosaic_0001>

<bundles_post_ra>
// kernel: generator_forward.1
= control target key start
LH: loop header
LB: loop body
LE: loop exit
PB: predicated region body
PF: predicated region fallthrough
CT: control target
= control target key end

     0   :  { %19 = vsyncpa [#allocation6], 0  ;;  %s4938_s0 = inlined_call_operand.vmem [shape: f32[16,32], index: 0, kind: input, shape index: {}]   ;;  %s4939_s1 = inlined_call_operand.vmem [shape: f32[16,10], index: 1, kind: input, shape index: {}]   ;;  %s4940_s2 = inlined_call_operand.hbm [shape: bf16[32,256], index: 2, kind: input, shape index: {}]   ;;  %s4941_s3 = inlined_call_operand.hbm [shape: bf16[10,256], index: 3, kind: input, shape index: {}]   ;;  %s4942_s4 = inlined_call_operand.hbm [shape: f32[1,256], index: 4, kind: input, shape index: {}]   ;;  %s4943_s5 = inlined_call_operand.hbm [shape: f32[1,256], index: 5, kind: input, shape index: {}]   ;;  %s4944_s6 = inlined_call_operand.hbm [shape: bf16[256,512], index: 6, kind: input, shape index: {}]   ;;  %s4945_s7 = inlined_call_operand.hbm [shape: f32[1,512], index: 7, kind: input, shape index: {}]   ;;  %s4946_s8 = inlined_call_operand.hbm [shape: f32[1,512], index: 8, kind: input, shape index: {}]   ;;  %s4947_s9 = inlined_call_operand.hbm [shape: bf16[512,1024], index: 9, kind: input, shape index: {}]   ;;  %s4948_s10 = inlined_call_operand.hbm [shape: f32[1,1024], index: 10, kind: input, shape index: {}]   ;;  %s4949_s11 = inlined_call_operand.hbm [shape: f32[1,1024], index: 11, kind: input, shape index: {}]   ;;  %s4950_s12 = inlined_call_operand.hbm [shape: bf16[1024,896], index: 12, kind: input, shape index: {}]   ;;  %s4951_s13 = inlined_call_operand.hbm [shape: f32[1,896], index: 13, kind: input, shape index: {}]   ;;  %s4952_s14 = inlined_call_operand.vmem [shape: f32[16,896], index: 14, kind: output, shape index: {}]  }
   0x1   :  { %20 = vsyncpa [#allocation8], 0 }
   0x2   :  { %21 = vsyncpa [#allocation11], 0 }
   0x3   :  { %22 = vsyncpa [#allocation14], 0 }
   0x4   :  { %23 = vsyncpa [#allocation17], 0 }
   0x5   :  { %24 = vsyncpa [#allocation20], 0  ;;  %s4172_s29 = smov [#allocation7]   ;;  %s4173_s15 = smov [#allocation10]  }
   0x6   :  { %s46_s30 = sshll.u32 %s4172_s29, 4  ;;  %s69_s16 = sshll.u32 %s4173_s15, 4  ;;  %s47_s30 = int_to_ptr.vmem [resolvable:$true] %s46_s30  ;;  %s70_s16 = int_to_ptr.vmem [resolvable:$true] %s69_s16 }
   0x7   :  { %s3936_s19 = scalar_lea.hbm %s4941_s3, 256 }
   0x8   :  { %p3937_p0 = scmp.ne.s32.totalorder %s4941_s3, %s3936_s19  ;;  %p3940_p1 = scmp.lt.u32.totalorder %s3936_s19, %s4941_s3 }
   0xa   :  { %p3942_p2 = pnand %p3940_p1, %p3937_p0 }
   0xc   :  { %3945 = shalt.err (!%p3942_p2)
}
   0xd   :  { %s3946_s24 = scalar_lea.vmem %s47_s30, 256  ;;  %p3951_p4 = scmp.lt.s32.totalorder %s47_s30, %s47_s30 }
   0xe   :  { %p3947_p3 = scmp.ne.s32.totalorder %s47_s30, %s3946_s24  ;;  %p3952_p5 = scmp.lt.s32.totalorder %s3946_s24, %s3946_s24 }
  0x10   :  { %p3953_p6 = por %p3952_p5, %p3951_p4 }
  0x12   :  { %p3954_p7 = pnand %p3953_p6, %p3947_p3 }
  0x14   :  { %3957 = shalt.err (!%p3954_p7)
}
  0x15   :  { %s4174_s25 = smov 128   ;;  %s4175_s26 = smov 8  }
  0x16   :  { %52 = dma.hbm_to_vmem [thread:$0]  %s4941_s3, 256, %s47_s30, [#allocation8], %s4174_s25, %s4174_s25, %s4175_s26  }
  0x17   :  { %s3958_s17 = scalar_lea.hbm %s4943_s5, 32 }
  0x18   :  { %p3959_p8 = scmp.ne.s32.totalorder %s4943_s5, %s3958_s17  ;;  %p3962_p9 = scmp.lt.u32.totalorder %s3958_s17, %s4943_s5 }
  0x1a   :  { %p3964_p10 = pnand %p3962_p9, %p3959_p8 }
  0x1c   :  { %3967 = shalt.err (!%p3964_p10)
}
  0x1d   :  { %s3968_s22 = scalar_lea.vmem %s70_s16, 32  ;;  %p3973_p12 = scmp.lt.s32.totalorder %s70_s16, %s70_s16 }
  0x1e   :  { %p3969_p11 = scmp.ne.s32.totalorder %s70_s16, %s3968_s22  ;;  %p3974_p13 = scmp.lt.s32.totalorder %s3968_s22, %s3968_s22 }
  0x20   :  { %p3975_p0 = por %p3974_p13, %p3973_p12 }
  0x22   :  { %p3976_p1 = pnand %p3975_p0, %p3969_p11 }
  0x24   :  { %3979 = shalt.err (!%p3976_p1)
}
  0x25   :  { %72 = dma.hbm_to_vmem [thread:$0]  %s4943_s5, 32, %s70_s16, [#allocation11]  }
  0x26   :  { %s4176_s23 = smov [#allocation13]   ;;  %s4177_s27 = smov [#allocation16]  }
  0x27   :  { %s91_s24 = sshll.u32 %s4176_s23, 4  ;;  %s111_s28 = sshll.u32 %s4177_s27, 4  ;;  %s92_s24 = int_to_ptr.vmem [resolvable:$true] %s91_s24  ;;  %s112_s28 = int_to_ptr.vmem [resolvable:$true] %s111_s28 }
  0x28   :  { %s3980_s17 = scalar_lea.hbm %s4945_s7, 64 }
  0x29   :  { %p3981_p2 = scmp.ne.s32.totalorder %s4945_s7, %s3980_s17  ;;  %p3984_p3 = scmp.lt.u32.totalorder %s3980_s17, %s4945_s7 }
  0x2b   :  { %p3986_p4 = pnand %p3984_p3, %p3981_p2 }
  0x2d   :  { %3989 = shalt.err (!%p3986_p4)
}
  0x2e   :  { %s3990_s5 = scalar_lea.vmem %s92_s24, 64  ;;  %p3995_p6 = scmp.lt.s32.totalorder %s92_s24, %s92_s24 }
  0x2f   :  { %p3991_p5 = scmp.ne.s32.totalorder %s92_s24, %s3990_s5  ;;  %p3996_p7 = scmp.lt.s32.totalorder %s3990_s5, %s3990_s5 }
  0x31   :  { %p3997_p8 = por %p3996_p7, %p3995_p6 }
  0x33   :  { %p3998_p9 = pnand %p3997_p8, %p3991_p5 }
  0x35   :  { %4001 = shalt.err (!%p3998_p9)
}
  0x36   :  { %94 = dma.hbm_to_vmem [thread:$0]  %s4945_s7, 64, %s92_s24, [#allocation14]  }
  0x37   :  { %s4002_s23 = scalar_lea.hbm %s4948_s10, 128 }
  0x38   :  { %p4003_p10 = scmp.ne.s32.totalorder %s4948_s10, %s4002_s23  ;;  %p4006_p11 = scmp.lt.u32.totalorder %s4002_s23, %s4948_s10 }
  0x3a   :  { %p4008_p12 = pnand %p4006_p11, %p4003_p10 }
  0x3c   :  { %4011 = shalt.err (!%p4008_p12)
}
  0x3d   :  { %s4012_s18 = scalar_lea.vmem %s112_s28, 128  ;;  %p4017_p0 = scmp.lt.s32.totalorder %s112_s28, %s112_s28 }
  0x3e   :  { %p4013_p13 = scmp.ne.s32.totalorder %s112_s28, %s4012_s18  ;;  %p4018_p1 = scmp.lt.s32.totalorder %s4012_s18, %s4012_s18 }
  0x40   :  { %p4019_p2 = por %p4018_p1, %p4017_p0 }
  0x42   :  { %p4020_p3 = pnand %p4019_p2, %p4013_p13 }
  0x44   :  { %4023 = shalt.err (!%p4020_p3)
}
  0x45   :  { %114 = dma.hbm_to_vmem [thread:$0]  %s4948_s10, 128, %s112_s28, [#allocation17]  }
  0x46   :  { %s4178_s19 = smov [#allocation5]   ;;  %s4179_s21 = smov [#allocation9]  }
  0x47   :  { %s34_s20 = sshll.u32 %s4178_s19, 4  ;;  %s59_s5 = sshll.u32 %s4179_s21, 4  ;;  %s35_s20 = int_to_ptr.vmem [resolvable:$true] %s34_s20  ;;  %s60_s5 = int_to_ptr.vmem [resolvable:$true] %s59_s5 }
  0x48   :  { %s4024_s3 = scalar_lea.hbm %s4940_s2, 512 }
  0x49   :  { %p4025_p4 = scmp.ne.s32.totalorder %s4940_s2, %s4024_s3  ;;  %p4028_p5 = scmp.lt.u32.totalorder %s4024_s3, %s4940_s2 }
  0x4b   :  { %p4030_p6 = pnand %p4028_p5, %p4025_p4 }
  0x4d   :  { %4033 = shalt.err (!%p4030_p6)
}
  0x4e   :  { %s4034_s10 = scalar_lea.vmem %s35_s20, 512  ;;  %p4039_p8 = scmp.lt.s32.totalorder %s35_s20, %s35_s20 }
  0x4f   :  { %p4035_p7 = scmp.ne.s32.totalorder %s35_s20, %s4034_s10  ;;  %p4040_p9 = scmp.lt.s32.totalorder %s4034_s10, %s4034_s10 }
  0x51   :  { %p4041_p10 = por %p4040_p9, %p4039_p8 }
  0x53   :  { %p4042_p11 = pnand %p4041_p10, %p4035_p7 }
  0x55   :  { %4045 = shalt.err (!%p4042_p11)
}
  0x56   :  { %40 = dma.hbm_to_vmem [thread:$0]  %s4940_s2, 512, %s35_s20, [#allocation6], %s4174_s25, %s4174_s25, %s4175_s26  }
  0x57   :  { %s4046_s7 = scalar_lea.hbm %s4942_s4, 32 }
  0x58   :  { %p4047_p12 = scmp.ne.s32.totalorder %s4942_s4, %s4046_s7  ;;  %p4050_p13 = scmp.lt.u32.totalorder %s4046_s7, %s4942_s4 }
  0x5a   :  { %p4052_p0 = pnand %p4050_p13, %p4047_p12 }
  0x5c   :  { %4055 = shalt.err (!%p4052_p0)
}
  0x5d   :  { %s4056_s22 = scalar_lea.vmem %s60_s5, 32  ;;  %p4061_p2 = scmp.lt.s32.totalorder %s60_s5, %s60_s5 }
  0x5e   :  { %p4057_p1 = scmp.ne.s32.totalorder %s60_s5, %s4056_s22  ;;  %p4062_p3 = scmp.lt.s32.totalorder %s4056_s22, %s4056_s22 }
  0x60   :  { %p4063_p4 = por %p4062_p3, %p4061_p2 }
  0x62   :  { %p4064_p5 = pnand %p4063_p4, %p4057_p1 }
  0x64   :  { %4067 = shalt.err (!%p4064_p5)
}
  0x65   :  { %62 = dma.hbm_to_vmem [thread:$0]  %s4942_s4, 32, %s60_s5, [#allocation8]  }
  0x66   :  { %s4180_s3 = smov [#allocation12]   ;;  %s4068_s29 = scalar_lea.hbm %s4944_s6, 8192 }
  0x67   :  { %s78_s30 = sshll.u32 %s4180_s3, 4  ;;  %p4069_p6 = scmp.ne.s32.totalorder %s4944_s6, %s4068_s29  ;;  %s79_s30 = int_to_ptr.vmem [resolvable:$true] %s78_s30 }
  0x68   :  { %p4072_p7 = scmp.lt.u32.totalorder %s4068_s29, %s4944_s6 }
  0x6a   :  { %p4074_p8 = pnand %p4072_p7, %p4069_p6 }
  0x6c   :  { %4077 = shalt.err (!%p4074_p8)
}
  0x6d   :  { %s4078_s18 = scalar_lea.vmem %s79_s30, 8192  ;;  %p4083_p10 = scmp.lt.s32.totalorder %s79_s30, %s79_s30 }
  0x6e   :  { %p4079_p9 = scmp.ne.s32.totalorder %s79_s30, %s4078_s18  ;;  %p4084_p11 = scmp.lt.s32.totalorder %s4078_s18, %s4078_s18 }
  0x70   :  { %p4085_p12 = por %p4084_p11, %p4083_p10 }
  0x72   :  { %p4086_p13 = pnand %p4085_p12, %p4079_p9 }
  0x74   :  { %4089 = shalt.err (!%p4086_p13)
}
  0x75   :  { %s4181_s4 = smov 256   ;;  %s4182_s5 = smov 16  }
  0x76   :  { %84 = dma.hbm_to_vmem [thread:$0]  %s4944_s6, 8192, %s79_s30, [#allocation11], %s4181_s4, %s4181_s4, %s4182_s5  }
  0x77   :  { %s4183_s19 = smov [#allocation15]   ;;  %s4184_s16 = smov [#allocation18]  }
  0x78   :  { %s101_s21 = sshll.u32 %s4183_s19, 4  ;;  %s121_s22 = sshll.u32 %s4184_s16, 4  ;;  %s102_s21 = int_to_ptr.vmem [resolvable:$true] %s101_s21  ;;  %s122_s22 = int_to_ptr.vmem [resolvable:$true] %s121_s22 }
  0x79   :  { %s4090_s3 = scalar_lea.hbm %s4946_s8, 64 }
  0x7a   :  { %p4091_p0 = scmp.ne.s32.totalorder %s4946_s8, %s4090_s3  ;;  %p4094_p1 = scmp.lt.u32.totalorder %s4090_s3, %s4946_s8 }
  0x7c   :  { %p4096_p2 = pnand %p4094_p1, %p4091_p0 }
  0x7e   :  { %4099 = shalt.err (!%p4096_p2)
}
  0x7f   :  { %s4100_s6 = scalar_lea.vmem %s102_s21, 64  ;;  %p4105_p4 = scmp.lt.s32.totalorder %s102_s21, %s102_s21 }
  0x80   :  { %p4101_p3 = scmp.ne.s32.totalorder %s102_s21, %s4100_s6  ;;  %p4106_p5 = scmp.lt.s32.totalorder %s4100_s6, %s4100_s6 }
  0x82   :  { %p4107_p6 = por %p4106_p5, %p4105_p4 }
  0x84   :  { %p4108_p7 = pnand %p4107_p6, %p4101_p3 }
  0x86   :  { %4111 = shalt.err (!%p4108_p7)
}
  0x87   :  { %104 = dma.hbm_to_vmem [thread:$0]  %s4946_s8, 64, %s102_s21, [#allocation14]  }
  0x88   :  { %s4112_s18 = scalar_lea.hbm %s4949_s11, 128 }
  0x89   :  { %p4113_p8 = scmp.ne.s32.totalorder %s4949_s11, %s4112_s18  ;;  %p4116_p9 = scmp.lt.u32.totalorder %s4112_s18, %s4949_s11 }
  0x8b   :  { %p4118_p10 = pnand %p4116_p9, %p4113_p8 }
  0x8d   :  { %4121 = shalt.err (!%p4118_p10)
}
  0x8e   :  { %s4122_s19 = scalar_lea.vmem %s122_s22, 128  ;;  %p4127_p12 = scmp.lt.s32.totalorder %s122_s22, %s122_s22 }
  0x8f   :  { %p4123_p11 = scmp.ne.s32.totalorder %s122_s22, %s4122_s19  ;;  %p4128_p13 = scmp.lt.s32.totalorder %s4122_s19, %s4122_s19 }
  0x91   :  { %p4129_p0 = por %p4128_p13, %p4127_p12 }
  0x93   :  { %p4130_p1 = pnand %p4129_p0, %p4123_p11 }
  0x95   :  { %4133 = shalt.err (!%p4130_p1)
}
  0x96   :  { %124 = dma.hbm_to_vmem [thread:$0]  %s4949_s11, 128, %s122_s22, [#allocation17]  }
  0x97   :  { %s4185_s16 = smov [#allocation19]   ;;  %s4134_s23 = scalar_lea.hbm %s4951_s13, 112 }
  0x98   :  { %s131_s2 = sshll.u32 %s4185_s16, 4  ;;  %p4135_p2 = scmp.ne.s32.totalorder %s4951_s13, %s4134_s23  ;;  %s132_s2 = int_to_ptr.vmem [resolvable:$true] %s131_s2 }
  0x99   :  { %p4138_p3 = scmp.lt.u32.totalorder %s4134_s23, %s4951_s13 }
  0x9b   :  { %p4140_p4 = pnand %p4138_p3, %p4135_p2 }
  0x9d   :  { %4143 = shalt.err (!%p4140_p4)
}
  0x9e   :  { %s4144_s30 = scalar_lea.vmem %s132_s2, 112  ;;  %s4148_s11 = scalar_lea.vmem %s132_s2, 128 }
  0x9f   :  { %p4145_p5 = scmp.ne.s32.totalorder %s132_s2, %s4144_s30  ;;  %p4149_p6 = scmp.lt.s32.totalorder %s132_s2, %s132_s2 }
  0xa0   :  { %p4150_p7 = scmp.lt.s32.totalorder %s4148_s11, %s4144_s30 }
  0xa2   :  { %p4151_p8 = por %p4150_p7, %p4149_p6 }
  0xa4   :  { %p4152_p9 = pnand %p4151_p8, %p4145_p5 }
  0xa6   :  { %4155 = shalt.err (!%p4152_p9)
}
  0xa7   :  { %134 = dma.hbm_to_vmem [thread:$0]  %s4951_s13, 112, %s132_s2, [#allocation20]  }
  0xa8   :  { %4156 = dma.done.wait [#allocation6], 512  }
  0xa9   :  { %4157 = vsyncadd [#allocation6], 4294966784 }
  0xaa   :  { %4158 = dma.done.wait [#allocation8], 288  }
  0xab   :  { %4159 = vsyncadd [#allocation8], 4294967008 }
  0xac   :  { %4160 = dma.done.wait [#allocation11], 8224  }
  0xad   :  { %4161 = vsyncadd [#allocation11], 4294959072 }
  0xae   :  { %4162 = dma.done.wait [#allocation14], 128  }
  0xaf   :  { %4163 = vsyncadd [#allocation14], 4294967168 }
  0xb0   :  { %4164 = dma.done.wait [#allocation17], 256  }
  0xb1   :  { %4165 = vsyncadd [#allocation17], 4294967040 }
  0xb2   :  { %4166 = dma.done.wait [#allocation20], 112  }
  0xb3   :  { %4167 = vsyncadd [#allocation20], 4294967184  ;;  %s170_s15 = sld [smem:[#allocation0]]   ;;  %s4186_s17 = smov 1024   ;;  %v4187_v0 = vmov 0   ;;  %vm234_vm0 = vcmask 1044480  }
  0xb4   :  { %182 = sst [smem:[#allocation22]] %s4186_s17  ;;  %273 = vmatprep.mubr.bf16.mxu1 %v4187_v0  ;;  %340 = vmatprep.mubr.bf16.mxu0 %v4187_v0  ;;  %s4188_s13 = smov 64   ;;  %vm230_vm1 = vcmask 80896   ;;  %vm304_vm2 = vcmask 261120  }
  0xb5   :  { %184 = sst [smem:[#allocation22 + $0x1]] %s4186_s17  ;;  %s4189_s18 = smov 2  }
  0xb6   :  { %186 = sst [smem:[#allocation22 + $0x2]] %s4175_s26  ;;  %s4190_s4 = smov [#allocation2]  }
  0xb7   :  { %188 = sst [smem:[#allocation22 + $0x3]] %s4188_s13  ;;  %s178_s5 = sshll.u32 %s4190_s4, 4  ;;  %s179_s5 = int_to_ptr.vmem [resolvable:$true] %s178_s5 }
  0xb8   :  { %190 = sst [smem:[#allocation22 + $0x4]] %s4174_s25  ;;  %s4191_s24 = smov 512  }
  0xb9   :  { %192 = sst [smem:[#allocation22 + $0x5]] %s4189_s18  ;;  %s3510_s7 = sshll.u32 %s170_s15, 26 }
  0xba   :  { %194 = sst [smem:[#allocation22 + $0x6]] %s4191_s24  ;;  %s4407_s19 = sadd.s32 134217728, %s3510_s7 }
  0xbb   :  { %196 = sst [smem:[#allocation22 + $0x7]] %s4188_s13  ;;  %s4192_s8 = smov 4  }
  0xbc   :  { %198 = sst [smem:[#allocation22 + $0x8]] %s4192_s8  ;;  %s4193_s26 = smov [#allocation4]  }
  0xbd   :  { %s4194_s21 = smov [#allocation21]  }
  0xbe   :  { %200 = dma.general %s4947_s9, 32768, %s179_s5, %s4193_s26, %s4194_s21, [#allocation22], %s4407_s19, 0  }
  0xbf   :  { %v3775_v1 = vld [vmem:[#allocation5 + $0x4] ss:$8 sps:$4 sm:$0xff]   ;;  %v3779_v3 = vld [vmem:[#allocation5] ss:$8 sps:$4 sm:$0xff]   ;;  %v3781_v5 = vld [vmem:[#allocation5 + $0x14] ss:$8 sps:$4 sm:$0xff]  }
  0xc0   :  { %v3777_v2 = vld [vmem:[#allocation7 + $0x4] ss:$8 sps:$4 sm:$0x1f]   ;;  %308 = vmatprep.subr.bf16.mxu0 %v3775_v1  ;;  %v3780_v4 = vld [vmem:[#allocation7] ss:$8 sps:$4 sm:$0x1f]  }
  0xc1   :  { %3514 = vmatprep.subr.msk.bf16.mxu1 %vm234_vm0, %v3777_v2  ;;  %v217_v6 = vld [vmem:[%s4939_s1] sm:$0xff]  ;;  %309 = vmatpush1.bf16.msra.mxu0 %v3779_v3  ;;  %v236_v7 = vsel %vm234_vm0, %v3780_v4, 0  ;;  %v218_v8 = vld [vmem:[%s4939_s1 + $0x8] sm:$0xff]  ;;  %v3783_v9 = vld [vmem:[#allocation5 + $0x10] ss:$8 sps:$4 sm:$0xff]  }
  0xc2   :  { %v210_v10 = vld [vmem:[%s4938_s0] sm:$0xff]  ;;  %242 = vmatpush1.bf16.msra.mxu1 %v236_v7  ;;  %310 = vmatprep.subr.bf16.mxu0 %v3781_v5  ;;  %v221_v11 = vpack.c.bf16 %v218_v8, %v217_v6  ;;  %v211_v12 = vld [vmem:[%s4938_s0 + $0x8] sm:$0xff] }
  0xc3   :  { %v216_v13 = vpack.c.bf16 %v211_v12, %v210_v10  ;;  %v3786_v14 = vld [vmem:[#allocation12 + $0x4] ss:$16 sps:$4 sm:$0xff]   ;;  %v3784_v15 = vld [vmem:[#allocation12] ss:$16 sps:$4 sm:$0xff]   ;;  %v3834_v46 = vld [vmem:[#allocation12 + $0xc] ss:$16 sps:$4 sm:$0xff]  }
  0xc4   :  { %v3789_v16 = vld [vmem:[#allocation12 + $0x24] ss:$16 sps:$4 sm:$0xff]   ;;  %v3787_v17 = vld [vmem:[#allocation12 + $0x20] ss:$16 sps:$4 sm:$0xff]  }
  0xc5   :  { %3515 = vmatmul.mubr.msk.bf16.vlgmr.msra.gmra.mrb[0].mxu1 %vm230_vm1, %v221_v11  ;;  %311 = vmatpush1.bf16.msra.mxu0 %v3783_v9  ;;  %v3792_v18 = vld [vmem:[#allocation12 + $0x44] ss:$16 sps:$4 sm:$0xff]   ;;  %v3790_v19 = vld [vmem:[#allocation12 + $0x40] ss:$16 sps:$4 sm:$0xff]  }
  0xc6   :  { %863 = vmatprep.subr.bf16.mxu0 %v3786_v14  ;;  %v3795_v20 = vld [vmem:[#allocation12 + $0x64] ss:$16 sps:$4 sm:$0xff]   ;;  %v3793_v21 = vld [vmem:[#allocation12 + $0x60] ss:$16 sps:$4 sm:$0xff]  }
  0xc7   :  { %v3798_v22 = vld [vmem:[#allocation12 + $0x84] ss:$16 sps:$4 sm:$0xff]   ;;  %v3796_v23 = vld [vmem:[#allocation12 + $0x80] ss:$16 sps:$4 sm:$0xff]  }
  0xc8   :  { %3520 = vmatmul.mubr.msk.bf16.vlgmr.msra.gmra.mrb[0].mxu0 %vm304_vm2, %v216_v13  ;;  %v3801_v24 = vld [vmem:[#allocation12 + $0xa4] ss:$16 sps:$4 sm:$0xff]   ;;  %v3799_v25 = vld [vmem:[#allocation12 + $0xa0] ss:$16 sps:$4 sm:$0xff]  }
  0xc9   :  { %864 = vmatpush1.bf16.msra.mxu0 %v3784_v15  ;;  %v3804_v26 = vld [vmem:[#allocation12 + $0xc4] ss:$16 sps:$4 sm:$0xff]   ;;  %v3802_v27 = vld [vmem:[#allocation12 + $0xc0] ss:$16 sps:$4 sm:$0xff]  }
  0xca   :  { %865 = vmatprep.subr.bf16.mxu0 %v3789_v16  ;;  %v3807_v28 = vld [vmem:[#allocation12 + $0xe4] ss:$16 sps:$4 sm:$0xff]   ;;  %v3805_v29 = vld [vmem:[#allocation12 + $0xe0] ss:$16 sps:$4 sm:$0xff]  }
  0xcb   :  { %v3810_v30 = vld [vmem:[#allocation12 + $0x104] ss:$16 sps:$4 sm:$0xff]   ;;  %v3808_v31 = vld [vmem:[#allocation12 + $0x100] ss:$16 sps:$4 sm:$0xff]  }
  0xcc   :  { %v3813_v32 = vld [vmem:[#allocation12 + $0x124] ss:$16 sps:$4 sm:$0xff]   ;;  %v3811_v33 = vld [vmem:[#allocation12 + $0x120] ss:$16 sps:$4 sm:$0xff]  }
  0xcd   :  { %866 = vmatpush1.bf16.msra.mxu0 %v3787_v17  ;;  %v3816_v34 = vld [vmem:[#allocation12 + $0x144] ss:$16 sps:$4 sm:$0xff]   ;;  %v3814_v35 = vld [vmem:[#allocation12 + $0x140] ss:$16 sps:$4 sm:$0xff]  }
  0xce   :  { %867 = vmatprep.subr.bf16.mxu0 %v3792_v18  ;;  %v3819_v36 = vld [vmem:[#allocation12 + $0x164] ss:$16 sps:$4 sm:$0xff]   ;;  %v3817_v37 = vld [vmem:[#allocation12 + $0x160] ss:$16 sps:$4 sm:$0xff]  }
  0xcf   :  { %v3822_v38 = vld [vmem:[#allocation12 + $0x184] ss:$16 sps:$4 sm:$0xff]   ;;  %v3820_v39 = vld [vmem:[#allocation12 + $0x180] ss:$16 sps:$4 sm:$0xff]  }
  0xd0   :  { %v3825_v40 = vld [vmem:[#allocation12 + $0x1a4] ss:$16 sps:$4 sm:$0xff]   ;;  %v3823_v41 = vld [vmem:[#allocation12 + $0x1a0] ss:$16 sps:$4 sm:$0xff]  }
  0xd1   :  { %868 = vmatpush1.bf16.msra.mxu0 %v3790_v19  ;;  %v3828_v42 = vld [vmem:[#allocation12 + $0x1c4] ss:$16 sps:$4 sm:$0xff]   ;;  %v3826_v43 = vld [vmem:[#allocation12 + $0x1c0] ss:$16 sps:$4 sm:$0xff]  }
  0xd2   :  { %869 = vmatprep.subr.bf16.mxu0 %v3795_v20  ;;  %v3831_v44 = vld [vmem:[#allocation12 + $0x1e4] ss:$16 sps:$4 sm:$0xff]   ;;  %v3829_v45 = vld [vmem:[#allocation12 + $0x1e0] ss:$16 sps:$4 sm:$0xff]  }
  0xd5   :  { %870 = vmatpush1.bf16.msra.mxu0 %v3793_v21 }
  0xd6   :  { %871 = vmatprep.subr.bf16.mxu0 %v3798_v22 }
  0xd9   :  { %872 = vmatpush1.bf16.msra.mxu0 %v3796_v23 }
  0xda   :  { %873 = vmatprep.subr.bf16.mxu0 %v3801_v24 }
  0xdd   :  { %874 = vmatpush1.bf16.msra.mxu0 %v3799_v25 }
  0xde   :  { %875 = vmatprep.subr.bf16.mxu0 %v3804_v26 }
  0xe1   :  { %876 = vmatpush1.bf16.msra.mxu0 %v3802_v27 }
  0xe2   :  { %877 = vmatprep.subr.bf16.mxu0 %v3807_v28 }
  0xe5   :  { %878 = vmatpush1.bf16.msra.mxu0 %v3805_v29 }
  0xe6   :  { %879 = vmatprep.subr.bf16.mxu0 %v3810_v30 }
  0xe9   :  { %880 = vmatpush1.bf16.msra.mxu0 %v3808_v31 }
  0xea   :  { %881 = vmatprep.subr.bf16.mxu0 %v3813_v32 }
  0xed   :  { %882 = vmatpush1.bf16.msra.mxu0 %v3811_v33 }
  0xee   :  { %883 = vmatprep.subr.bf16.mxu0 %v3816_v34 }
  0xf1   :  { %884 = vmatpush1.bf16.msra.mxu0 %v3814_v35 }
  0xf2   :  { %885 = vmatprep.subr.bf16.mxu0 %v3819_v36 }
  0xf5   :  { %886 = vmatpush1.bf16.msra.mxu0 %v3817_v37 }
  0xf6   :  { %887 = vmatprep.subr.bf16.mxu0 %v3822_v38 }
  0xf9   :  { %888 = vmatpush1.bf16.msra.mxu0 %v3820_v39 }
  0xfa   :  { %889 = vmatprep.subr.bf16.mxu0 %v3825_v40 }
  0xfd   :  { %890 = vmatpush1.bf16.msra.mxu0 %v3823_v41  ;;  %v4195_v41 = vmov 1966171168  }
  0xfe   :  { %891 = vmatprep.subr.bf16.mxu0 %v3828_v42  ;;  %v406_v42 = vunpack.c.l.s4 %v4195_v41  ;;  %v3868_v41 = vld [vmem:[#allocation12 + $0x188] ss:$16 sps:$4 sm:$0xff]  }
 0x101   :  { %892 = vmatpush1.bf16.msra.mxu0 %v3826_v43  ;;  %v408_v43 = vlaneseq }
 0x102   :  { %893 = vmatprep.subr.bf16.mxu0 %v3831_v44  ;;  %v407_v44 = vunpack.c.0.s8 %v406_v42  ;;  %v3873_v42 = vld [vmem:[#allocation12 + $0x1ac] ss:$16 sps:$4 sm:$0xff]  }
 0x105   :  { %894 = vmatpush1.bf16.msra.mxu0 %v3829_v45  ;;  %v4445_v45 = vshrl.u32 %v408_v43, 7  ;;  %v3871_v43 = vld [vmem:[#allocation12 + $0x1a8] ss:$16 sps:$4 sm:$0xff]  }
 0x106   :  { %906 = vmatprep.subr.bf16.mxu0 %v3834_v46 }
 0x198   :  { %v275_v47 = vpop.f32.mrb[0].mxu1 }
 0x199   :  { %v277_v48 = vpop.f32.mrb[1].mxu1 }
 0x19a   :  { %v279_v49 = vpop.f32.mrb[2].mxu1 }
 0x19b   :  { %v281_v50 = vpop.f32.mrb[3].mxu1  ;;  %v342_v51 = vpop.f32.mrb[0].mxu0 }
 0x19c   :  { %v4427_v52 = vadd.f32 %v342_v51, %v275_v47  ;;  %v344_v53 = vpop.f32.mrb[1].mxu0  ;;  %v4448_v47 = vsub.s32 %v407_v44, %v4445_v45  ;;  %v397_v51 = vld [vmem:[#allocation9] sm:$0x3] }
 0x19d   :  { %v4429_v54 = vadd.f32 %v344_v53, %v277_v48  ;;  %v346_v55 = vpop.f32.mrb[2].mxu0  ;;  %v3876_v44 = vld [vmem:[#allocation12 + $0x1cc] ss:$16 sps:$4 sm:$0xff]  }
 0x19e   :  { %v4431_v56 = vadd.f32 %v346_v55, %v279_v49  ;;  %v348_v57 = vpop.f32.mrb[3].mxu0  ;;  %v371_v61 = vmul.f32 %v4427_v52, %v4427_v52  ;;  %v4453_v55 = vsub.s32 0, %v4445_v45 }
 0x19f   :  { %v4433_v58 = vadd.f32 %v348_v57, %v281_v50  ;;  %v372_v0 = vmul.f32 %v4429_v54, %v4429_v54  ;;  %v4456_v57 = vsub.s32 1, %v4445_v45 }
 0x1a0   :  { %v353_v59 = vmul.f32 0.0, %v4431_v56 }
 0x1a1   :  { %v354_v60 = vmul.f32 0.0, %v4433_v58 }
 0x1a2   :  { %v355_v62 = vadd.f32 %v353_v59, %v4427_v52  ;;  %v373_v63 = vmul.f32 %v353_v59, %v4431_v56 }
 0x1a3   :  { %v362_v1 = vadd.f32 %v354_v60, %v4429_v54  ;;  %v374_v2 = vmul.f32 %v354_v60, %v4433_v58 }
 0x1a4   :  { %v356_v3 = vrot.slane %v355_v62, 4  ;;  %v375_v4 = vadd.f32 %v373_v63, %v371_v61 }
 0x1a5   :  { %v363_v5 = vrot.slane %v362_v1, 4  ;;  %v382_v6 = vadd.f32 %v374_v2, %v372_v0 }
 0x1a6   :  { %v357_v7 = vadd.f32 %v356_v3, %v355_v62  ;;  %v376_v8 = vrot.slane %v375_v4, 4 }
 0x1a7   :  { %v364_v9 = vadd.f32 %v363_v5, %v362_v1  ;;  %v383_v10 = vrot.slane %v382_v6, 4 }
 0x1a8   :  { %v358_v11 = vrot.slane %v357_v7, 2  ;;  %v377_v12 = vadd.f32 %v376_v8, %v375_v4 }
 0x1a9   :  { %v365_v13 = vrot.slane %v364_v9, 2  ;;  %v384_v14 = vadd.f32 %v383_v10, %v382_v6  ;;  %v421_v6 = vld [vmem:[#allocation10] sm:$0x3] }
 0x1aa   :  { %v359_v15 = vadd.f32 %v358_v11, %v357_v7  ;;  %v378_v16 = vrot.slane %v377_v12, 2 }
 0x1ab   :  { %v366_v17 = vadd.f32 %v365_v13, %v364_v9  ;;  %v385_v18 = vrot.slane %v384_v14, 2 }
 0x1ac   :  { %v360_v19 = vrot.slane %v359_v15, 1  ;;  %v379_v20 = vadd.f32 %v378_v16, %v377_v12  ;;  %v3832_v16 = vld [vmem:[#allocation12 + $0x8] ss:$16 sps:$4 sm:$0xff]  }
 0x1ad   :  { %v367_v21 = vrot.slane %v366_v17, 1  ;;  %v386_v22 = vadd.f32 %v385_v18, %v384_v14  ;;  %v3837_v18 = vld [vmem:[#allocation12 + $0x2c] ss:$16 sps:$4 sm:$0xff]  }
 0x1ae   :  { %v361_v23 = vadd.f32 %v360_v19, %v359_v15  ;;  %v380_v24 = vrot.slane %v379_v20, 1  ;;  %v3835_v19 = vld [vmem:[#allocation12 + $0x28] ss:$16 sps:$4 sm:$0xff]  }
 0x1af   :  { %v368_v25 = vadd.f32 %v367_v21, %v366_v17  ;;  %v387_v26 = vrot.slane %v386_v22, 1  ;;  %v3838_v21 = vld [vmem:[#allocation12 + $0x48] ss:$16 sps:$4 sm:$0xff]  }
 0x1b0   :  { %v369_v27 = vmul.f32 0.125, %v361_v23  ;;  %v381_v28 = vadd.f32 %v380_v24, %v379_v20  ;;  %v3840_v20 = vld [vmem:[#allocation12 + $0x4c] ss:$16 sps:$4 sm:$0xff]   ;;  %v3841_v23 = vld [vmem:[#allocation12 + $0x68] ss:$16 sps:$4 sm:$0xff]  }
 0x1b1   :  { %v370_v29 = vmul.f32 0.125, %v368_v25  ;;  %v388_v30 = vadd.f32 %v387_v26, %v386_v22  ;;  %v3843_v22 = vld [vmem:[#allocation12 + $0x6c] ss:$16 sps:$4 sm:$0xff]   ;;  %v3844_v25 = vld [vmem:[#allocation12 + $0x88] ss:$16 sps:$4 sm:$0xff]  }
 0x1b2   :  { %v389_v31 = vmul.f32 0.125, %v381_v28  ;;  %v391_v32 = vmul.f32 %v369_v27, %v369_v27  ;;  %v3846_v24 = vld [vmem:[#allocation12 + $0x8c] ss:$16 sps:$4 sm:$0xff]  }
 0x1b3   :  { %v390_v33 = vmul.f32 0.125, %v388_v30  ;;  %v392_v34 = vmul.f32 %v370_v29, %v370_v29  ;;  %v3849_v26 = vld [vmem:[#allocation12 + $0xac] ss:$16 sps:$4 sm:$0xff]  }
 0x1b4   :  { %v393_v35 = vsub.f32 %v389_v31, %v391_v32  ;;  %v3852_v28 = vld [vmem:[#allocation12 + $0xcc] ss:$16 sps:$4 sm:$0xff]   ;;  %v3853_v31 = vld [vmem:[#allocation12 + $0xe8] ss:$16 sps:$4 sm:$0xff]  }
 0x1b5   :  { %v394_v36 = vsub.f32 %v390_v33, %v392_v34  ;;  %v3855_v30 = vld [vmem:[#allocation12 + $0xec] ss:$16 sps:$4 sm:$0xff]   ;;  %v3856_v33 = vld [vmem:[#allocation12 + $0x108] ss:$16 sps:$4 sm:$0xff]  }
 0x1b6   :  { %v395_v37 = vmax.f32 %v393_v35, 0.0  ;;  %v3858_v32 = vld [vmem:[#allocation12 + $0x10c] ss:$16 sps:$4 sm:$0xff]   ;;  %v3859_v35 = vld [vmem:[#allocation12 + $0x128] ss:$16 sps:$4 sm:$0xff]  }
 0x1b7   :  { %v396_v38 = vmax.f32 %v394_v36, 0.0  ;;  %v3861_v34 = vld [vmem:[#allocation12 + $0x12c] ss:$16 sps:$4 sm:$0xff]  }
 0x1b8   :  { %v398_v39 = vadd.f32 1e-05, %v395_v37  ;;  %v3864_v36 = vld [vmem:[#allocation12 + $0x14c] ss:$16 sps:$4 sm:$0xff]   ;;  %v3862_v37 = vld [vmem:[#allocation12 + $0x148] ss:$16 sps:$4 sm:$0xff]  }
 0x1b9   :  { %v399_v40 = vadd.f32 1e-05, %v396_v38  ;;  %v3867_v38 = vld [vmem:[#allocation12 + $0x16c] ss:$16 sps:$4 sm:$0xff]  }
 0x1ba   :  { %3880 = vrsqrt.f32 %v398_v39  ;;  %v3865_v39 = vld [vmem:[#allocation12 + $0x168] ss:$16 sps:$4 sm:$0xff]  }
 0x1bb   :  { %3882 = vrsqrt.f32 %v399_v40  ;;  %v3870_v40 = vld [vmem:[#allocation12 + $0x18c] ss:$16 sps:$4 sm:$0xff]  }
 0x1c4   :  { %v3881_v46 = vpop.eup %3880 }
 0x1c5   :  { %v3883_v48 = vpop.eup %3882 }
 0x1c6   :  { %v404_v49 = vcombine.low %v3881_v46, %v3883_v48  ;;  %v3874_v46 = vld [vmem:[#allocation12 + $0x1c8] ss:$16 sps:$4 sm:$0xff]   ;;  %v3879_v48 = vld [vmem:[#allocation12 + $0x1ec] ss:$16 sps:$4 sm:$0xff]  }
 0x1c8   :  { %v411_v50 = vrot.slane %v404_v49, %v4448_v47  ;;  %v3877_v49 = vld [vmem:[#allocation12 + $0x1e8] ss:$16 sps:$4 sm:$0xff]  }
 0x1ca   :  { %v418_v53 = vrot.slane %v411_v50, %v4448_v47 }
 0x1cc   :  { %v420_v59 = vmul.f32 %v418_v53, %v397_v51 }
 0x1ce   :  { %v426_v60 = vrot.slane %v420_v59, %v4453_v55  ;;  %v430_v61 = vrot.slane %v420_v59, %v4456_v57 }
 0x1d0   :  { %v433_v62 = vmul.f32 %v426_v60, %v369_v27  ;;  %v434_v63 = vmul.f32 %v430_v61, %v370_v29  ;;  %v457_v0 = vmul.f32 %v430_v61, %v4433_v58  ;;  %v455_v1 = vmul.f32 %v430_v61, %v4429_v54  ;;  %v3847_v27 = vld [vmem:[#allocation12 + $0xa8] ss:$16 sps:$4 sm:$0xff]  }
 0x1d1   :  { %v454_v2 = vmul.f32 %v426_v60, %v4427_v52  ;;  %v456_v3 = vmul.f32 %v426_v60, %v4431_v56  ;;  %v3850_v29 = vld [vmem:[#allocation12 + $0xc8] ss:$16 sps:$4 sm:$0xff]  }
 0x1d2   :  { %v437_v4 = vcombine.low %v433_v62, %v434_v63 }
 0x1d4   :  { %v444_v5 = vrot.slane %v437_v4, %v4448_v47 }
 0x1d6   :  { %v451_v7 = vrot.slane %v444_v5, %v4448_v47 }
 0x1d8   :  { %v453_v8 = vsub.f32 %v421_v6, %v451_v7 }
 0x1da   :  { %v466_v9 = vrot.slane %v453_v8, %v4456_v57  ;;  %v462_v10 = vrot.slane %v453_v8, %v4453_v55 }
 0x1dc   :  { %v470_v11 = vadd.f32 %v466_v9, %v455_v1  ;;  %v472_v12 = vadd.f32 %v466_v9, %v457_v0  ;;  %v469_v58 = vadd.f32 %v462_v10, %v454_v2  ;;  %v471_v13 = vadd.f32 %v462_v10, %v456_v3 }
 0x1de   :  { %v474_v54 = vmax.f32 %v470_v11, 0.0  ;;  %v476_v14 = vmax.f32 %v472_v12, 0.0  ;;  %v473_v52 = vmax.f32 %v469_v58, 0.0  ;;  %v475_v15 = vmax.f32 %v471_v13, 0.0 }
 0x1e0   :  { %v542_v56 = vpack.c.bf16 %v476_v14, %v474_v54  ;;  %v4468_v17 = vpack.c.bf16 %v475_v15, %v473_v52 }
 0x1e2   :  { %895 = vmatprep.mubr.bf16.mxu0 %v542_v56 }
 0x1e3   :  { %896 = vmatmul.mubr.bf16.vlgmr.msra.gmra.mrb[4].mxu0 %v4468_v17 }
 0x1e4   :  { %907 = vmatpush1.bf16.msra.mxu0 %v3832_v16  ;;  %938 = vmatprep.mubr.bf16.mxu0 %v542_v56 }
 0x1e5   :  { %908 = vmatprep.subr.bf16.mxu0 %v3837_v18 }
 0x1e8   :  { %909 = vmatpush1.bf16.msra.mxu0 %v3835_v19 }
 0x1e9   :  { %910 = vmatprep.subr.bf16.mxu0 %v3840_v20 }
 0x1ec   :  { %911 = vmatpush1.bf16.msra.mxu0 %v3838_v21 }
 0x1ed   :  { %912 = vmatprep.subr.bf16.mxu0 %v3843_v22 }
 0x1f0   :  { %913 = vmatpush1.bf16.msra.mxu0 %v3841_v23 }
 0x1f1   :  { %914 = vmatprep.subr.bf16.mxu0 %v3846_v24 }
 0x1f4   :  { %915 = vmatpush1.bf16.msra.mxu0 %v3844_v25 }
 0x1f5   :  { %916 = vmatprep.subr.bf16.mxu0 %v3849_v26 }
 0x1f8   :  { %917 = vmatpush1.bf16.msra.mxu0 %v3847_v27 }
 0x1f9   :  { %918 = vmatprep.subr.bf16.mxu0 %v3852_v28 }
 0x1fc   :  { %919 = vmatpush1.bf16.msra.mxu0 %v3850_v29 }
 0x1fd   :  { %920 = vmatprep.subr.bf16.mxu0 %v3855_v30 }
 0x200   :  { %921 = vmatpush1.bf16.msra.mxu0 %v3853_v31 }
 0x201   :  { %922 = vmatprep.subr.bf16.mxu0 %v3858_v32 }
 0x204   :  { %923 = vmatpush1.bf16.msra.mxu0 %v3856_v33 }
 0x205   :  { %924 = vmatprep.subr.bf16.mxu0 %v3861_v34 }
 0x208   :  { %925 = vmatpush1.bf16.msra.mxu0 %v3859_v35 }
 0x209   :  { %926 = vmatprep.subr.bf16.mxu0 %v3864_v36 }
 0x20c   :  { %927 = vmatpush1.bf16.msra.mxu0 %v3862_v37 }
 0x20d   :  { %928 = vmatprep.subr.bf16.mxu0 %v3867_v38 }
 0x210   :  { %929 = vmatpush1.bf16.msra.mxu0 %v3865_v39 }
 0x211   :  { %930 = vmatprep.subr.bf16.mxu0 %v3870_v40 }
 0x214   :  { %931 = vmatpush1.bf16.msra.mxu0 %v3868_v41 }
 0x215   :  { %932 = vmatprep.subr.bf16.mxu0 %v3873_v42 }
 0x218   :  { %933 = vmatpush1.bf16.msra.mxu0 %v3871_v43 }
 0x219   :  { %934 = vmatprep.subr.bf16.mxu0 %v3876_v44 }
 0x21c   :  { %935 = vmatpush1.bf16.msra.mxu0 %v3874_v46 }
 0x21d   :  { %936 = vmatprep.subr.bf16.mxu0 %v3879_v48 }
 0x220   :  { %937 = vmatpush1.bf16.msra.mxu0 %v3877_v49 }
 0x223   :  { %939 = vmatmul.mubr.bf16.vlgmr.msra.gmra.mrb[8].mxu0 %v4468_v17 }
 0x2b6   :  { %v4472_v50 = vpop.f32.mrb[4].mxu0 }
 0x2b7   :  { %v4474_v51 = vpop.f32.mrb[5].mxu0  ;;  %v989_v62 = vmul.f32 %v4472_v50, %v4472_v50 }
 0x2b8   :  { %v4476_v53 = vpop.f32.mrb[6].mxu0  ;;  %v990_v1 = vmul.f32 %v4474_v51, %v4474_v51 }
 0x2b9   :  { %v953_v59 = vmul.f32 0.0, %v4476_v53  ;;  %v4479_v60 = vpop.f32.mrb[7].mxu0 }
 0x2ba   :  { %v954_v61 = vmul.f32 0.0, %v4479_v60 }
 0x2bb   :  { %v957_v63 = vadd.f32 %v953_v59, %v4472_v50  ;;  %v993_v0 = vmul.f32 %v953_v59, %v4476_v53 }
 0x2bc   :  { %v964_v2 = vadd.f32 %v954_v61, %v4474_v51  ;;  %v994_v3 = vmul.f32 %v954_v61, %v4479_v60 }
 0x2bd   :  { %v958_v4 = vrot.slane %v957_v63, 4  ;;  %v997_v5 = vadd.f32 %v993_v0, %v989_v62 }
 0x2be   :  { %v965_v6 = vrot.slane %v964_v2, 4  ;;  %v1004_v7 = vadd.f32 %v994_v3, %v990_v1 }
 0x2bf   :  { %v959_v8 = vadd.f32 %v958_v4, %v957_v63  ;;  %v998_v9 = vrot.slane %v997_v5, 4 }
 0x2c0   :  { %v966_v10 = vadd.f32 %v965_v6, %v964_v2  ;;  %v1005_v11 = vrot.slane %v1004_v7, 4 }
 0x2c1   :  { %v960_v12 = vrot.slane %v959_v8, 2  ;;  %v999_v58 = vadd.f32 %v998_v9, %v997_v5 }
 0x2c2   :  { %v967_v13 = vrot.slane %v966_v10, 2  ;;  %v1006_v54 = vadd.f32 %v1005_v11, %v1004_v7 }
 0x2c3   :  { %v961_v14 = vadd.f32 %v960_v12, %v959_v8  ;;  %v1000_v52 = vrot.slane %v999_v58, 2 }
 0x2c4   :  { %v968_v15 = vadd.f32 %v967_v13, %v966_v10  ;;  %v1007_v56 = vrot.slane %v1006_v54, 2 }
 0x2c5   :  { %v962_v16 = vrot.slane %v961_v14, 1  ;;  %v1001_v17 = vadd.f32 %v1000_v52, %v999_v58 }
 0x2c6   :  { %v969_v18 = vrot.slane %v968_v15, 1  ;;  %v1008_v19 = vadd.f32 %v1007_v56, %v1006_v54 }
 0x2c7   :  { %v963_v20 = vadd.f32 %v962_v16, %v961_v14  ;;  %v1002_v21 = vrot.slane %v1001_v17, 1 }
 0x2c8   :  { %v970_v22 = vadd.f32 %v969_v18, %v968_v15  ;;  %v1009_v23 = vrot.slane %v1008_v19, 1 }
 0x2c9   :  { %v4490_v24 = vmul.f32 0.125, %v963_v20  ;;  %v1003_v25 = vadd.f32 %v1002_v21, %v1001_v17 }
 0x2ca   :  { %v4492_v26 = vmul.f32 0.125, %v970_v22  ;;  %v1010_v27 = vadd.f32 %v1009_v23, %v1008_v19 }
 0x2cb   :  { %v1025_v28 = vmul.f32 0.125, %v1003_v25  ;;  %v1029_v29 = vmul.f32 %v4490_v24, %v4490_v24 }
 0x2cc   :  { %v1026_v30 = vmul.f32 0.125, %v1010_v27  ;;  %v1030_v31 = vmul.f32 %v4492_v26, %v4492_v26 }
 0x2cd   :  { %v1033_v32 = vsub.f32 %v1025_v28, %v1029_v29 }
 0x2ce   :  { %v1034_v33 = vsub.f32 %v1026_v30, %v1030_v31 }
 0x2cf   :  { %v1037_v34 = vmax.f32 %v1033_v32, 0.0 }
 0x2d0   :  { %v1038_v35 = vmax.f32 %v1034_v33, 0.0 }
 0x2d1   :  { %v1042_v36 = vadd.f32 1e-05, %v1037_v34 }
 0x2d2   :  { %v1043_v37 = vadd.f32 1e-05, %v1038_v35 }
 0x2d3   :  { %3884 = vrsqrt.f32 %v1042_v36 }
 0x2d4   :  { %3886 = vrsqrt.f32 %v1043_v37 }
 0x2dd   :  { %v3885_v38 = vpop.eup %3884 }
 0x2de   :  { %v3887_v39 = vpop.eup %3886 }
 0x2df   :  { %v1054_v40 = vcombine.low %v3885_v38, %v3887_v39 }
 0x2f6   :  { %v4498_v41 = vpop.f32.mrb[8].mxu0 }
 0x2f7   :  { %v4500_v42 = vpop.f32.mrb[9].mxu0  ;;  %v991_v49 = vmul.f32 %v4498_v41, %v4498_v41 }
 0x2f8   :  { %v4502_v43 = vpop.f32.mrb[10].mxu0  ;;  %v992_v62 = vmul.f32 %v4500_v42, %v4500_v42 }
 0x2f9   :  { %v955_v44 = vmul.f32 0.0, %v4502_v43  ;;  %v4505_v46 = vpop.f32.mrb[11].mxu0 }
 0x2fa   :  { %v956_v48 = vmul.f32 0.0, %v4505_v46 }
 0x2fb   :  { %v971_v59 = vadd.f32 %v955_v44, %v4498_v41  ;;  %v995_v61 = vmul.f32 %v955_v44, %v4502_v43  ;;  %v1062_v44 = vrot.slane %v1054_v40, %v4448_v47 }
 0x2fc   :  { %v978_v63 = vadd.f32 %v956_v48, %v4500_v42  ;;  %v996_v0 = vmul.f32 %v956_v48, %v4505_v46 }
 0x2fd   :  { %v972_v1 = vrot.slane %v971_v59, 4  ;;  %v1011_v2 = vadd.f32 %v995_v61, %v991_v49 }
 0x2fe   :  { %v979_v3 = vrot.slane %v978_v63, 4  ;;  %v1018_v4 = vadd.f32 %v996_v0, %v992_v62  ;;  %v4520_v62 = vsub.s32 2, %v4445_v45 }
 0x2ff   :  { %v973_v5 = vadd.f32 %v972_v1, %v971_v59  ;;  %v1012_v6 = vrot.slane %v1011_v2, 4  ;;  %v1041_v59 = vld [vmem:[#allocation13] sm:$0xf] }
 0x300   :  { %v980_v7 = vadd.f32 %v979_v3, %v978_v63  ;;  %v1019_v8 = vrot.slane %v1018_v4, 4  ;;  %v4523_v63 = vsub.s32 3, %v4445_v45 }
 0x301   :  { %v974_v9 = vrot.slane %v973_v5, 2  ;;  %v1013_v10 = vadd.f32 %v1012_v6, %v1011_v2 }
 0x302   :  { %v981_v11 = vrot.slane %v980_v7, 2  ;;  %v1020_v12 = vadd.f32 %v1019_v8, %v1018_v4 }
 0x303   :  { %v975_v58 = vadd.f32 %v974_v9, %v973_v5  ;;  %v1014_v13 = vrot.slane %v1013_v10, 2 }
 0x304   :  { %v982_v54 = vadd.f32 %v981_v11, %v980_v7  ;;  %v1021_v14 = vrot.slane %v1020_v12, 2 }
 0x305   :  { %v976_v52 = vrot.slane %v975_v58, 1  ;;  %v1015_v15 = vadd.f32 %v1014_v13, %v1013_v10 }
 0x306   :  { %v983_v56 = vrot.slane %v982_v54, 1  ;;  %v1022_v16 = vadd.f32 %v1021_v14, %v1020_v12 }
 0x307   :  { %v977_v17 = vadd.f32 %v976_v52, %v975_v58  ;;  %v1016_v18 = vrot.slane %v1015_v15, 1 }
 0x308   :  { %v984_v19 = vadd.f32 %v983_v56, %v982_v54  ;;  %v1023_v20 = vrot.slane %v1022_v16, 1 }
 0x309   :  { %v987_v21 = vmul.f32 0.125, %v977_v17  ;;  %v1017_v22 = vadd.f32 %v1016_v18, %v1015_v15 }
 0x30a   :  { %v988_v23 = vmul.f32 0.125, %v984_v19  ;;  %v1024_v25 = vadd.f32 %v1023_v20, %v1022_v16 }
 0x30b   :  { %v1027_v27 = vmul.f32 0.125, %v1017_v22  ;;  %v1031_v28 = vmul.f32 %v987_v21, %v987_v21 }
 0x30c   :  { %v1028_v29 = vmul.f32 0.125, %v1024_v25  ;;  %v1032_v30 = vmul.f32 %v988_v23, %v988_v23 }
 0x30d   :  { %v1035_v31 = vsub.f32 %v1027_v27, %v1031_v28 }
 0x30e   :  { %v1036_v32 = vsub.f32 %v1028_v29, %v1032_v30 }
 0x30f   :  { %v1039_v33 = vmax.f32 %v1035_v31, 0.0 }
 0x310   :  { %v1040_v34 = vmax.f32 %v1036_v32, 0.0 }
 0x311   :  { %v1044_v35 = vadd.f32 1e-05, %v1039_v33 }
 0x312   :  { %v1045_v36 = vadd.f32 1e-05, %v1040_v34 }
 0x313   :  { %3888 = vrsqrt.f32 %v1044_v35 }
 0x314   :  { %3890 = vrsqrt.f32 %v1045_v36 }
 0x31d   :  { %v3889_v37 = vpop.eup %3888 }
 0x31e   :  { %v3891_v38 = vpop.eup %3890 }
 0x31f   :  { %v1055_v39 = vcombine.low %v3889_v37, %v3891_v38 }
 0x321   :  { %v1069_v48 = vrot.slane %v1055_v39, %v4448_v47 }
 0x323   :  { %v1070_v49 = vcombine.low %v1062_v44, %v1069_v48 }
 0x325   :  { %v1077_v61 = vrot.slane %v1070_v49, %v4448_v47 }
 0x327   :  { %v1079_v0 = vmul.f32 %v1077_v61, %v1041_v59 }
 0x329   :  { %v1085_v1 = vrot.slane %v1079_v0, %v4453_v55  ;;  %v1089_v2 = vrot.slane %v1079_v0, %v4456_v57  ;;  %v1093_v3 = vrot.slane %v1079_v0, %v4520_v62  ;;  %v1097_v40 = vrot.slane %v1079_v0, %v4523_v63 }
 0x32b   :  { %v1102_v4 = vmul.f32 %v1085_v1, %v4490_v24  ;;  %v1103_v5 = vmul.f32 %v1089_v2, %v4492_v26  ;;  %v1104_v6 = vmul.f32 %v1093_v3, %v987_v21  ;;  %v1105_v7 = vmul.f32 %v1097_v40, %v988_v23 }
 0x32c   :  { %v1136_v8 = vmul.f32 %v1085_v1, %v4472_v50  ;;  %v1137_v9 = vmul.f32 %v1089_v2, %v4474_v51  ;;  %v1138_v10 = vmul.f32 %v1093_v3, %v4498_v41  ;;  %v1139_v11 = vmul.f32 %v1097_v40, %v4500_v42  ;;  %v1080_v51 = vld [vmem:[#allocation15] sm:$0xf] }
 0x32d   :  { %v1110_v12 = vcombine.low %v1102_v4, %v1103_v5  ;;  %v1111_v58 = vcombine.low %v1104_v6, %v1105_v7  ;;  %v1140_v13 = vmul.f32 %v1085_v1, %v4476_v53  ;;  %v1141_v54 = vmul.f32 %v1089_v2, %v4479_v60 }
 0x32e   :  { %v1142_v24 = vmul.f32 %v1093_v3, %v4502_v43  ;;  %v1143_v26 = vmul.f32 %v1097_v40, %v4505_v46 }
 0x32f   :  { %v1118_v14 = vrot.slane %v1110_v12, %v4448_v47  ;;  %v1125_v50 = vrot.slane %v1111_v58, %v4448_v47 }
 0x331   :  { %v1126_v52 = vcombine.low %v1118_v14, %v1125_v50 }
 0x333   :  { %v1133_v41 = vrot.slane %v1126_v52, %v4448_v47 }
 0x335   :  { %v1135_v15 = vsub.f32 %v1080_v51, %v1133_v41 }
 0x337   :  { %v1148_v42 = vrot.slane %v1135_v15, %v4453_v55  ;;  %v1152_v56 = vrot.slane %v1135_v15, %v4456_v57  ;;  %v1156_v53 = vrot.slane %v1135_v15, %v4520_v62  ;;  %v1160_v60 = vrot.slane %v1135_v15, %v4523_v63 }
 0x339   :  { %v4546_v43 = vadd.f32 %v1148_v42, %v1136_v8  ;;  %v1166_v46 = vadd.f32 %v1152_v56, %v1137_v9  ;;  %v4548_v16 = vadd.f32 %v1156_v53, %v1138_v10  ;;  %v4550_v17 = vadd.f32 %v1160_v60, %v1139_v11 }
 0x33a   :  { %v4552_v18 = vadd.f32 %v1148_v42, %v1140_v13  ;;  %v1170_v19 = vadd.f32 %v1152_v56, %v1141_v54  ;;  %v4554_v20 = vadd.f32 %v1156_v53, %v1142_v24  ;;  %v4556_v21 = vadd.f32 %v1160_v60, %v1143_v26 }
 0x33b   :  { %v1173_v22 = vmax.f32 %v4546_v43, 0.0  ;;  %v1174_v23 = vmax.f32 %v1166_v46, 0.0  ;;  %v1175_v25 = vmax.f32 %v4548_v16, 0.0  ;;  %v1176_v27 = vmax.f32 %v4550_v17, 0.0 }
 0x33c   :  { %v1177_v28 = vmax.f32 %v4552_v18, 0.0  ;;  %v1178_v29 = vmax.f32 %v1170_v19, 0.0  ;;  %v1179_v30 = vmax.f32 %v4554_v20, 0.0  ;;  %v1180_v31 = vmax.f32 %v4556_v21, 0.0 }
 0x33d   :  { %4168 = dma.done.wait [#allocation4], 32768 }
 0x33e   :  { %4169 = vsyncadd [#allocation4], 4294934528  ;;  %v4564_v32 = vpack.c.bf16 %v1178_v29, %v1174_v23  ;;  %s4196_s0 = smov 896   ;;  %s4197_s1 = smov 7  }
 0x33f   :  { %1201 = sst [smem:[#allocation24]] %s4196_s0  ;;  %s4198_s30 = smov [#allocation3]  }
 0x340   :  { %1203 = sst [smem:[#allocation24 + $0x1]] %s4196_s0  ;;  %1512 = vmatprep.mubr.bf16.mxu1 %v4564_v32  ;;  %1598 = vmatprep.mubr.bf16.mxu0 %v4564_v32  ;;  %s1197_s11 = sshll.u32 %s4198_s30, 4  ;;  %s1198_s11 = int_to_ptr.vmem [resolvable:$true] %s1197_s11 }
 0x341   :  { %1205 = sst [smem:[#allocation24 + $0x2]] %s4197_s1  ;;  %s4199_s22 = smov 448  }
 0x342   :  { %1207 = sst [smem:[#allocation24 + $0x3]] %s4188_s13  ;;  %s4200_s28 = smov [#allocation4 + $0x1]  }
 0x343   :  { %1209 = sst [smem:[#allocation24 + $0x4]] %s4174_s25  ;;  %s4201_s15 = smov [#allocation23]  }
 0x344   :  { %1211 = sst [smem:[#allocation24 + $0x5]] %s4189_s18 }
 0x345   :  { %1213 = sst [smem:[#allocation24 + $0x6]] %s4199_s22 }
 0x346   :  { %1215 = sst [smem:[#allocation24 + $0x7]] %s4188_s13 }
 0x347   :  { %1217 = sst [smem:[#allocation24 + $0x8]] %s4192_s8 }
 0x348   :  { %1219 = dma.general %s4950_s12, 57344, %s1198_s11, %s4200_s28, %s4201_s15, [#allocation24], %s4407_s19, 0  }
 0x349   :  { %v1221_v33 = vld [vmem:[#allocation2 + $0x8] sm:$0xff]  ;;  %v1223_v34 = vld [vmem:[#allocation2 + $0x18] sm:$0xff]  ;;  %v1220_v35 = vld [vmem:[#allocation2] sm:$0xff] }
 0x34a   :  { %1480 = vmatprep.subr.bf16.mxu1 %v1221_v33  ;;  %1566 = vmatprep.subr.bf16.mxu0 %v1223_v34  ;;  %v1222_v36 = vld [vmem:[#allocation2 + $0x10] sm:$0xff]  ;;  %v1229_v37 = vld [vmem:[#allocation2 + $0x48] sm:$0xff]  ;;  %v1231_v38 = vld [vmem:[#allocation2 + $0x58] sm:$0xff] }
 0x34b   :  { %1481 = vmatpush1.bf16.msra.mxu1 %v1220_v35  ;;  %1567 = vmatpush1.bf16.msra.mxu0 %v1222_v36  ;;  %v1228_v39 = vld [vmem:[#allocation2 + $0x40] sm:$0xff]  ;;  %v1230_v44 = vld [vmem:[#allocation2 + $0x50] sm:$0xff]  ;;  %v1237_v48 = vld [vmem:[#allocation2 + $0x88] sm:$0xff] }
 0x34c   :  { %1482 = vmatprep.subr.bf16.mxu1 %v1229_v37  ;;  %1568 = vmatprep.subr.bf16.mxu0 %v1231_v38  ;;  %v1239_v49 = vld [vmem:[#allocation2 + $0x98] sm:$0xff]  ;;  %v1236_v59 = vld [vmem:[#allocation2 + $0x80] sm:$0xff]  ;;  %v1238_v61 = vld [vmem:[#allocation2 + $0x90] sm:$0xff] }
 0x34d   :  { %v1245_v0 = vld [vmem:[#allocation2 + $0xc8] sm:$0xff]  ;;  %v1247_v1 = vld [vmem:[#allocation2 + $0xd8] sm:$0xff]  ;;  %v1244_v2 = vld [vmem:[#allocation2 + $0xc0] sm:$0xff] }
 0x34e   :  { %v1246_v3 = vld [vmem:[#allocation2 + $0xd0] sm:$0xff]  ;;  %v1253_v40 = vld [vmem:[#allocation2 + $0x108] sm:$0xff]  ;;  %v1255_v4 = vld [vmem:[#allocation2 + $0x118] sm:$0xff] }
 0x34f   :  { %1483 = vmatpush1.bf16.msra.mxu1 %v1228_v39  ;;  %1569 = vmatpush1.bf16.msra.mxu0 %v1230_v44  ;;  %v1252_v5 = vld [vmem:[#allocation2 + $0x100] sm:$0xff]  ;;  %v1254_v6 = vld [vmem:[#allocation2 + $0x110] sm:$0xff]  ;;  %v1261_v7 = vld [vmem:[#allocation2 + $0x148] sm:$0xff] }
 0x350   :  { %1484 = vmatprep.subr.bf16.mxu1 %v1237_v48  ;;  %1570 = vmatprep.subr.bf16.mxu0 %v1239_v49  ;;  %v1263_v8 = vld [vmem:[#allocation2 + $0x158] sm:$0xff]  ;;  %v1260_v9 = vld [vmem:[#allocation2 + $0x140] sm:$0xff]  ;;  %v1262_v10 = vld [vmem:[#allocation2 + $0x150] sm:$0xff] }
 0x351   :  { %v1269_v11 = vld [vmem:[#allocation2 + $0x188] sm:$0xff]  ;;  %v1271_v12 = vld [vmem:[#allocation2 + $0x198] sm:$0xff]  ;;  %v1268_v58 = vld [vmem:[#allocation2 + $0x180] sm:$0xff] }
 0x352   :  { %v1270_v13 = vld [vmem:[#allocation2 + $0x190] sm:$0xff]  ;;  %v1277_v54 = vld [vmem:[#allocation2 + $0x1c8] sm:$0xff]  ;;  %v1279_v24 = vld [vmem:[#allocation2 + $0x1d8] sm:$0xff] }
 0x353   :  { %1485 = vmatpush1.bf16.msra.mxu1 %v1236_v59  ;;  %1571 = vmatpush1.bf16.msra.mxu0 %v1238_v61  ;;  %v1276_v26 = vld [vmem:[#allocation2 + $0x1c0] sm:$0xff]  ;;  %v1278_v14 = vld [vmem:[#allocation2 + $0x1d0] sm:$0xff]  ;;  %v1285_v50 = vld [vmem:[#allocation2 + $0x208] sm:$0xff] }
 0x354   :  { %1486 = vmatprep.subr.bf16.mxu1 %v1245_v0  ;;  %1572 = vmatprep.subr.bf16.mxu0 %v1247_v1  ;;  %v1287_v52 = vld [vmem:[#allocation2 + $0x218] sm:$0xff]  ;;  %v1284_v51 = vld [vmem:[#allocation2 + $0x200] sm:$0xff]  ;;  %v1286_v41 = vld [vmem:[#allocation2 + $0x210] sm:$0xff] }
 0x355   :  { %v1293_v15 = vld [vmem:[#allocation2 + $0x248] sm:$0xff]  ;;  %v1295_v42 = vld [vmem:[#allocation2 + $0x258] sm:$0xff]  ;;  %v1292_v56 = vld [vmem:[#allocation2 + $0x240] sm:$0xff] }
 0x356   :  { %v1294_v53 = vld [vmem:[#allocation2 + $0x250] sm:$0xff]  ;;  %v1301_v60 = vld [vmem:[#allocation2 + $0x288] sm:$0xff]  ;;  %v1303_v46 = vld [vmem:[#allocation2 + $0x298] sm:$0xff] }
 0x357   :  { %1487 = vmatpush1.bf16.msra.mxu1 %v1244_v2  ;;  %1573 = vmatpush1.bf16.msra.mxu0 %v1246_v3  ;;  %v1300_v19 = vld [vmem:[#allocation2 + $0x280] sm:$0xff]  ;;  %v1302_v23 = vld [vmem:[#allocation2 + $0x290] sm:$0xff]  ;;  %v1309_v29 = vld [vmem:[#allocation2 + $0x2c8] sm:$0xff] }
 0x358   :  { %1488 = vmatprep.subr.bf16.mxu1 %v1253_v40  ;;  %1574 = vmatprep.subr.bf16.mxu0 %v1255_v4  ;;  %v1311_v33 = vld [vmem:[#allocation2 + $0x2d8] sm:$0xff]  ;;  %v1308_v34 = vld [vmem:[#allocation2 + $0x2c0] sm:$0xff]  ;;  %v1310_v35 = vld [vmem:[#allocation2 + $0x2d0] sm:$0xff] }
 0x359   :  { %v1317_v36 = vld [vmem:[#allocation2 + $0x308] sm:$0xff]  ;;  %v1319_v37 = vld [vmem:[#allocation2 + $0x318] sm:$0xff]  ;;  %v1316_v38 = vld [vmem:[#allocation2 + $0x300] sm:$0xff] }
 0x35a   :  { %v1318_v39 = vld [vmem:[#allocation2 + $0x310] sm:$0xff]  ;;  %v1325_v44 = vld [vmem:[#allocation2 + $0x348] sm:$0xff]  ;;  %v1327_v48 = vld [vmem:[#allocation2 + $0x358] sm:$0xff] }
 0x35b   :  { %1489 = vmatpush1.bf16.msra.mxu1 %v1252_v5  ;;  %1575 = vmatpush1.bf16.msra.mxu0 %v1254_v6  ;;  %v1324_v49 = vld [vmem:[#allocation2 + $0x340] sm:$0xff]  ;;  %v1326_v59 = vld [vmem:[#allocation2 + $0x350] sm:$0xff]  ;;  %v1333_v61 = vld [vmem:[#allocation2 + $0x388] sm:$0xff] }
 0x35c   :  { %1490 = vmatprep.subr.bf16.mxu1 %v1261_v7  ;;  %1576 = vmatprep.subr.bf16.mxu0 %v1263_v8  ;;  %v1335_v0 = vld [vmem:[#allocation2 + $0x398] sm:$0xff]  ;;  %v1332_v1 = vld [vmem:[#allocation2 + $0x380] sm:$0xff]  ;;  %v1334_v2 = vld [vmem:[#allocation2 + $0x390] sm:$0xff]  ;;  %v4581_v8 = vpack.c.bf16 %v1177_v28, %v1173_v22 }
 0x35d   :  { %v1341_v3 = vld [vmem:[#allocation2 + $0x3c8] sm:$0xff]  ;;  %v1343_v40 = vld [vmem:[#allocation2 + $0x3d8] sm:$0xff]  ;;  %v1340_v4 = vld [vmem:[#allocation2 + $0x3c0] sm:$0xff] }
 0x35e   :  { %v1342_v5 = vld [vmem:[#allocation2 + $0x3d0] sm:$0xff]  ;;  %v1349_v6 = vld [vmem:[#allocation2 + $0x408] sm:$0xff]  ;;  %v1351_v7 = vld [vmem:[#allocation2 + $0x418] sm:$0xff] }
 0x35f   :  { %1491 = vmatpush1.bf16.msra.mxu1 %v1260_v9  ;;  %1577 = vmatpush1.bf16.msra.mxu0 %v1262_v10  ;;  %v1348_v9 = vld [vmem:[#allocation2 + $0x400] sm:$0xff]  ;;  %v1350_v10 = vld [vmem:[#allocation2 + $0x410] sm:$0xff]  ;;  %v1365_v22 = vld [vmem:[#allocation2 + $0x488] sm:$0xff] }
 0x360   :  { %1492 = vmatprep.subr.bf16.mxu1 %v1269_v11  ;;  %1578 = vmatprep.subr.bf16.mxu0 %v1271_v12  ;;  %v1357_v11 = vld [vmem:[#allocation2 + $0x448] sm:$0xff]  ;;  %v1359_v12 = vld [vmem:[#allocation2 + $0x458] sm:$0xff]  ;;  %v1356_v43 = vld [vmem:[#allocation2 + $0x440] sm:$0xff] }
 0x361   :  { %v1358_v18 = vld [vmem:[#allocation2 + $0x450] sm:$0xff]  ;;  %v1367_v28 = vld [vmem:[#allocation2 + $0x498] sm:$0xff]  ;;  %v1364_v17 = vld [vmem:[#allocation2 + $0x480] sm:$0xff] }
 0x362   :  { %v1366_v21 = vld [vmem:[#allocation2 + $0x490] sm:$0xff]  ;;  %v1232_v16 = vld [vmem:[#allocation2 + $0x60] sm:$0xff] }
 0x363   :  { %1493 = vmatpush1.bf16.msra.mxu1 %v1268_v58  ;;  %1579 = vmatpush1.bf16.msra.mxu0 %v1270_v13  ;;  %v4587_v58 = vpack.c.bf16 %v1180_v31, %v1176_v27  ;;  %v1373_v27 = vld [vmem:[#allocation2 + $0x4c8] sm:$0xff]  ;;  %v1375_v31 = vld [vmem:[#allocation2 + $0x4d8] sm:$0xff]  ;;  %v1372_v13 = vld [vmem:[#allocation2 + $0x4c0] sm:$0xff] }
 0x364   :  { %1494 = vmatprep.subr.bf16.mxu1 %v1277_v54  ;;  %1580 = vmatprep.subr.bf16.mxu0 %v1279_v24  ;;  %v1374_v54 = vld [vmem:[#allocation2 + $0x4d0] sm:$0xff]  ;;  %v1381_v24 = vld [vmem:[#allocation2 + $0x508] sm:$0xff] }
 0x365   :  { %v1234_v20 = vld [vmem:[#allocation2 + $0x70] sm:$0xff] }
 0x367   :  { %1495 = vmatpush1.bf16.msra.mxu1 %v1276_v26  ;;  %1581 = vmatpush1.bf16.msra.mxu0 %v1278_v14  ;;  %v1383_v26 = vld [vmem:[#allocation2 + $0x518] sm:$0xff]  ;;  %v1380_v14 = vld [vmem:[#allocation2 + $0x500] sm:$0xff] }
 0x368   :  { %1496 = vmatprep.subr.bf16.mxu1 %v1285_v50  ;;  %1582 = vmatprep.subr.bf16.mxu0 %v1287_v52  ;;  %v1382_v50 = vld [vmem:[#allocation2 + $0x510] sm:$0xff]  ;;  %v1389_v52 = vld [vmem:[#allocation2 + $0x548] sm:$0xff] }
 0x36b   :  { %1497 = vmatpush1.bf16.msra.mxu1 %v1284_v51  ;;  %1583 = vmatpush1.bf16.msra.mxu0 %v1286_v41  ;;  %v1391_v51 = vld [vmem:[#allocation2 + $0x558] sm:$0xff]  ;;  %v1388_v41 = vld [vmem:[#allocation2 + $0x540] sm:$0xff] }
 0x36c   :  { %1498 = vmatprep.subr.bf16.mxu1 %v1293_v15  ;;  %1584 = vmatprep.subr.bf16.mxu0 %v1295_v42  ;;  %v1390_v15 = vld [vmem:[#allocation2 + $0x550] sm:$0xff]  ;;  %v1397_v42 = vld [vmem:[#allocation2 + $0x588] sm:$0xff] }
 0x36f   :  { %1499 = vmatpush1.bf16.msra.mxu1 %v1292_v56  ;;  %1585 = vmatpush1.bf16.msra.mxu0 %v1294_v53  ;;  %v1399_v56 = vld [vmem:[#allocation2 + $0x598] sm:$0xff]  ;;  %v1396_v53 = vld [vmem:[#allocation2 + $0x580] sm:$0xff] }
 0x370   :  { %1500 = vmatprep.subr.bf16.mxu1 %v1301_v60  ;;  %1586 = vmatprep.subr.bf16.mxu0 %v1303_v46  ;;  %v1398_v60 = vld [vmem:[#allocation2 + $0x590] sm:$0xff]  ;;  %v1405_v46 = vld [vmem:[#allocation2 + $0x5c8] sm:$0xff] }
 0x373   :  { %1501 = vmatpush1.bf16.msra.mxu1 %v1300_v19  ;;  %1587 = vmatpush1.bf16.msra.mxu0 %v1302_v23  ;;  %v1407_v19 = vld [vmem:[#allocation2 + $0x5d8] sm:$0xff]  ;;  %v1404_v23 = vld [vmem:[#allocation2 + $0x5c0] sm:$0xff] }
 0x374   :  { %1502 = vmatprep.subr.bf16.mxu1 %v1309_v29  ;;  %1588 = vmatprep.subr.bf16.mxu0 %v1311_v33  ;;  %v1406_v29 = vld [vmem:[#allocation2 + $0x5d0] sm:$0xff]  ;;  %v1413_v33 = vld [vmem:[#allocation2 + $0x608] sm:$0xff] }
 0x377   :  { %1503 = vmatpush1.bf16.msra.mxu1 %v1308_v34  ;;  %1589 = vmatpush1.bf16.msra.mxu0 %v1310_v35  ;;  %v1415_v34 = vld [vmem:[#allocation2 + $0x618] sm:$0xff]  ;;  %v1412_v35 = vld [vmem:[#allocation2 + $0x600] sm:$0xff] }
 0x378   :  { %1504 = vmatprep.subr.bf16.mxu1 %v1317_v36  ;;  %1590 = vmatprep.subr.bf16.mxu0 %v1319_v37  ;;  %v1414_v36 = vld [vmem:[#allocation2 + $0x610] sm:$0xff]  ;;  %v1421_v37 = vld [vmem:[#allocation2 + $0x648] sm:$0xff] }
 0x37b   :  { %1505 = vmatpush1.bf16.msra.mxu1 %v1316_v38  ;;  %1591 = vmatpush1.bf16.msra.mxu0 %v1318_v39  ;;  %v1423_v38 = vld [vmem:[#allocation2 + $0x658] sm:$0xff]  ;;  %v1420_v39 = vld [vmem:[#allocation2 + $0x640] sm:$0xff] }
 0x37c   :  { %1506 = vmatprep.subr.bf16.mxu1 %v1325_v44  ;;  %1592 = vmatprep.subr.bf16.mxu0 %v1327_v48  ;;  %v1422_v44 = vld [vmem:[#allocation2 + $0x650] sm:$0xff]  ;;  %v1429_v48 = vld [vmem:[#allocation2 + $0x688] sm:$0xff] }
 0x37f   :  { %1507 = vmatpush1.bf16.msra.mxu1 %v1324_v49  ;;  %1593 = vmatpush1.bf16.msra.mxu0 %v1326_v59  ;;  %v1431_v49 = vld [vmem:[#allocation2 + $0x698] sm:$0xff]  ;;  %v1428_v59 = vld [vmem:[#allocation2 + $0x680] sm:$0xff] }
 0x380   :  { %1508 = vmatprep.subr.bf16.mxu1 %v1333_v61  ;;  %1594 = vmatprep.subr.bf16.mxu0 %v1335_v0  ;;  %v1430_v61 = vld [vmem:[#allocation2 + $0x690] sm:$0xff]  ;;  %v1437_v0 = vld [vmem:[#allocation2 + $0x6c8] sm:$0xff] }
 0x383   :  { %1509 = vmatpush1.bf16.msra.mxu1 %v1332_v1  ;;  %1595 = vmatpush1.bf16.msra.mxu0 %v1334_v2  ;;  %v1439_v1 = vld [vmem:[#allocation2 + $0x6d8] sm:$0xff]  ;;  %v1436_v2 = vld [vmem:[#allocation2 + $0x6c0] sm:$0xff] }
 0x384   :  { %1510 = vmatprep.subr.bf16.mxu1 %v1341_v3  ;;  %1596 = vmatprep.subr.bf16.mxu0 %v1343_v40  ;;  %v1438_v3 = vld [vmem:[#allocation2 + $0x6d0] sm:$0xff]  ;;  %v1445_v40 = vld [vmem:[#allocation2 + $0x708] sm:$0xff] }
 0x387   :  { %1511 = vmatpush1.bf16.msra.mxu1 %v1340_v4  ;;  %1597 = vmatpush1.bf16.msra.mxu0 %v1342_v5  ;;  %v1447_v4 = vld [vmem:[#allocation2 + $0x718] sm:$0xff]  ;;  %v1444_v5 = vld [vmem:[#allocation2 + $0x700] sm:$0xff] }
 0x388   :  { %1523 = vmatprep.subr.bf16.mxu1 %v1349_v6  ;;  %1609 = vmatprep.subr.bf16.mxu0 %v1351_v7  ;;  %v1446_v6 = vld [vmem:[#allocation2 + $0x710] sm:$0xff]  ;;  %v1453_v7 = vld [vmem:[#allocation2 + $0x748] sm:$0xff] }
 0x38a   :  { %1513 = vmatmul.mubr.bf16.vlgmr.msra.gmra.mrb[4].mxu1 %v4581_v8  ;;  %1599 = vmatmul.mubr.bf16.vlgmr.msra.gmra.mrb[12].mxu0 %v4581_v8 }
 0x38b   :  { %1524 = vmatpush1.bf16.msra.mxu1 %v1348_v9  ;;  %1610 = vmatpush1.bf16.msra.mxu0 %v1350_v10  ;;  %v1455_v9 = vld [vmem:[#allocation2 + $0x758] sm:$0xff]  ;;  %v1452_v10 = vld [vmem:[#allocation2 + $0x740] sm:$0xff] }
 0x38c   :  { %1525 = vmatprep.subr.bf16.mxu1 %v1357_v11  ;;  %1611 = vmatprep.subr.bf16.mxu0 %v1359_v12  ;;  %v1454_v11 = vld [vmem:[#allocation2 + $0x750] sm:$0xff]  ;;  %v1461_v12 = vld [vmem:[#allocation2 + $0x788] sm:$0xff] }
 0x38d   :  { %1555 = vmatprep.mubr.bf16.mxu1 %v4587_v58  ;;  %1641 = vmatprep.mubr.bf16.mxu0 %v4587_v58 }
 0x38f   :  { %1526 = vmatpush1.bf16.msra.mxu1 %v1356_v43  ;;  %1612 = vmatpush1.bf16.msra.mxu0 %v1358_v18  ;;  %v1463_v43 = vld [vmem:[#allocation2 + $0x798] sm:$0xff]  ;;  %v1460_v18 = vld [vmem:[#allocation2 + $0x780] sm:$0xff] }
 0x390   :  { %1527 = vmatprep.subr.bf16.mxu1 %v1365_v22  ;;  %1613 = vmatprep.subr.bf16.mxu0 %v1367_v28  ;;  %v1462_v22 = vld [vmem:[#allocation2 + $0x790] sm:$0xff]  ;;  %v1469_v28 = vld [vmem:[#allocation2 + $0x7c8] sm:$0xff] }
 0x393   :  { %1528 = vmatpush1.bf16.msra.mxu1 %v1364_v17  ;;  %1614 = vmatpush1.bf16.msra.mxu0 %v1366_v21  ;;  %v1471_v17 = vld [vmem:[#allocation2 + $0x7d8] sm:$0xff]  ;;  %v1468_v21 = vld [vmem:[#allocation2 + $0x7c0] sm:$0xff] }
 0x394   :  { %1529 = vmatprep.subr.bf16.mxu1 %v1373_v27  ;;  %1615 = vmatprep.subr.bf16.mxu0 %v1375_v31  ;;  %v1470_v27 = vld [vmem:[#allocation2 + $0x7d0] sm:$0xff]  ;;  %v1225_v31 = vld [vmem:[#allocation2 + $0x28] sm:$0xff] }
 0x397   :  { %1530 = vmatpush1.bf16.msra.mxu1 %v1372_v13  ;;  %1616 = vmatpush1.bf16.msra.mxu0 %v1374_v54  ;;  %v1227_v13 = vld [vmem:[#allocation2 + $0x38] sm:$0xff]  ;;  %v4597_v54 = vpack.c.bf16 %v1179_v30, %v1175_v25  ;;  %v1241_v25 = vld [vmem:[#allocation2 + $0xa8] sm:$0xff] }
 0x398   :  { %1531 = vmatprep.subr.bf16.mxu1 %v1381_v24  ;;  %1617 = vmatprep.subr.bf16.mxu0 %v1383_v26  ;;  %v1224_v24 = vld [vmem:[#allocation2 + $0x20] sm:$0xff]  ;;  %v1226_v26 = vld [vmem:[#allocation2 + $0x30] sm:$0xff]  ;;  %v1243_v30 = vld [vmem:[#allocation2 + $0xb8] sm:$0xff] }
 0x39b   :  { %1532 = vmatpush1.bf16.msra.mxu1 %v1380_v14  ;;  %1618 = vmatpush1.bf16.msra.mxu0 %v1382_v50  ;;  %v1233_v14 = vld [vmem:[#allocation2 + $0x68] sm:$0xff]  ;;  %v1235_v50 = vld [vmem:[#allocation2 + $0x78] sm:$0xff] }
 0x39c   :  { %1533 = vmatprep.subr.bf16.mxu1 %v1389_v52  ;;  %1619 = vmatprep.subr.bf16.mxu0 %v1391_v51  ;;  %v1240_v52 = vld [vmem:[#allocation2 + $0xa0] sm:$0xff]  ;;  %v1242_v51 = vld [vmem:[#allocation2 + $0xb0] sm:$0xff] }
 0x39f   :  { %1534 = vmatpush1.bf16.msra.mxu1 %v1388_v41  ;;  %1620 = vmatpush1.bf16.msra.mxu0 %v1390_v15  ;;  %v1249_v41 = vld [vmem:[#allocation2 + $0xe8] sm:$0xff]  ;;  %v1251_v15 = vld [vmem:[#allocation2 + $0xf8] sm:$0xff] }
 0x3a0   :  { %1535 = vmatprep.subr.bf16.mxu1 %v1397_v42  ;;  %1621 = vmatprep.subr.bf16.mxu0 %v1399_v56  ;;  %v1248_v42 = vld [vmem:[#allocation2 + $0xe0] sm:$0xff]  ;;  %v1250_v56 = vld [vmem:[#allocation2 + $0xf0] sm:$0xff] }
 0x3a3   :  { %1536 = vmatpush1.bf16.msra.mxu1 %v1396_v53  ;;  %1622 = vmatpush1.bf16.msra.mxu0 %v1398_v60  ;;  %v1257_v53 = vld [vmem:[#allocation2 + $0x128] sm:$0xff]  ;;  %v1259_v60 = vld [vmem:[#allocation2 + $0x138] sm:$0xff] }
 0x3a4   :  { %1537 = vmatprep.subr.bf16.mxu1 %v1405_v46  ;;  %1623 = vmatprep.subr.bf16.mxu0 %v1407_v19  ;;  %v1258_v46 = vld [vmem:[#allocation2 + $0x130] sm:$0xff]  ;;  %v1265_v19 = vld [vmem:[#allocation2 + $0x168] sm:$0xff] }
 0x3a7   :  { %1538 = vmatpush1.bf16.msra.mxu1 %v1404_v23  ;;  %1624 = vmatpush1.bf16.msra.mxu0 %v1406_v29  ;;  %v1267_v23 = vld [vmem:[#allocation2 + $0x178] sm:$0xff]  ;;  %v1264_v29 = vld [vmem:[#allocation2 + $0x160] sm:$0xff] }
 0x3a8   :  { %1539 = vmatprep.subr.bf16.mxu1 %v1413_v33  ;;  %1625 = vmatprep.subr.bf16.mxu0 %v1415_v34  ;;  %v1266_v33 = vld [vmem:[#allocation2 + $0x170] sm:$0xff]  ;;  %v1273_v34 = vld [vmem:[#allocation2 + $0x1a8] sm:$0xff] }
 0x3ab   :  { %1540 = vmatpush1.bf16.msra.mxu1 %v1412_v35  ;;  %1626 = vmatpush1.bf16.msra.mxu0 %v1414_v36  ;;  %v1275_v35 = vld [vmem:[#allocation2 + $0x1b8] sm:$0xff]  ;;  %v1272_v36 = vld [vmem:[#allocation2 + $0x1a0] sm:$0xff] }
 0x3ac   :  { %1541 = vmatprep.subr.bf16.mxu1 %v1421_v37  ;;  %1627 = vmatprep.subr.bf16.mxu0 %v1423_v38  ;;  %v1274_v37 = vld [vmem:[#allocation2 + $0x1b0] sm:$0xff]  ;;  %v1281_v38 = vld [vmem:[#allocation2 + $0x1e8] sm:$0xff] }
 0x3af   :  { %1542 = vmatpush1.bf16.msra.mxu1 %v1420_v39  ;;  %1628 = vmatpush1.bf16.msra.mxu0 %v1422_v44  ;;  %v1283_v39 = vld [vmem:[#allocation2 + $0x1f8] sm:$0xff]  ;;  %v1280_v44 = vld [vmem:[#allocation2 + $0x1e0] sm:$0xff] }
 0x3b0   :  { %1543 = vmatprep.subr.bf16.mxu1 %v1429_v48  ;;  %1629 = vmatprep.subr.bf16.mxu0 %v1431_v49  ;;  %v1282_v48 = vld [vmem:[#allocation2 + $0x1f0] sm:$0xff]  ;;  %v1289_v49 = vld [vmem:[#allocation2 + $0x228] sm:$0xff] }
 0x3b3   :  { %1544 = vmatpush1.bf16.msra.mxu1 %v1428_v59  ;;  %1630 = vmatpush1.bf16.msra.mxu0 %v1430_v61  ;;  %v1291_v59 = vld [vmem:[#allocation2 + $0x238] sm:$0xff]  ;;  %v1288_v61 = vld [vmem:[#allocation2 + $0x220] sm:$0xff] }
 0x3b4   :  { %1545 = vmatprep.subr.bf16.mxu1 %v1437_v0  ;;  %1631 = vmatprep.subr.bf16.mxu0 %v1439_v1  ;;  %v1290_v0 = vld [vmem:[#allocation2 + $0x230] sm:$0xff]  ;;  %v1297_v1 = vld [vmem:[#allocation2 + $0x268] sm:$0xff] }
 0x3b7   :  { %1546 = vmatpush1.bf16.msra.mxu1 %v1436_v2  ;;  %1632 = vmatpush1.bf16.msra.mxu0 %v1438_v3  ;;  %v1299_v2 = vld [vmem:[#allocation2 + $0x278] sm:$0xff]  ;;  %v1296_v3 = vld [vmem:[#allocation2 + $0x260] sm:$0xff] }
 0x3b8   :  { %1547 = vmatprep.subr.bf16.mxu1 %v1445_v40  ;;  %1633 = vmatprep.subr.bf16.mxu0 %v1447_v4  ;;  %v1298_v40 = vld [vmem:[#allocation2 + $0x270] sm:$0xff]  ;;  %v1305_v4 = vld [vmem:[#allocation2 + $0x2a8] sm:$0xff] }
 0x3bb   :  { %1548 = vmatpush1.bf16.msra.mxu1 %v1444_v5  ;;  %1634 = vmatpush1.bf16.msra.mxu0 %v1446_v6  ;;  %v1307_v5 = vld [vmem:[#allocation2 + $0x2b8] sm:$0xff]  ;;  %v1304_v6 = vld [vmem:[#allocation2 + $0x2a0] sm:$0xff] }
 0x3bc   :  { %1549 = vmatprep.subr.bf16.mxu1 %v1453_v7  ;;  %1635 = vmatprep.subr.bf16.mxu0 %v1455_v9  ;;  %v1306_v7 = vld [vmem:[#allocation2 + $0x2b0] sm:$0xff]  ;;  %v1313_v9 = vld [vmem:[#allocation2 + $0x2e8] sm:$0xff] }
 0x3bf   :  { %1550 = vmatpush1.bf16.msra.mxu1 %v1452_v10  ;;  %1636 = vmatpush1.bf16.msra.mxu0 %v1454_v11  ;;  %v1315_v10 = vld [vmem:[#allocation2 + $0x2f8] sm:$0xff]  ;;  %v1312_v11 = vld [vmem:[#allocation2 + $0x2e0] sm:$0xff] }
 0x3c0   :  { %1551 = vmatprep.subr.bf16.mxu1 %v1461_v12  ;;  %1637 = vmatprep.subr.bf16.mxu0 %v1463_v43  ;;  %v1314_v12 = vld [vmem:[#allocation2 + $0x2f0] sm:$0xff]  ;;  %v1321_v43 = vld [vmem:[#allocation2 + $0x328] sm:$0xff] }
 0x3c3   :  { %1552 = vmatpush1.bf16.msra.mxu1 %v1460_v18  ;;  %1638 = vmatpush1.bf16.msra.mxu0 %v1462_v22  ;;  %v1323_v18 = vld [vmem:[#allocation2 + $0x338] sm:$0xff]  ;;  %v1320_v22 = vld [vmem:[#allocation2 + $0x320] sm:$0xff] }
 0x3c4   :  { %1553 = vmatprep.subr.bf16.mxu1 %v1469_v28  ;;  %1639 = vmatprep.subr.bf16.mxu0 %v1471_v17  ;;  %v1322_v28 = vld [vmem:[#allocation2 + $0x330] sm:$0xff]  ;;  %v1329_v17 = vld [vmem:[#allocation2 + $0x368] sm:$0xff] }
 0x3c7   :  { %1554 = vmatpush1.bf16.msra.mxu1 %v1468_v21  ;;  %1640 = vmatpush1.bf16.msra.mxu0 %v1470_v27  ;;  %v1331_v21 = vld [vmem:[#allocation2 + $0x378] sm:$0xff]  ;;  %v1328_v27 = vld [vmem:[#allocation2 + $0x360] sm:$0xff] }
 0x3c8   :  { %1652 = vmatprep.subr.bf16.mxu1 %v1225_v31  ;;  %1738 = vmatprep.subr.bf16.mxu0 %v1227_v13  ;;  %v1330_v31 = vld [vmem:[#allocation2 + $0x370] sm:$0xff]  ;;  %v1337_v13 = vld [vmem:[#allocation2 + $0x3a8] sm:$0xff] }
 0x3ca   :  { %1556 = vmatmul.mubr.bf16.vlgmr.msra.gmra.mrb[4].mxu1 %v4597_v54  ;;  %1642 = vmatmul.mubr.bf16.vlgmr.msra.gmra.mrb[12].mxu0 %v4597_v54 }
 0x3cb   :  { %1653 = vmatpush1.bf16.msra.mxu1 %v1224_v24  ;;  %1739 = vmatpush1.bf16.msra.mxu0 %v1226_v26  ;;  %v1339_v24 = vld [vmem:[#allocation2 + $0x3b8] sm:$0xff]  ;;  %v1336_v26 = vld [vmem:[#allocation2 + $0x3a0] sm:$0xff] }
 0x3cc   :  { %1654 = vmatprep.subr.bf16.mxu1 %v1233_v14  ;;  %1740 = vmatprep.subr.bf16.mxu0 %v1235_v50  ;;  %v1338_v14 = vld [vmem:[#allocation2 + $0x3b0] sm:$0xff]  ;;  %v1345_v50 = vld [vmem:[#allocation2 + $0x3e8] sm:$0xff] }
 0x3cd   :  { %1684 = vmatprep.mubr.bf16.mxu1 %v4564_v32  ;;  %1770 = vmatprep.mubr.bf16.mxu0 %v4564_v32  ;;  %v1256_v32 = vld [vmem:[#allocation2 + $0x120] sm:$0xff] }
 0x3cf   :  { %1655 = vmatpush1.bf16.msra.mxu1 %v1232_v16  ;;  %1741 = vmatpush1.bf16.msra.mxu0 %v1234_v20  ;;  %v1347_v16 = vld [vmem:[#allocation2 + $0x3f8] sm:$0xff]  ;;  %v1344_v20 = vld [vmem:[#allocation2 + $0x3e0] sm:$0xff] }
 0x3d0   :  { %1656 = vmatprep.subr.bf16.mxu1 %v1241_v25  ;;  %1742 = vmatprep.subr.bf16.mxu0 %v1243_v30  ;;  %v1346_v25 = vld [vmem:[#allocation2 + $0x3f0] sm:$0xff]  ;;  %v1353_v30 = vld [vmem:[#allocation2 + $0x428] sm:$0xff] }
 0x3d3   :  { %1657 = vmatpush1.bf16.msra.mxu1 %v1240_v52  ;;  %1743 = vmatpush1.bf16.msra.mxu0 %v1242_v51  ;;  %v1355_v52 = vld [vmem:[#allocation2 + $0x438] sm:$0xff]  ;;  %v1352_v51 = vld [vmem:[#allocation2 + $0x420] sm:$0xff] }
 0x3d4   :  { %1658 = vmatprep.subr.bf16.mxu1 %v1249_v41  ;;  %1744 = vmatprep.subr.bf16.mxu0 %v1251_v15  ;;  %v1354_v41 = vld [vmem:[#allocation2 + $0x430] sm:$0xff]  ;;  %v1361_v15 = vld [vmem:[#allocation2 + $0x468] sm:$0xff] }
 0x3d7   :  { %1659 = vmatpush1.bf16.msra.mxu1 %v1248_v42  ;;  %1745 = vmatpush1.bf16.msra.mxu0 %v1250_v56  ;;  %v1363_v42 = vld [vmem:[#allocation2 + $0x478] sm:$0xff]  ;;  %v1360_v56 = vld [vmem:[#allocation2 + $0x460] sm:$0xff] }
 0x3d8   :  { %1660 = vmatprep.subr.bf16.mxu1 %v1257_v53  ;;  %1746 = vmatprep.subr.bf16.mxu0 %v1259_v60  ;;  %v1362_v53 = vld [vmem:[#allocation2 + $0x470] sm:$0xff]  ;;  %v1369_v60 = vld [vmem:[#allocation2 + $0x4a8] sm:$0xff] }
 0x3db   :  { %1661 = vmatpush1.bf16.msra.mxu1 %v1256_v32  ;;  %1747 = vmatpush1.bf16.msra.mxu0 %v1258_v46  ;;  %v1371_v32 = vld [vmem:[#allocation2 + $0x4b8] sm:$0xff]  ;;  %v1368_v46 = vld [vmem:[#allocation2 + $0x4a0] sm:$0xff] }
 0x3dc   :  { %1662 = vmatprep.subr.bf16.mxu1 %v1265_v19  ;;  %1748 = vmatprep.subr.bf16.mxu0 %v1267_v23  ;;  %v1370_v19 = vld [vmem:[#allocation2 + $0x4b0] sm:$0xff]  ;;  %v1377_v23 = vld [vmem:[#allocation2 + $0x4e8] sm:$0xff] }
 0x3df   :  { %1663 = vmatpush1.bf16.msra.mxu1 %v1264_v29  ;;  %1749 = vmatpush1.bf16.msra.mxu0 %v1266_v33  ;;  %v1376_v29 = vld [vmem:[#allocation2 + $0x4e0] sm:$0xff]  ;;  %v1378_v33 = vld [vmem:[#allocation2 + $0x4f0] sm:$0xff] }
 0x3e0   :  { %1664 = vmatprep.subr.bf16.mxu1 %v1273_v34  ;;  %1750 = vmatprep.subr.bf16.mxu0 %v1275_v35  ;;  %v1385_v34 = vld [vmem:[#allocation2 + $0x528] sm:$0xff]  ;;  %v1387_v35 = vld [vmem:[#allocation2 + $0x538] sm:$0xff] }
 0x3e3   :  { %1665 = vmatpush1.bf16.msra.mxu1 %v1272_v36  ;;  %1751 = vmatpush1.bf16.msra.mxu0 %v1274_v37  ;;  %v1386_v36 = vld [vmem:[#allocation2 + $0x530] sm:$0xff]  ;;  %v1393_v37 = vld [vmem:[#allocation2 + $0x568] sm:$0xff] }
 0x3e4   :  { %1666 = vmatprep.subr.bf16.mxu1 %v1281_v38  ;;  %1752 = vmatprep.subr.bf16.mxu0 %v1283_v39  ;;  %v1395_v38 = vld [vmem:[#allocation2 + $0x578] sm:$0xff]  ;;  %v1392_v39 = vld [vmem:[#allocation2 + $0x560] sm:$0xff] }
 0x3e7   :  { %1667 = vmatpush1.bf16.msra.mxu1 %v1280_v44  ;;  %1753 = vmatpush1.bf16.msra.mxu0 %v1282_v48  ;;  %v1394_v44 = vld [vmem:[#allocation2 + $0x570] sm:$0xff]  ;;  %v1401_v48 = vld [vmem:[#allocation2 + $0x5a8] sm:$0xff] }
 0x3e8   :  { %1668 = vmatprep.subr.bf16.mxu1 %v1289_v49  ;;  %1754 = vmatprep.subr.bf16.mxu0 %v1291_v59  ;;  %v1403_v49 = vld [vmem:[#allocation2 + $0x5b8] sm:$0xff]  ;;  %v1400_v59 = vld [vmem:[#allocation2 + $0x5a0] sm:$0xff] }
 0x3eb   :  { %1669 = vmatpush1.bf16.msra.mxu1 %v1288_v61  ;;  %1755 = vmatpush1.bf16.msra.mxu0 %v1290_v0  ;;  %v1402_v61 = vld [vmem:[#allocation2 + $0x5b0] sm:$0xff]  ;;  %v1409_v0 = vld [vmem:[#allocation2 + $0x5e8] sm:$0xff] }
 0x3ec   :  { %1670 = vmatprep.subr.bf16.mxu1 %v1297_v1  ;;  %1756 = vmatprep.subr.bf16.mxu0 %v1299_v2  ;;  %v1411_v1 = vld [vmem:[#allocation2 + $0x5f8] sm:$0xff]  ;;  %v1408_v2 = vld [vmem:[#allocation2 + $0x5e0] sm:$0xff] }
 0x3ef   :  { %1671 = vmatpush1.bf16.msra.mxu1 %v1296_v3  ;;  %1757 = vmatpush1.bf16.msra.mxu0 %v1298_v40  ;;  %v1410_v3 = vld [vmem:[#allocation2 + $0x5f0] sm:$0xff]  ;;  %v1417_v40 = vld [vmem:[#allocation2 + $0x628] sm:$0xff] }
 0x3f0   :  { %1672 = vmatprep.subr.bf16.mxu1 %v1305_v4  ;;  %1758 = vmatprep.subr.bf16.mxu0 %v1307_v5  ;;  %v1419_v4 = vld [vmem:[#allocation2 + $0x638] sm:$0xff]  ;;  %v1416_v5 = vld [vmem:[#allocation2 + $0x620] sm:$0xff] }
 0x3f3   :  { %1673 = vmatpush1.bf16.msra.mxu1 %v1304_v6  ;;  %1759 = vmatpush1.bf16.msra.mxu0 %v1306_v7  ;;  %v1418_v6 = vld [vmem:[#allocation2 + $0x630] sm:$0xff]  ;;  %v1425_v7 = vld [vmem:[#allocation2 + $0x668] sm:$0xff] }
 0x3f4   :  { %1674 = vmatprep.subr.bf16.mxu1 %v1313_v9  ;;  %1760 = vmatprep.subr.bf16.mxu0 %v1315_v10  ;;  %v1427_v9 = vld [vmem:[#allocation2 + $0x678] sm:$0xff]  ;;  %v1424_v10 = vld [vmem:[#allocation2 + $0x660] sm:$0xff] }
 0x3f7   :  { %1675 = vmatpush1.bf16.msra.mxu1 %v1312_v11  ;;  %1761 = vmatpush1.bf16.msra.mxu0 %v1314_v12  ;;  %v1426_v11 = vld [vmem:[#allocation2 + $0x670] sm:$0xff]  ;;  %v1433_v12 = vld [vmem:[#allocation2 + $0x6a8] sm:$0xff] }
 0x3f8   :  { %1676 = vmatprep.subr.bf16.mxu1 %v1321_v43  ;;  %1762 = vmatprep.subr.bf16.mxu0 %v1323_v18  ;;  %v1435_v43 = vld [vmem:[#allocation2 + $0x6b8] sm:$0xff]  ;;  %v1432_v18 = vld [vmem:[#allocation2 + $0x6a0] sm:$0xff] }
 0x3fb   :  { %1677 = vmatpush1.bf16.msra.mxu1 %v1320_v22  ;;  %1763 = vmatpush1.bf16.msra.mxu0 %v1322_v28  ;;  %v1434_v22 = vld [vmem:[#allocation2 + $0x6b0] sm:$0xff]  ;;  %v1441_v28 = vld [vmem:[#allocation2 + $0x6e8] sm:$0xff] }
 0x3fc   :  { %1678 = vmatprep.subr.bf16.mxu1 %v1329_v17  ;;  %1764 = vmatprep.subr.bf16.mxu0 %v1331_v21  ;;  %v1443_v17 = vld [vmem:[#allocation2 + $0x6f8] sm:$0xff]  ;;  %v1440_v21 = vld [vmem:[#allocation2 + $0x6e0] sm:$0xff] }
 0x3ff   :  { %1679 = vmatpush1.bf16.msra.mxu1 %v1328_v27  ;;  %1765 = vmatpush1.bf16.msra.mxu0 %v1330_v31  ;;  %v1442_v27 = vld [vmem:[#allocation2 + $0x6f0] sm:$0xff]  ;;  %v1449_v31 = vld [vmem:[#allocation2 + $0x728] sm:$0xff] }
 0x400   :  { %1680 = vmatprep.subr.bf16.mxu1 %v1337_v13  ;;  %1766 = vmatprep.subr.bf16.mxu0 %v1339_v24  ;;  %v1451_v13 = vld [vmem:[#allocation2 + $0x738] sm:$0xff]  ;;  %v1448_v24 = vld [vmem:[#allocation2 + $0x720] sm:$0xff] }
 0x403   :  { %1681 = vmatpush1.bf16.msra.mxu1 %v1336_v26  ;;  %1767 = vmatpush1.bf16.msra.mxu0 %v1338_v14  ;;  %v1450_v26 = vld [vmem:[#allocation2 + $0x730] sm:$0xff]  ;;  %v1457_v14 = vld [vmem:[#allocation2 + $0x768] sm:$0xff] }
 0x404   :  { %1682 = vmatprep.subr.bf16.mxu1 %v1345_v50  ;;  %1768 = vmatprep.subr.bf16.mxu0 %v1347_v16  ;;  %v1459_v50 = vld [vmem:[#allocation2 + $0x778] sm:$0xff]  ;;  %v1456_v16 = vld [vmem:[#allocation2 + $0x760] sm:$0xff] }
 0x407   :  { %1683 = vmatpush1.bf16.msra.mxu1 %v1344_v20  ;;  %1769 = vmatpush1.bf16.msra.mxu0 %v1346_v25  ;;  %v1458_v20 = vld [vmem:[#allocation2 + $0x770] sm:$0xff]  ;;  %v1465_v25 = vld [vmem:[#allocation2 + $0x7a8] sm:$0xff] }
 0x408   :  { %1695 = vmatprep.subr.bf16.mxu1 %v1353_v30  ;;  %1781 = vmatprep.subr.bf16.mxu0 %v1355_v52  ;;  %v1467_v30 = vld [vmem:[#allocation2 + $0x7b8] sm:$0xff]  ;;  %v1464_v52 = vld [vmem:[#allocation2 + $0x7a0] sm:$0xff] }
 0x40a   :  { %1685 = vmatmul.mubr.bf16.vlgmr.msra.gmra.mrb[8].mxu1 %v4581_v8  ;;  %1771 = vmatmul.mubr.bf16.vlgmr.msra.gmra.mrb[16].mxu0 %v4581_v8  ;;  %v1379_v8 = vld [vmem:[#allocation2 + $0x4f8] sm:$0xff] }
 0x40b   :  { %1696 = vmatpush1.bf16.msra.mxu1 %v1352_v51  ;;  %1782 = vmatpush1.bf16.msra.mxu0 %v1354_v41  ;;  %v1466_v51 = vld [vmem:[#allocation2 + $0x7b0] sm:$0xff]  ;;  %v1473_v41 = vld [vmem:[#allocation2 + $0x7e8] sm:$0xff] }
 0x40c   :  { %1697 = vmatprep.subr.bf16.mxu1 %v1361_v15  ;;  %1783 = vmatprep.subr.bf16.mxu0 %v1363_v42  ;;  %v1475_v15 = vld [vmem:[#allocation2 + $0x7f8] sm:$0xff]  ;;  %v1472_v42 = vld [vmem:[#allocation2 + $0x7e0] sm:$0xff] }
 0x40d   :  { %1727 = vmatprep.mubr.bf16.mxu1 %v4587_v58  ;;  %1813 = vmatprep.mubr.bf16.mxu0 %v4587_v58  ;;  %v1384_v58 = vld [vmem:[#allocation2 + $0x520] sm:$0xff] }
 0x40f   :  { %1698 = vmatpush1.bf16.msra.mxu1 %v1360_v56  ;;  %1784 = vmatpush1.bf16.msra.mxu0 %v1362_v53  ;;  %v1474_v56 = vld [vmem:[#allocation2 + $0x7f0] sm:$0xff] }
 0x410   :  { %1699 = vmatprep.subr.bf16.mxu1 %v1369_v60  ;;  %1785 = vmatprep.subr.bf16.mxu0 %v1371_v32 }
 0x413   :  { %1700 = vmatpush1.bf16.msra.mxu1 %v1368_v46  ;;  %1786 = vmatpush1.bf16.msra.mxu0 %v1370_v19 }
 0x414   :  { %1701 = vmatprep.subr.bf16.mxu1 %v1377_v23  ;;  %1787 = vmatprep.subr.bf16.mxu0 %v1379_v8 }
 0x417   :  { %1702 = vmatpush1.bf16.msra.mxu1 %v1376_v29  ;;  %1788 = vmatpush1.bf16.msra.mxu0 %v1378_v33 }
 0x418   :  { %1703 = vmatprep.subr.bf16.mxu1 %v1385_v34  ;;  %1789 = vmatprep.subr.bf16.mxu0 %v1387_v35 }
 0x41b   :  { %1704 = vmatpush1.bf16.msra.mxu1 %v1384_v58  ;;  %1790 = vmatpush1.bf16.msra.mxu0 %v1386_v36 }
 0x41c   :  { %1705 = vmatprep.subr.bf16.mxu1 %v1393_v37  ;;  %1791 = vmatprep.subr.bf16.mxu0 %v1395_v38 }
 0x41f   :  { %1706 = vmatpush1.bf16.msra.mxu1 %v1392_v39  ;;  %1792 = vmatpush1.bf16.msra.mxu0 %v1394_v44 }
 0x420   :  { %1707 = vmatprep.subr.bf16.mxu1 %v1401_v48  ;;  %1793 = vmatprep.subr.bf16.mxu0 %v1403_v49 }
 0x423   :  { %1708 = vmatpush1.bf16.msra.mxu1 %v1400_v59  ;;  %1794 = vmatpush1.bf16.msra.mxu0 %v1402_v61 }
 0x424   :  { %1709 = vmatprep.subr.bf16.mxu1 %v1409_v0  ;;  %1795 = vmatprep.subr.bf16.mxu0 %v1411_v1 }
 0x427   :  { %1710 = vmatpush1.bf16.msra.mxu1 %v1408_v2  ;;  %1796 = vmatpush1.bf16.msra.mxu0 %v1410_v3 }
 0x428   :  { %1711 = vmatprep.subr.bf16.mxu1 %v1417_v40  ;;  %1797 = vmatprep.subr.bf16.mxu0 %v1419_v4 }
 0x42b   :  { %1712 = vmatpush1.bf16.msra.mxu1 %v1416_v5  ;;  %1798 = vmatpush1.bf16.msra.mxu0 %v1418_v6 }
 0x42c   :  { %1713 = vmatprep.subr.bf16.mxu1 %v1425_v7  ;;  %1799 = vmatprep.subr.bf16.mxu0 %v1427_v9 }
 0x42f   :  { %1714 = vmatpush1.bf16.msra.mxu1 %v1424_v10  ;;  %1800 = vmatpush1.bf16.msra.mxu0 %v1426_v11 }
 0x430   :  { %1715 = vmatprep.subr.bf16.mxu1 %v1433_v12  ;;  %1801 = vmatprep.subr.bf16.mxu0 %v1435_v43 }
 0x433   :  { %1716 = vmatpush1.bf16.msra.mxu1 %v1432_v18  ;;  %1802 = vmatpush1.bf16.msra.mxu0 %v1434_v22 }
 0x434   :  { %1717 = vmatprep.subr.bf16.mxu1 %v1441_v28  ;;  %1803 = vmatprep.subr.bf16.mxu0 %v1443_v17 }
 0x437   :  { %1718 = vmatpush1.bf16.msra.mxu1 %v1440_v21  ;;  %1804 = vmatpush1.bf16.msra.mxu0 %v1442_v27 }
 0x438   :  { %1719 = vmatprep.subr.bf16.mxu1 %v1449_v31  ;;  %1805 = vmatprep.subr.bf16.mxu0 %v1451_v13 }
 0x43b   :  { %1720 = vmatpush1.bf16.msra.mxu1 %v1448_v24  ;;  %1806 = vmatpush1.bf16.msra.mxu0 %v1450_v26 }
 0x43c   :  { %1721 = vmatprep.subr.bf16.mxu1 %v1457_v14  ;;  %1807 = vmatprep.subr.bf16.mxu0 %v1459_v50 }
 0x43f   :  { %1722 = vmatpush1.bf16.msra.mxu1 %v1456_v16  ;;  %1808 = vmatpush1.bf16.msra.mxu0 %v1458_v20 }
 0x440   :  { %1723 = vmatprep.subr.bf16.mxu1 %v1465_v25  ;;  %1809 = vmatprep.subr.bf16.mxu0 %v1467_v30 }
 0x443   :  { %1724 = vmatpush1.bf16.msra.mxu1 %v1464_v52  ;;  %1810 = vmatpush1.bf16.msra.mxu0 %v1466_v51 }
 0x444   :  { %1725 = vmatprep.subr.bf16.mxu1 %v1473_v41  ;;  %1811 = vmatprep.subr.bf16.mxu0 %v1475_v15 }
 0x447   :  { %1726 = vmatpush1.bf16.msra.mxu1 %v1472_v42  ;;  %1812 = vmatpush1.bf16.msra.mxu0 %v1474_v56 }
 0x44a   :  { %1728 = vmatmul.mubr.bf16.vlgmr.msra.gmra.mrb[8].mxu1 %v4597_v54  ;;  %1814 = vmatmul.mubr.bf16.vlgmr.msra.gmra.mrb[16].mxu0 %v4597_v54 }
 0x49d   :  { %v4609_v53 = vpop.f32.mrb[4].mxu1  ;;  %v4611_v60 = vpop.f32.mrb[12].mxu0 }
 0x49e   :  { %v4613_v32 = vpop.f32.mrb[5].mxu1  ;;  %v4615_v46 = vpop.f32.mrb[13].mxu0  ;;  %v1904_v8 = vmul.f32 %v4609_v53, %v4609_v53  ;;  %v1906_v29 = vmul.f32 %v4611_v60, %v4611_v60 }
 0x49f   :  { %v4617_v19 = vpop.f32.mrb[6].mxu1  ;;  %v4619_v23 = vpop.f32.mrb[14].mxu0  ;;  %v1905_v58 = vmul.f32 %v4613_v32, %v4613_v32  ;;  %v1907_v36 = vmul.f32 %v4615_v46, %v4615_v46 }
 0x4a0   :  { %v1832_v54 = vmul.f32 0.0, %v4617_v19  ;;  %v1834_v33 = vmul.f32 0.0, %v4619_v23  ;;  %v4627_v34 = vpop.f32.mrb[7].mxu1  ;;  %v4629_v35 = vpop.f32.mrb[15].mxu0 }
 0x4a1   :  { %v1833_v37 = vmul.f32 0.0, %v4627_v34  ;;  %v1835_v38 = vmul.f32 0.0, %v4629_v35 }
 0x4a2   :  { %v1840_v39 = vadd.f32 %v1832_v54, %v4609_v53  ;;  %v1912_v44 = vmul.f32 %v1832_v54, %v4617_v19  ;;  %v1854_v48 = vadd.f32 %v1834_v33, %v4611_v60  ;;  %v1914_v49 = vmul.f32 %v1834_v33, %v4619_v23 }
 0x4a3   :  { %v1847_v59 = vadd.f32 %v1833_v37, %v4613_v32  ;;  %v1913_v61 = vmul.f32 %v1833_v37, %v4627_v34  ;;  %v1861_v0 = vadd.f32 %v1835_v38, %v4615_v46  ;;  %v1915_v1 = vmul.f32 %v1835_v38, %v4629_v35 }
 0x4a4   :  { %v1841_v2 = vrot.slane %v1840_v39, 4  ;;  %v1920_v3 = vadd.f32 %v1912_v44, %v1904_v8  ;;  %v1855_v40 = vrot.slane %v1854_v48, 4  ;;  %v1934_v4 = vadd.f32 %v1914_v49, %v1906_v29 }
 0x4a5   :  { %v1848_v5 = vrot.slane %v1847_v59, 4  ;;  %v1927_v6 = vadd.f32 %v1913_v61, %v1905_v58  ;;  %v1862_v7 = vrot.slane %v1861_v0, 4  ;;  %v1941_v9 = vadd.f32 %v1915_v1, %v1907_v36 }
 0x4a6   :  { %v1842_v10 = vadd.f32 %v1841_v2, %v1840_v39  ;;  %v1921_v11 = vrot.slane %v1920_v3, 4  ;;  %v1856_v12 = vadd.f32 %v1855_v40, %v1854_v48  ;;  %v1935_v43 = vrot.slane %v1934_v4, 4 }
 0x4a7   :  { %v1849_v18 = vadd.f32 %v1848_v5, %v1847_v59  ;;  %v1928_v22 = vrot.slane %v1927_v6, 4  ;;  %v1863_v28 = vadd.f32 %v1862_v7, %v1861_v0  ;;  %v1942_v17 = vrot.slane %v1941_v9, 4 }
 0x4a8   :  { %v1843_v21 = vrot.slane %v1842_v10, 2  ;;  %v1922_v27 = vadd.f32 %v1921_v11, %v1920_v3  ;;  %v1857_v31 = vrot.slane %v1856_v12, 2  ;;  %v1936_v13 = vadd.f32 %v1935_v43, %v1934_v4 }
 0x4a9   :  { %v1850_v24 = vrot.slane %v1849_v18, 2  ;;  %v1929_v26 = vadd.f32 %v1928_v22, %v1927_v6  ;;  %v1864_v14 = vrot.slane %v1863_v28, 2  ;;  %v1943_v50 = vadd.f32 %v1942_v17, %v1941_v9 }
 0x4aa   :  { %v1844_v16 = vadd.f32 %v1843_v21, %v1842_v10  ;;  %v1923_v20 = vrot.slane %v1922_v27, 2  ;;  %v1858_v25 = vadd.f32 %v1857_v31, %v1856_v12  ;;  %v1937_v30 = vrot.slane %v1936_v13, 2 }
 0x4ab   :  { %v1851_v52 = vadd.f32 %v1850_v24, %v1849_v18  ;;  %v1930_v51 = vrot.slane %v1929_v26, 2  ;;  %v1865_v41 = vadd.f32 %v1864_v14, %v1863_v28  ;;  %v1944_v15 = vrot.slane %v1943_v50, 2 }
 0x4ac   :  { %v1845_v42 = vrot.slane %v1844_v16, 1  ;;  %v1924_v56 = vadd.f32 %v1923_v20, %v1922_v27  ;;  %v1859_v8 = vrot.slane %v1858_v25, 1  ;;  %v1938_v29 = vadd.f32 %v1937_v30, %v1936_v13 }
 0x4ad   :  { %v1852_v54 = vrot.slane %v1851_v52, 1  ;;  %v1931_v33 = vadd.f32 %v1930_v51, %v1929_v26  ;;  %v1866_v58 = vrot.slane %v1865_v41, 1  ;;  %v1945_v36 = vadd.f32 %v1944_v15, %v1943_v50 }
 0x4ae   :  { %v1846_v37 = vadd.f32 %v1845_v42, %v1844_v16  ;;  %v1925_v38 = vrot.slane %v1924_v56, 1  ;;  %v1860_v39 = vadd.f32 %v1859_v8, %v1858_v25  ;;  %v1939_v44 = vrot.slane %v1938_v29, 1 }
 0x4af   :  { %v1853_v48 = vadd.f32 %v1852_v54, %v1851_v52  ;;  %v1932_v49 = vrot.slane %v1931_v33, 1  ;;  %v1867_v59 = vadd.f32 %v1866_v58, %v1865_v41  ;;  %v1946_v61 = vrot.slane %v1945_v36, 1 }
 0x4b0   :  { %v4645_v0 = vmul.f32 0.125, %v1846_v37  ;;  %v1926_v1 = vadd.f32 %v1925_v38, %v1924_v56  ;;  %v4647_v2 = vmul.f32 0.125, %v1860_v39  ;;  %v1940_v3 = vadd.f32 %v1939_v44, %v1938_v29 }
 0x4b1   :  { %v4649_v40 = vmul.f32 0.125, %v1853_v48  ;;  %v1933_v4 = vadd.f32 %v1932_v49, %v1931_v33  ;;  %v4651_v5 = vmul.f32 0.125, %v1867_v59  ;;  %v1947_v6 = vadd.f32 %v1946_v61, %v1945_v36 }
 0x4b2   :  { %v1976_v7 = vmul.f32 0.125, %v1926_v1  ;;  %v1984_v9 = vmul.f32 %v4645_v0, %v4645_v0  ;;  %v1978_v10 = vmul.f32 0.125, %v1940_v3  ;;  %v1986_v11 = vmul.f32 %v4647_v2, %v4647_v2 }
 0x4b3   :  { %v1977_v12 = vmul.f32 0.125, %v1933_v4  ;;  %v1985_v43 = vmul.f32 %v4649_v40, %v4649_v40  ;;  %v1979_v18 = vmul.f32 0.125, %v1947_v6  ;;  %v1987_v22 = vmul.f32 %v4651_v5, %v4651_v5 }
 0x4b4   :  { %v1992_v28 = vsub.f32 %v1976_v7, %v1984_v9  ;;  %v1994_v17 = vsub.f32 %v1978_v10, %v1986_v11 }
 0x4b5   :  { %v1993_v21 = vsub.f32 %v1977_v12, %v1985_v43  ;;  %v1995_v27 = vsub.f32 %v1979_v18, %v1987_v22 }
 0x4b6   :  { %v2000_v31 = vmax.f32 %v1992_v28, 0.0  ;;  %v2002_v13 = vmax.f32 %v1994_v17, 0.0 }
 0x4b7   :  { %v2001_v24 = vmax.f32 %v1993_v21, 0.0  ;;  %v2003_v26 = vmax.f32 %v1995_v27, 0.0 }
 0x4b8   :  { %v2009_v14 = vadd.f32 1e-05, %v2000_v31  ;;  %v2011_v50 = vadd.f32 1e-05, %v2002_v13 }
 0x4b9   :  { %v2010_v16 = vadd.f32 1e-05, %v2001_v24  ;;  %v2012_v20 = vadd.f32 1e-05, %v2003_v26 }
 0x4ba   :  { %3892 = vrsqrt.f32 %v2009_v14 }
 0x4bb   :  { %3894 = vrsqrt.f32 %v2011_v50 }
 0x4bc   :  { %3896 = vrsqrt.f32 %v2010_v16 }
 0x4bd   :  { %3898 = vrsqrt.f32 %v2012_v20 }
 0x4c4   :  { %v3893_v25 = vpop.eup %3892 }
 0x4c5   :  { %v3895_v30 = vpop.eup %3894 }
 0x4c6   :  { %v3897_v52 = vpop.eup %3896 }
 0x4c7   :  { %v3899_v51 = vpop.eup %3898  ;;  %v2033_v41 = vcombine.low %v3893_v25, %v3897_v52 }
 0x4c8   :  { %v2034_v15 = vcombine.low %v3895_v30, %v3899_v51 }
 0x4c9   :  { %v4662_v42 = vrot.slane %v2033_v41, %v4448_v47 }
 0x4ca   :  { %v4665_v56 = vrot.slane %v2034_v15, %v4448_v47 }
 0x4cc   :  { %v2065_v8 = vcombine.low %v4662_v42, %v4665_v56 }
 0x51d   :  { %v4669_v29 = vpop.f32.mrb[8].mxu1  ;;  %v4671_v54 = vpop.f32.mrb[16].mxu0 }
 0x51e   :  { %v4673_v33 = vpop.f32.mrb[9].mxu1  ;;  %v4675_v58 = vpop.f32.mrb[17].mxu0  ;;  %v1908_v38 = vmul.f32 %v4669_v29, %v4669_v29  ;;  %v1910_v39 = vmul.f32 %v4671_v54, %v4671_v54 }
 0x51f   :  { %v4677_v36 = vpop.f32.mrb[10].mxu1  ;;  %v4679_v37 = vpop.f32.mrb[18].mxu0  ;;  %v1909_v61 = vmul.f32 %v4673_v33, %v4673_v33  ;;  %v1911_v1 = vmul.f32 %v4675_v58, %v4675_v58 }
 0x520   :  { %v1836_v44 = vmul.f32 0.0, %v4677_v36  ;;  %v1838_v48 = vmul.f32 0.0, %v4679_v37  ;;  %v4687_v49 = vpop.f32.mrb[11].mxu1  ;;  %v4689_v59 = vpop.f32.mrb[19].mxu0 }
 0x521   :  { %v1837_v3 = vmul.f32 0.0, %v4687_v49  ;;  %v1839_v4 = vmul.f32 0.0, %v4689_v59 }
 0x522   :  { %v1868_v6 = vadd.f32 %v1836_v44, %v4669_v29  ;;  %v1916_v7 = vmul.f32 %v1836_v44, %v4677_v36  ;;  %v1882_v9 = vadd.f32 %v1838_v48, %v4671_v54  ;;  %v1918_v10 = vmul.f32 %v1838_v48, %v4679_v37 }
 0x523   :  { %v1875_v11 = vadd.f32 %v1837_v3, %v4673_v33  ;;  %v1917_v12 = vmul.f32 %v1837_v3, %v4687_v49  ;;  %v1889_v43 = vadd.f32 %v1839_v4, %v4675_v58  ;;  %v1919_v18 = vmul.f32 %v1839_v4, %v4689_v59 }
 0x524   :  { %v1869_v22 = vrot.slane %v1868_v6, 4  ;;  %v1948_v28 = vadd.f32 %v1916_v7, %v1908_v38  ;;  %v1883_v17 = vrot.slane %v1882_v9, 4  ;;  %v1962_v21 = vadd.f32 %v1918_v10, %v1910_v39 }
 0x525   :  { %v1876_v27 = vrot.slane %v1875_v11, 4  ;;  %v1955_v31 = vadd.f32 %v1917_v12, %v1909_v61  ;;  %v1890_v13 = vrot.slane %v1889_v43, 4  ;;  %v1969_v24 = vadd.f32 %v1919_v18, %v1911_v1 }
 0x526   :  { %v1870_v26 = vadd.f32 %v1869_v22, %v1868_v6  ;;  %v1949_v14 = vrot.slane %v1948_v28, 4  ;;  %v1884_v50 = vadd.f32 %v1883_v17, %v1882_v9  ;;  %v1963_v16 = vrot.slane %v1962_v21, 4 }
 0x527   :  { %v1877_v20 = vadd.f32 %v1876_v27, %v1875_v11  ;;  %v1956_v25 = vrot.slane %v1955_v31, 4  ;;  %v1891_v30 = vadd.f32 %v1890_v13, %v1889_v43  ;;  %v1970_v52 = vrot.slane %v1969_v24, 4 }
 0x528   :  { %v1871_v51 = vrot.slane %v1870_v26, 2  ;;  %v1950_v41 = vadd.f32 %v1949_v14, %v1948_v28  ;;  %v1885_v15 = vrot.slane %v1884_v50, 2  ;;  %v1964_v44 = vadd.f32 %v1963_v16, %v1962_v21 }
 0x529   :  { %v1878_v48 = vrot.slane %v1877_v20, 2  ;;  %v1957_v38 = vadd.f32 %v1956_v25, %v1955_v31  ;;  %v1892_v3 = vrot.slane %v1891_v30, 2  ;;  %v1971_v39 = vadd.f32 %v1970_v52, %v1969_v24 }
 0x52a   :  { %v1872_v4 = vadd.f32 %v1871_v51, %v1870_v26  ;;  %v1951_v61 = vrot.slane %v1950_v41, 2  ;;  %v1886_v7 = vadd.f32 %v1885_v15, %v1884_v50  ;;  %v1965_v1 = vrot.slane %v1964_v44, 2 }
 0x52b   :  { %v1879_v6 = vadd.f32 %v1878_v48, %v1877_v20  ;;  %v1958_v10 = vrot.slane %v1957_v38, 2  ;;  %v1893_v9 = vadd.f32 %v1892_v3, %v1891_v30  ;;  %v1972_v12 = vrot.slane %v1971_v39, 2 }
 0x52c   :  { %v1873_v11 = vrot.slane %v1872_v4, 1  ;;  %v1952_v18 = vadd.f32 %v1951_v61, %v1950_v41  ;;  %v1887_v43 = vrot.slane %v1886_v7, 1  ;;  %v1966_v22 = vadd.f32 %v1965_v1, %v1964_v44 }
 0x52d   :  { %v1880_v17 = vrot.slane %v1879_v6, 1  ;;  %v1959_v28 = vadd.f32 %v1958_v10, %v1957_v38  ;;  %v1894_v27 = vrot.slane %v1893_v9, 1  ;;  %v1973_v21 = vadd.f32 %v1972_v12, %v1971_v39 }
 0x52e   :  { %v1874_v13 = vadd.f32 %v1873_v11, %v1872_v4  ;;  %v1953_v31 = vrot.slane %v1952_v18, 1  ;;  %v1888_v14 = vadd.f32 %v1887_v43, %v1886_v7  ;;  %v1967_v24 = vrot.slane %v1966_v22, 1 }
 0x52f   :  { %v1881_v26 = vadd.f32 %v1880_v17, %v1879_v6  ;;  %v1960_v16 = vrot.slane %v1959_v28, 1  ;;  %v1895_v50 = vadd.f32 %v1894_v27, %v1893_v9  ;;  %v1974_v25 = vrot.slane %v1973_v21, 1 }
 0x530   :  { %v1900_v20 = vmul.f32 0.125, %v1874_v13  ;;  %v1954_v52 = vadd.f32 %v1953_v31, %v1952_v18  ;;  %v1902_v30 = vmul.f32 0.125, %v1888_v14  ;;  %v1968_v51 = vadd.f32 %v1967_v24, %v1966_v22 }
 0x531   :  { %v1901_v15 = vmul.f32 0.125, %v1881_v26  ;;  %v1961_v41 = vadd.f32 %v1960_v16, %v1959_v28  ;;  %v1903_v48 = vmul.f32 0.125, %v1895_v50  ;;  %v1975_v44 = vadd.f32 %v1974_v25, %v1973_v21 }
 0x532   :  { %v1980_v3 = vmul.f32 0.125, %v1954_v52  ;;  %v1988_v38 = vmul.f32 %v1900_v20, %v1900_v20  ;;  %v1982_v61 = vmul.f32 0.125, %v1968_v51  ;;  %v1990_v39 = vmul.f32 %v1902_v30, %v1902_v30 }
 0x533   :  { %v1981_v4 = vmul.f32 0.125, %v1961_v41  ;;  %v1989_v1 = vmul.f32 %v1901_v15, %v1901_v15  ;;  %v1983_v7 = vmul.f32 0.125, %v1975_v44  ;;  %v1991_v10 = vmul.f32 %v1903_v48, %v1903_v48 }
 0x534   :  { %v1996_v6 = vsub.f32 %v1980_v3, %v1988_v38  ;;  %v1998_v12 = vsub.f32 %v1982_v61, %v1990_v39  ;;  %v2073_v41 = vrot.slane %v2065_v8, %v4448_v47  ;;  %v2008_v3 = vld [vmem:[#allocation16] sm:$0xff]  ;;  %v4713_v61 = vsub.s32 4, %v4445_v45 }
 0x535   :  { %v1997_v9 = vsub.f32 %v1981_v4, %v1989_v1  ;;  %v1999_v11 = vsub.f32 %v1983_v7, %v1991_v10  ;;  %v4716_v39 = vsub.s32 5, %v4445_v45  ;;  %v4719_v4 = vsub.s32 6, %v4445_v45 }
 0x536   :  { %v2004_v43 = vmax.f32 %v1996_v6, 0.0  ;;  %v2006_v18 = vmax.f32 %v1998_v12, 0.0  ;;  %v2116_v1 = vsub.s32 7, %v4445_v45 }
 0x537   :  { %v2005_v17 = vmax.f32 %v1997_v9, 0.0  ;;  %v2007_v22 = vmax.f32 %v1999_v11, 0.0 }
 0x538   :  { %v2013_v27 = vadd.f32 1e-05, %v2004_v43  ;;  %v2015_v28 = vadd.f32 1e-05, %v2006_v18 }
 0x539   :  { %v2014_v13 = vadd.f32 1e-05, %v2005_v17  ;;  %v2016_v21 = vadd.f32 1e-05, %v2007_v22 }
 0x53a   :  { %3900 = vrsqrt.f32 %v2013_v27 }
 0x53b   :  { %3902 = vrsqrt.f32 %v2015_v28 }
 0x53c   :  { %3904 = vrsqrt.f32 %v2014_v13 }
 0x53d   :  { %3906 = vrsqrt.f32 %v2016_v21 }
 0x544   :  { %v3901_v31 = vpop.eup %3900 }
 0x545   :  { %v3903_v14 = vpop.eup %3902 }
 0x546   :  { %v3905_v24 = vpop.eup %3904 }
 0x547   :  { %v3907_v26 = vpop.eup %3906  ;;  %v2035_v16 = vcombine.low %v3901_v31, %v3905_v24 }
 0x548   :  { %v2036_v50 = vcombine.low %v3903_v14, %v3907_v26 }
 0x549   :  { %v2057_v25 = vrot.slane %v2035_v16, %v4448_v47 }
 0x54a   :  { %v2064_v52 = vrot.slane %v2036_v50, %v4448_v47 }
 0x54c   :  { %v2066_v51 = vcombine.low %v2057_v25, %v2064_v52 }
 0x54e   :  { %v2080_v44 = vrot.slane %v2066_v51, %v4448_v47 }
 0x550   :  { %v2081_v38 = vcombine.low %v2073_v41, %v2080_v44 }
 0x552   :  { %v2083_v7 = vmul.f32 %v2081_v38, %v2008_v3 }
 0x554   :  { %v2089_v10 = vrot.slane %v2083_v7, %v4453_v55  ;;  %v2093_v42 = vrot.slane %v2083_v7, %v4456_v57  ;;  %v2097_v56 = vrot.slane %v2083_v7, %v4520_v62  ;;  %v2101_v8 = vrot.slane %v2083_v7, %v4523_v63 }
 0x555   :  { %v2105_v6 = vrot.slane %v2083_v7, %v4713_v61  ;;  %v2109_v12 = vrot.slane %v2083_v7, %v4716_v39  ;;  %v2113_v9 = vrot.slane %v2083_v7, %v4719_v4  ;;  %v2117_v11 = vrot.slane %v2083_v7, %v2116_v1 }
 0x556   :  { %v2126_v43 = vmul.f32 %v2089_v10, %v4645_v0  ;;  %v2127_v45 = vmul.f32 %v2093_v42, %v4649_v40  ;;  %v2128_v18 = vmul.f32 %v2097_v56, %v4647_v2  ;;  %v2129_v17 = vmul.f32 %v2101_v8, %v4651_v5 }
 0x557   :  { %v2130_v22 = vmul.f32 %v2105_v6, %v1900_v20  ;;  %v2131_v27 = vmul.f32 %v2109_v12, %v1901_v15  ;;  %v2132_v28 = vmul.f32 %v2113_v9, %v1902_v30  ;;  %v2133_v13 = vmul.f32 %v2117_v11, %v1903_v48 }
 0x558   :  { %v2142_v21 = vcombine.low %v2126_v43, %v2127_v45  ;;  %v2143_v31 = vcombine.low %v2128_v18, %v2129_v17  ;;  %v2193_v14 = vmul.f32 %v2089_v10, %v4609_v53  ;;  %v2194_v24 = vmul.f32 %v2093_v42, %v4613_v32 }
 0x559   :  { %v2144_v26 = vcombine.low %v2130_v22, %v2131_v27  ;;  %v2145_v16 = vcombine.low %v2132_v28, %v2133_v13  ;;  %v2195_v0 = vmul.f32 %v2097_v56, %v4611_v60  ;;  %v2196_v40 = vmul.f32 %v2101_v8, %v4615_v46 }
 0x55a   :  { %v2152_v2 = vrot.slane %v2142_v21, %v4448_v47  ;;  %v2159_v5 = vrot.slane %v2143_v31, %v4448_v47  ;;  %v2197_v20 = vmul.f32 %v2105_v6, %v4669_v29  ;;  %v2198_v30 = vmul.f32 %v2109_v12, %v4673_v33 }
 0x55b   :  { %v2166_v15 = vrot.slane %v2144_v26, %v4448_v47  ;;  %v2173_v53 = vrot.slane %v2145_v16, %v4448_v47  ;;  %v2199_v32 = vmul.f32 %v2113_v9, %v4671_v54  ;;  %v2200_v48 = vmul.f32 %v2117_v11, %v4675_v58 }
 0x55c   :  { %v2174_v50 = vcombine.low %v2152_v2, %v2159_v5  ;;  %v2201_v60 = vmul.f32 %v2089_v10, %v4617_v19  ;;  %v2202_v46 = vmul.f32 %v2093_v42, %v4627_v34  ;;  %v2203_v25 = vmul.f32 %v2097_v56, %v4619_v23  ;;  %v2084_v19 = vld [vmem:[#allocation18] sm:$0xff] }
 0x55d   :  { %v2175_v52 = vcombine.low %v2166_v15, %v2173_v53  ;;  %v2204_v29 = vmul.f32 %v2101_v8, %v4629_v35  ;;  %v2205_v33 = vmul.f32 %v2105_v6, %v4677_v36  ;;  %v2206_v51 = vmul.f32 %v2109_v12, %v4687_v49 }
 0x55e   :  { %v2182_v41 = vrot.slane %v2174_v50, %v4448_v47  ;;  %v2207_v54 = vmul.f32 %v2113_v9, %v4679_v37  ;;  %v2208_v58 = vmul.f32 %v2117_v11, %v4689_v59 }
 0x55f   :  { %v2189_v44 = vrot.slane %v2175_v52, %v4448_v47 }
 0x561   :  { %v2190_v3 = vcombine.low %v2182_v41, %v2189_v44 }
 0x563   :  { %v2192_v34 = vsub.f32 %v2084_v19, %v2190_v3 }
 0x565   :  { %v2213_v23 = vrot.slane %v2192_v34, %v4453_v55  ;;  %v2217_v38 = vrot.slane %v2192_v34, %v4456_v57  ;;  %v2221_v35 = vrot.slane %v2192_v34, %v4520_v62  ;;  %v2225_v36 = vrot.slane %v2192_v34, %v4523_v63 }
 0x566   :  { %v2229_v49 = vrot.slane %v2192_v34, %v4713_v61  ;;  %v2233_v7 = vrot.slane %v2192_v34, %v4716_v39  ;;  %v2237_v37 = vrot.slane %v2192_v34, %v4719_v4  ;;  %v2241_v59 = vrot.slane %v2192_v34, %v2116_v1 }
 0x567   :  { %v4762_v10 = vadd.f32 %v2213_v23, %v2193_v14  ;;  %v2251_v47 = vadd.f32 %v2217_v38, %v2194_v24  ;;  %v4764_v42 = vadd.f32 %v2221_v35, %v2195_v0  ;;  %v4766_v56 = vadd.f32 %v2225_v36, %v2196_v40 }
 0x568   :  { %v4768_v8 = vadd.f32 %v2229_v49, %v2197_v20  ;;  %v4770_v6 = vadd.f32 %v2233_v7, %v2198_v30  ;;  %v4772_v12 = vadd.f32 %v2237_v37, %v2199_v32  ;;  %v4774_v9 = vadd.f32 %v2241_v59, %v2200_v48 }
 0x569   :  { %v4776_v11 = vadd.f32 %v2213_v23, %v2201_v60  ;;  %v2259_v43 = vadd.f32 %v2217_v38, %v2202_v46  ;;  %v4778_v45 = vadd.f32 %v2221_v35, %v2203_v25  ;;  %v4780_v1 = vadd.f32 %v2225_v36, %v2204_v29 }
 0x56a   :  { %v4782_v18 = vadd.f32 %v2229_v49, %v2205_v33  ;;  %v4784_v17 = vadd.f32 %v2233_v7, %v2206_v51  ;;  %v4786_v22 = vadd.f32 %v2237_v37, %v2207_v54  ;;  %v4788_v27 = vadd.f32 %v2241_v59, %v2208_v58 }
 0x56b   :  { %v2266_v28 = vmax.f32 %v4762_v10, 0.0  ;;  %v2267_v13 = vmax.f32 %v2251_v47, 0.0  ;;  %v2268_v21 = vmax.f32 %v4764_v42, 0.0  ;;  %v2269_v31 = vmax.f32 %v4766_v56, 0.0 }
 0x56c   :  { %v2270_v14 = vmax.f32 %v4768_v8, 0.0  ;;  %v2271_v24 = vmax.f32 %v4770_v6, 0.0  ;;  %v2272_v26 = vmax.f32 %v4772_v12, 0.0  ;;  %v2273_v16 = vmax.f32 %v4774_v9, 0.0 }
 0x56d   :  { %v2274_v0 = vmax.f32 %v4776_v11, 0.0  ;;  %v2275_v40 = vmax.f32 %v2259_v43, 0.0  ;;  %v2276_v2 = vmax.f32 %v4778_v45, 0.0  ;;  %v2277_v5 = vmax.f32 %v4780_v1, 0.0 }
 0x56e   :  { %v2278_v20 = vmax.f32 %v4782_v18, 0.0  ;;  %v2279_v30 = vmax.f32 %v4784_v17, 0.0  ;;  %v2280_v15 = vmax.f32 %v4786_v22, 0.0  ;;  %v2281_v53 = vmax.f32 %v4788_v27, 0.0 }
 0x56f   :  { %4170 = dma.done.wait [#allocation4 + $0x1], 57344 }
 0x570   :  { %4171 = vsyncadd [#allocation4 + $0x1], 4294909952  ;;  %v4804_v32 = vpack.c.bf16 %v2275_v40, %v2267_v13  ;;  %v2287_v48 = vld [vmem:[#allocation3 + $0x8] sm:$0xff]  ;;  %v2289_v50 = vld [vmem:[#allocation3 + $0x18] sm:$0xff] }
 0x571   :  { %v2286_v60 = vld [vmem:[#allocation3] sm:$0xff]  ;;  %2779 = vmatprep.subr.bf16.mxu1 %v2287_v48  ;;  %2951 = vmatprep.subr.bf16.mxu0 %v2289_v50  ;;  %v2288_v46 = vld [vmem:[#allocation3 + $0x10] sm:$0xff]  ;;  %v2293_v29 = vld [vmem:[#allocation3 + $0x38] sm:$0xff] }
 0x572   :  { %2811 = vmatprep.mubr.bf16.mxu1 %v4804_v32  ;;  %2983 = vmatprep.mubr.bf16.mxu0 %v4804_v32  ;;  %v2294_v25 = vld [vmem:[#allocation3 + $0x40] sm:$0xff]  ;;  %v2296_v52 = vld [vmem:[#allocation3 + $0x50] sm:$0xff]  ;;  %v2295_v33 = vld [vmem:[#allocation3 + $0x48] sm:$0xff] }
 0x573   :  { %2780 = vmatpush1.bf16.msra.mxu1 %v2286_v60  ;;  %2952 = vmatpush1.bf16.msra.mxu0 %v2288_v46  ;;  %v2301_v51 = vld [vmem:[#allocation3 + $0x78] sm:$0xff]  ;;  %v2303_v41 = vld [vmem:[#allocation3 + $0x88] sm:$0xff]  ;;  %v2300_v54 = vld [vmem:[#allocation3 + $0x70] sm:$0xff] }
 0x574   :  { %2781 = vmatprep.subr.bf16.mxu1 %v2294_v25  ;;  %2953 = vmatprep.subr.bf16.mxu0 %v2296_v52  ;;  %v2302_v58 = vld [vmem:[#allocation3 + $0x80] sm:$0xff]  ;;  %v2308_v44 = vld [vmem:[#allocation3 + $0xb0] sm:$0xff]  ;;  %v2307_v3 = vld [vmem:[#allocation3 + $0xa8] sm:$0xff] }
 0x575   :  { %v2310_v19 = vld [vmem:[#allocation3 + $0xc0] sm:$0xff]  ;;  %v2309_v34 = vld [vmem:[#allocation3 + $0xb8] sm:$0xff]  ;;  %v2315_v23 = vld [vmem:[#allocation3 + $0xe8] sm:$0xff] }
 0x576   :  { %v2317_v38 = vld [vmem:[#allocation3 + $0xf8] sm:$0xff]  ;;  %v2314_v35 = vld [vmem:[#allocation3 + $0xe0] sm:$0xff]  ;;  %v2316_v36 = vld [vmem:[#allocation3 + $0xf0] sm:$0xff] }
 0x577   :  { %2782 = vmatpush1.bf16.msra.mxu1 %v2293_v29  ;;  %2954 = vmatpush1.bf16.msra.mxu0 %v2295_v33  ;;  %v2322_v49 = vld [vmem:[#allocation3 + $0x120] sm:$0xff]  ;;  %v2324_v7 = vld [vmem:[#allocation3 + $0x130] sm:$0xff]  ;;  %v2321_v37 = vld [vmem:[#allocation3 + $0x118] sm:$0xff] }
 0x578   :  { %2783 = vmatprep.subr.bf16.mxu1 %v2301_v51  ;;  %2955 = vmatprep.subr.bf16.mxu0 %v2303_v41  ;;  %v2323_v59 = vld [vmem:[#allocation3 + $0x128] sm:$0xff]  ;;  %v2329_v47 = vld [vmem:[#allocation3 + $0x158] sm:$0xff]  ;;  %v2328_v13 = vld [vmem:[#allocation3 + $0x150] sm:$0xff] }
 0x579   :  { %v2331_v43 = vld [vmem:[#allocation3 + $0x168] sm:$0xff]  ;;  %v2330_v40 = vld [vmem:[#allocation3 + $0x160] sm:$0xff]  ;;  %v2336_v48 = vld [vmem:[#allocation3 + $0x190] sm:$0xff] }
 0x57a   :  { %v2338_v50 = vld [vmem:[#allocation3 + $0x1a0] sm:$0xff]  ;;  %v2335_v60 = vld [vmem:[#allocation3 + $0x188] sm:$0xff]  ;;  %v2337_v46 = vld [vmem:[#allocation3 + $0x198] sm:$0xff] }
 0x57b   :  { %2784 = vmatpush1.bf16.msra.mxu1 %v2300_v54  ;;  %2956 = vmatpush1.bf16.msra.mxu0 %v2302_v58  ;;  %v2343_v25 = vld [vmem:[#allocation3 + $0x1c8] sm:$0xff]  ;;  %v2345_v52 = vld [vmem:[#allocation3 + $0x1d8] sm:$0xff]  ;;  %v2342_v29 = vld [vmem:[#allocation3 + $0x1c0] sm:$0xff] }
 0x57c   :  { %2785 = vmatprep.subr.bf16.mxu1 %v2308_v44  ;;  %2957 = vmatprep.subr.bf16.mxu0 %v2310_v19  ;;  %v2344_v33 = vld [vmem:[#allocation3 + $0x1d0] sm:$0xff]  ;;  %v2350_v51 = vld [vmem:[#allocation3 + $0x200] sm:$0xff]  ;;  %v2349_v54 = vld [vmem:[#allocation3 + $0x1f8] sm:$0xff] }
 0x57d   :  { %v2352_v41 = vld [vmem:[#allocation3 + $0x210] sm:$0xff]  ;;  %v2351_v58 = vld [vmem:[#allocation3 + $0x208] sm:$0xff]  ;;  %v2357_v44 = vld [vmem:[#allocation3 + $0x238] sm:$0xff] }
 0x57e   :  { %v2359_v19 = vld [vmem:[#allocation3 + $0x248] sm:$0xff]  ;;  %v2405_v10 = vld [vmem:[#allocation3 + $0x3b8] sm:$0xff]  ;;  %v2412_v56 = vld [vmem:[#allocation3 + $0x3f0] sm:$0xff] }
 0x57f   :  { %2786 = vmatpush1.bf16.msra.mxu1 %v2307_v3  ;;  %2958 = vmatpush1.bf16.msra.mxu0 %v2309_v34  ;;  %v2356_v3 = vld [vmem:[#allocation3 + $0x230] sm:$0xff]  ;;  %v2358_v34 = vld [vmem:[#allocation3 + $0x240] sm:$0xff]  ;;  %v2407_v11 = vld [vmem:[#allocation3 + $0x3c8] sm:$0xff] }
 0x580   :  { %2787 = vmatprep.subr.bf16.mxu1 %v2315_v23  ;;  %2959 = vmatprep.subr.bf16.mxu0 %v2317_v38  ;;  %v2364_v23 = vld [vmem:[#allocation3 + $0x270] sm:$0xff]  ;;  %v2366_v38 = vld [vmem:[#allocation3 + $0x280] sm:$0xff]  ;;  %v2517_v42 = vld [vmem:[#allocation3 + $0x738] sm:$0xff] }
 0x581   :  { %v2414_v1 = vld [vmem:[#allocation3 + $0x400] sm:$0xff]  ;;  %v2519_v45 = vld [vmem:[#allocation3 + $0x748] sm:$0xff]  ;;  %v2524_v6 = vld [vmem:[#allocation3 + $0x770] sm:$0xff] }
 0x582   :  { %v2526_v17 = vld [vmem:[#allocation3 + $0x780] sm:$0xff]  ;;  %v2629_v8 = vld [vmem:[#allocation3 + $0xab8] sm:$0xff]  ;;  %v2631_v18 = vld [vmem:[#allocation3 + $0xac8] sm:$0xff] }
 0x583   :  { %2788 = vmatpush1.bf16.msra.mxu1 %v2314_v35  ;;  %2960 = vmatpush1.bf16.msra.mxu0 %v2316_v36  ;;  %v2363_v35 = vld [vmem:[#allocation3 + $0x268] sm:$0xff]  ;;  %v2365_v36 = vld [vmem:[#allocation3 + $0x278] sm:$0xff]  ;;  %v2636_v9 = vld [vmem:[#allocation3 + $0xaf0] sm:$0xff] }
 0x584   :  { %2789 = vmatprep.subr.bf16.mxu1 %v2322_v49  ;;  %2961 = vmatprep.subr.bf16.mxu0 %v2324_v7  ;;  %v2371_v49 = vld [vmem:[#allocation3 + $0x2a8] sm:$0xff]  ;;  %v2373_v7 = vld [vmem:[#allocation3 + $0x2b8] sm:$0xff]  ;;  %v2638_v27 = vld [vmem:[#allocation3 + $0xb00] sm:$0xff] }
 0x585   :  { %v2297_v12 = vld [vmem:[#allocation3 + $0x58] sm:$0xff]  ;;  %v2299_v22 = vld [vmem:[#allocation3 + $0x68] sm:$0xff] }
 0x587   :  { %2790 = vmatpush1.bf16.msra.mxu1 %v2321_v37  ;;  %2962 = vmatpush1.bf16.msra.mxu0 %v2323_v59  ;;  %v2370_v37 = vld [vmem:[#allocation3 + $0x2a0] sm:$0xff]  ;;  %v2372_v59 = vld [vmem:[#allocation3 + $0x2b0] sm:$0xff] }
 0x588   :  { %2791 = vmatprep.subr.bf16.mxu1 %v2329_v47  ;;  %2963 = vmatprep.subr.bf16.mxu0 %v2331_v43  ;;  %v2378_v47 = vld [vmem:[#allocation3 + $0x2e0] sm:$0xff]  ;;  %v2380_v43 = vld [vmem:[#allocation3 + $0x2f0] sm:$0xff] }
 0x58b   :  { %2792 = vmatpush1.bf16.msra.mxu1 %v2328_v13  ;;  %2964 = vmatpush1.bf16.msra.mxu0 %v2330_v40  ;;  %v2377_v13 = vld [vmem:[#allocation3 + $0x2d8] sm:$0xff]  ;;  %v2379_v40 = vld [vmem:[#allocation3 + $0x2e8] sm:$0xff] }
 0x58c   :  { %2793 = vmatprep.subr.bf16.mxu1 %v2336_v48  ;;  %2965 = vmatprep.subr.bf16.mxu0 %v2338_v50  ;;  %v2385_v48 = vld [vmem:[#allocation3 + $0x318] sm:$0xff]  ;;  %v2387_v50 = vld [vmem:[#allocation3 + $0x328] sm:$0xff] }
 0x58f   :  { %2794 = vmatpush1.bf16.msra.mxu1 %v2335_v60  ;;  %2966 = vmatpush1.bf16.msra.mxu0 %v2337_v46  ;;  %v2384_v60 = vld [vmem:[#allocation3 + $0x310] sm:$0xff]  ;;  %v2386_v46 = vld [vmem:[#allocation3 + $0x320] sm:$0xff] }
 0x590   :  { %2795 = vmatprep.subr.bf16.mxu1 %v2343_v25  ;;  %2967 = vmatprep.subr.bf16.mxu0 %v2345_v52  ;;  %v2392_v25 = vld [vmem:[#allocation3 + $0x350] sm:$0xff]  ;;  %v2394_v52 = vld [vmem:[#allocation3 + $0x360] sm:$0xff] }
 0x593   :  { %2796 = vmatpush1.bf16.msra.mxu1 %v2342_v29  ;;  %2968 = vmatpush1.bf16.msra.mxu0 %v2344_v33  ;;  %v2391_v29 = vld [vmem:[#allocation3 + $0x348] sm:$0xff]  ;;  %v2393_v33 = vld [vmem:[#allocation3 + $0x358] sm:$0xff] }
 0x594   :  { %2797 = vmatprep.subr.bf16.mxu1 %v2350_v51  ;;  %2969 = vmatprep.subr.bf16.mxu0 %v2352_v41  ;;  %v2399_v51 = vld [vmem:[#allocation3 + $0x388] sm:$0xff]  ;;  %v2401_v41 = vld [vmem:[#allocation3 + $0x398] sm:$0xff] }
 0x597   :  { %2798 = vmatpush1.bf16.msra.mxu1 %v2349_v54  ;;  %2970 = vmatpush1.bf16.msra.mxu0 %v2351_v58  ;;  %v4812_v54 = vpack.c.bf16 %v2274_v0, %v2266_v28  ;;  %v2398_v58 = vld [vmem:[#allocation3 + $0x380] sm:$0xff]  ;;  %v2413_v28 = vld [vmem:[#allocation3 + $0x3f8] sm:$0xff]  ;;  %v2415_v0 = vld [vmem:[#allocation3 + $0x408] sm:$0xff] }
 0x598   :  { %2799 = vmatprep.subr.bf16.mxu1 %v2357_v44  ;;  %2971 = vmatprep.subr.bf16.mxu0 %v2359_v19  ;;  %v2400_v44 = vld [vmem:[#allocation3 + $0x390] sm:$0xff]  ;;  %v2406_v19 = vld [vmem:[#allocation3 + $0x3c0] sm:$0xff] }
 0x59b   :  { %2800 = vmatpush1.bf16.msra.mxu1 %v2356_v3  ;;  %2972 = vmatpush1.bf16.msra.mxu0 %v2358_v34  ;;  %v2408_v3 = vld [vmem:[#allocation3 + $0x3d0] sm:$0xff]  ;;  %v4818_v34 = vpack.c.bf16 %v2277_v5, %v2269_v31  ;;  %v2422_v5 = vld [vmem:[#allocation3 + $0x440] sm:$0xff] }
 0x59c   :  { %2801 = vmatprep.subr.bf16.mxu1 %v2364_v23  ;;  %2973 = vmatprep.subr.bf16.mxu0 %v2366_v38  ;;  %v2420_v31 = vld [vmem:[#allocation3 + $0x430] sm:$0xff]  ;;  %v2419_v23 = vld [vmem:[#allocation3 + $0x428] sm:$0xff]  ;;  %v2421_v38 = vld [vmem:[#allocation3 + $0x438] sm:$0xff] }
 0x59f   :  { %2802 = vmatpush1.bf16.msra.mxu1 %v2363_v35  ;;  %2974 = vmatpush1.bf16.msra.mxu0 %v2365_v36  ;;  %v2427_v35 = vld [vmem:[#allocation3 + $0x468] sm:$0xff]  ;;  %v2429_v36 = vld [vmem:[#allocation3 + $0x478] sm:$0xff] }
 0x5a0   :  { %2803 = vmatprep.subr.bf16.mxu1 %v2371_v49  ;;  %2975 = vmatprep.subr.bf16.mxu0 %v2373_v7  ;;  %v2426_v49 = vld [vmem:[#allocation3 + $0x460] sm:$0xff]  ;;  %v2428_v7 = vld [vmem:[#allocation3 + $0x470] sm:$0xff] }
 0x5a3   :  { %2804 = vmatpush1.bf16.msra.mxu1 %v2370_v37  ;;  %2976 = vmatpush1.bf16.msra.mxu0 %v2372_v59  ;;  %v2434_v37 = vld [vmem:[#allocation3 + $0x4a0] sm:$0xff]  ;;  %v2436_v59 = vld [vmem:[#allocation3 + $0x4b0] sm:$0xff] }
 0x5a4   :  { %2805 = vmatprep.subr.bf16.mxu1 %v2378_v47  ;;  %2977 = vmatprep.subr.bf16.mxu0 %v2380_v43  ;;  %v2433_v47 = vld [vmem:[#allocation3 + $0x498] sm:$0xff]  ;;  %v2435_v43 = vld [vmem:[#allocation3 + $0x4a8] sm:$0xff] }
 0x5a7   :  { %2806 = vmatpush1.bf16.msra.mxu1 %v2377_v13  ;;  %2978 = vmatpush1.bf16.msra.mxu0 %v2379_v40  ;;  %v2441_v13 = vld [vmem:[#allocation3 + $0x4d8] sm:$0xff]  ;;  %v2443_v40 = vld [vmem:[#allocation3 + $0x4e8] sm:$0xff] }
 0x5a8   :  { %2807 = vmatprep.subr.bf16.mxu1 %v2385_v48  ;;  %2979 = vmatprep.subr.bf16.mxu0 %v2387_v50  ;;  %v2440_v48 = vld [vmem:[#allocation3 + $0x4d0] sm:$0xff]  ;;  %v2442_v50 = vld [vmem:[#allocation3 + $0x4e0] sm:$0xff] }
 0x5ab   :  { %2808 = vmatpush1.bf16.msra.mxu1 %v2384_v60  ;;  %2980 = vmatpush1.bf16.msra.mxu0 %v2386_v46  ;;  %v2448_v60 = vld [vmem:[#allocation3 + $0x510] sm:$0xff]  ;;  %v2450_v46 = vld [vmem:[#allocation3 + $0x520] sm:$0xff] }
 0x5ac   :  { %2809 = vmatprep.subr.bf16.mxu1 %v2392_v25  ;;  %2981 = vmatprep.subr.bf16.mxu0 %v2394_v52  ;;  %v2447_v25 = vld [vmem:[#allocation3 + $0x508] sm:$0xff]  ;;  %v2449_v52 = vld [vmem:[#allocation3 + $0x518] sm:$0xff] }
 0x5af   :  { %2810 = vmatpush1.bf16.msra.mxu1 %v2391_v29  ;;  %2982 = vmatpush1.bf16.msra.mxu0 %v2393_v33  ;;  %v2455_v29 = vld [vmem:[#allocation3 + $0x548] sm:$0xff]  ;;  %v2457_v33 = vld [vmem:[#allocation3 + $0x558] sm:$0xff] }
 0x5b0   :  { %2822 = vmatprep.subr.bf16.mxu1 %v2399_v51  ;;  %2994 = vmatprep.subr.bf16.mxu0 %v2401_v41  ;;  %v2454_v51 = vld [vmem:[#allocation3 + $0x540] sm:$0xff]  ;;  %v2456_v41 = vld [vmem:[#allocation3 + $0x550] sm:$0xff] }
 0x5b2   :  { %2812 = vmatmul.mubr.bf16.vlgmr.msra.gmra.mrb[12].mxu1 %v4812_v54  ;;  %2984 = vmatmul.mubr.bf16.vlgmr.msra.gmra.mrb[20].mxu0 %v4812_v54 }
 0x5b3   :  { %2823 = vmatpush1.bf16.msra.mxu1 %v2398_v58  ;;  %2995 = vmatpush1.bf16.msra.mxu0 %v2400_v44  ;;  %v2462_v58 = vld [vmem:[#allocation3 + $0x580] sm:$0xff]  ;;  %v2464_v44 = vld [vmem:[#allocation3 + $0x590] sm:$0xff] }
 0x5b4   :  { %2824 = vmatprep.subr.bf16.mxu1 %v2406_v19  ;;  %2996 = vmatprep.subr.bf16.mxu0 %v2408_v3  ;;  %v2461_v19 = vld [vmem:[#allocation3 + $0x578] sm:$0xff]  ;;  %v2463_v3 = vld [vmem:[#allocation3 + $0x588] sm:$0xff] }
 0x5b5   :  { %2854 = vmatprep.mubr.bf16.mxu1 %v4818_v34  ;;  %3026 = vmatprep.mubr.bf16.mxu0 %v4818_v34 }
 0x5b7   :  { %2825 = vmatpush1.bf16.msra.mxu1 %v2405_v10  ;;  %2997 = vmatpush1.bf16.msra.mxu0 %v2407_v11  ;;  %v2469_v10 = vld [vmem:[#allocation3 + $0x5b8] sm:$0xff]  ;;  %v2471_v11 = vld [vmem:[#allocation3 + $0x5c8] sm:$0xff] }
 0x5b8   :  { %2826 = vmatprep.subr.bf16.mxu1 %v2413_v28  ;;  %2998 = vmatprep.subr.bf16.mxu0 %v2415_v0  ;;  %v2468_v28 = vld [vmem:[#allocation3 + $0x5b0] sm:$0xff]  ;;  %v2470_v0 = vld [vmem:[#allocation3 + $0x5c0] sm:$0xff] }
 0x5bb   :  { %2827 = vmatpush1.bf16.msra.mxu1 %v2412_v56  ;;  %2999 = vmatpush1.bf16.msra.mxu0 %v2414_v1  ;;  %v2476_v56 = vld [vmem:[#allocation3 + $0x5f0] sm:$0xff]  ;;  %v2478_v1 = vld [vmem:[#allocation3 + $0x600] sm:$0xff] }
 0x5bc   :  { %2828 = vmatprep.subr.bf16.mxu1 %v2420_v31  ;;  %3000 = vmatprep.subr.bf16.mxu0 %v2422_v5  ;;  %v2475_v31 = vld [vmem:[#allocation3 + $0x5e8] sm:$0xff]  ;;  %v2477_v5 = vld [vmem:[#allocation3 + $0x5f8] sm:$0xff] }
 0x5bf   :  { %2829 = vmatpush1.bf16.msra.mxu1 %v2419_v23  ;;  %3001 = vmatpush1.bf16.msra.mxu0 %v2421_v38  ;;  %v2483_v23 = vld [vmem:[#allocation3 + $0x628] sm:$0xff]  ;;  %v2485_v38 = vld [vmem:[#allocation3 + $0x638] sm:$0xff] }
 0x5c0   :  { %2830 = vmatprep.subr.bf16.mxu1 %v2427_v35  ;;  %3002 = vmatprep.subr.bf16.mxu0 %v2429_v36  ;;  %v2482_v35 = vld [vmem:[#allocation3 + $0x620] sm:$0xff]  ;;  %v2484_v36 = vld [vmem:[#allocation3 + $0x630] sm:$0xff] }
 0x5c3   :  { %2831 = vmatpush1.bf16.msra.mxu1 %v2426_v49  ;;  %3003 = vmatpush1.bf16.msra.mxu0 %v2428_v7  ;;  %v2490_v49 = vld [vmem:[#allocation3 + $0x660] sm:$0xff]  ;;  %v2492_v7 = vld [vmem:[#allocation3 + $0x670] sm:$0xff] }
 0x5c4   :  { %2832 = vmatprep.subr.bf16.mxu1 %v2434_v37  ;;  %3004 = vmatprep.subr.bf16.mxu0 %v2436_v59  ;;  %v2489_v37 = vld [vmem:[#allocation3 + $0x658] sm:$0xff]  ;;  %v2491_v59 = vld [vmem:[#allocation3 + $0x668] sm:$0xff] }
 0x5c7   :  { %2833 = vmatpush1.bf16.msra.mxu1 %v2433_v47  ;;  %3005 = vmatpush1.bf16.msra.mxu0 %v2435_v43  ;;  %v2497_v47 = vld [vmem:[#allocation3 + $0x698] sm:$0xff]  ;;  %v2499_v43 = vld [vmem:[#allocation3 + $0x6a8] sm:$0xff] }
 0x5c8   :  { %2834 = vmatprep.subr.bf16.mxu1 %v2441_v13  ;;  %3006 = vmatprep.subr.bf16.mxu0 %v2443_v40  ;;  %v2496_v13 = vld [vmem:[#allocation3 + $0x690] sm:$0xff]  ;;  %v2498_v40 = vld [vmem:[#allocation3 + $0x6a0] sm:$0xff] }
 0x5cb   :  { %2835 = vmatpush1.bf16.msra.mxu1 %v2440_v48  ;;  %3007 = vmatpush1.bf16.msra.mxu0 %v2442_v50  ;;  %v2504_v48 = vld [vmem:[#allocation3 + $0x6d0] sm:$0xff]  ;;  %v2506_v50 = vld [vmem:[#allocation3 + $0x6e0] sm:$0xff] }
 0x5cc   :  { %2836 = vmatprep.subr.bf16.mxu1 %v2448_v60  ;;  %3008 = vmatprep.subr.bf16.mxu0 %v2450_v46  ;;  %v2503_v60 = vld [vmem:[#allocation3 + $0x6c8] sm:$0xff]  ;;  %v2505_v46 = vld [vmem:[#allocation3 + $0x6d8] sm:$0xff] }
 0x5cf   :  { %2837 = vmatpush1.bf16.msra.mxu1 %v2447_v25  ;;  %3009 = vmatpush1.bf16.msra.mxu0 %v2449_v52  ;;  %v2511_v25 = vld [vmem:[#allocation3 + $0x708] sm:$0xff]  ;;  %v2513_v52 = vld [vmem:[#allocation3 + $0x718] sm:$0xff] }
 0x5d0   :  { %2838 = vmatprep.subr.bf16.mxu1 %v2455_v29  ;;  %3010 = vmatprep.subr.bf16.mxu0 %v2457_v33  ;;  %v4828_v29 = vpack.c.bf16 %v2276_v2, %v2268_v21  ;;  %v2510_v33 = vld [vmem:[#allocation3 + $0x700] sm:$0xff]  ;;  %v2525_v21 = vld [vmem:[#allocation3 + $0x778] sm:$0xff]  ;;  %v2527_v2 = vld [vmem:[#allocation3 + $0x788] sm:$0xff] }
 0x5d3   :  { %2839 = vmatpush1.bf16.msra.mxu1 %v2454_v51  ;;  %3011 = vmatpush1.bf16.msra.mxu0 %v2456_v41  ;;  %v2512_v51 = vld [vmem:[#allocation3 + $0x710] sm:$0xff]  ;;  %v2518_v41 = vld [vmem:[#allocation3 + $0x740] sm:$0xff] }
 0x5d4   :  { %2840 = vmatprep.subr.bf16.mxu1 %v2462_v58  ;;  %3012 = vmatprep.subr.bf16.mxu0 %v2464_v44  ;;  %v2520_v58 = vld [vmem:[#allocation3 + $0x750] sm:$0xff]  ;;  %v4834_v44 = vpack.c.bf16 %v2279_v30, %v2271_v24  ;;  %v2534_v30 = vld [vmem:[#allocation3 + $0x7c0] sm:$0xff] }
 0x5d5   :  { %v2532_v24 = vld [vmem:[#allocation3 + $0x7b0] sm:$0xff] }
 0x5d7   :  { %2841 = vmatpush1.bf16.msra.mxu1 %v2461_v19  ;;  %3013 = vmatpush1.bf16.msra.mxu0 %v2463_v3  ;;  %v2531_v19 = vld [vmem:[#allocation3 + $0x7a8] sm:$0xff]  ;;  %v2533_v3 = vld [vmem:[#allocation3 + $0x7b8] sm:$0xff] }
 0x5d8   :  { %2842 = vmatprep.subr.bf16.mxu1 %v2469_v10  ;;  %3014 = vmatprep.subr.bf16.mxu0 %v2471_v11  ;;  %v2539_v10 = vld [vmem:[#allocation3 + $0x7e8] sm:$0xff]  ;;  %v2541_v11 = vld [vmem:[#allocation3 + $0x7f8] sm:$0xff] }
 0x5db   :  { %2843 = vmatpush1.bf16.msra.mxu1 %v2468_v28  ;;  %3015 = vmatpush1.bf16.msra.mxu0 %v2470_v0  ;;  %v2538_v28 = vld [vmem:[#allocation3 + $0x7e0] sm:$0xff]  ;;  %v2540_v0 = vld [vmem:[#allocation3 + $0x7f0] sm:$0xff] }
 0x5dc   :  { %2844 = vmatprep.subr.bf16.mxu1 %v2476_v56  ;;  %3016 = vmatprep.subr.bf16.mxu0 %v2478_v1  ;;  %v2546_v56 = vld [vmem:[#allocation3 + $0x820] sm:$0xff]  ;;  %v2548_v1 = vld [vmem:[#allocation3 + $0x830] sm:$0xff] }
 0x5df   :  { %2845 = vmatpush1.bf16.msra.mxu1 %v2475_v31  ;;  %3017 = vmatpush1.bf16.msra.mxu0 %v2477_v5  ;;  %v2545_v31 = vld [vmem:[#allocation3 + $0x818] sm:$0xff]  ;;  %v2547_v5 = vld [vmem:[#allocation3 + $0x828] sm:$0xff] }
 0x5e0   :  { %2846 = vmatprep.subr.bf16.mxu1 %v2483_v23  ;;  %3018 = vmatprep.subr.bf16.mxu0 %v2485_v38  ;;  %v2553_v23 = vld [vmem:[#allocation3 + $0x858] sm:$0xff]  ;;  %v2555_v38 = vld [vmem:[#allocation3 + $0x868] sm:$0xff] }
 0x5e3   :  { %2847 = vmatpush1.bf16.msra.mxu1 %v2482_v35  ;;  %3019 = vmatpush1.bf16.msra.mxu0 %v2484_v36  ;;  %v2552_v35 = vld [vmem:[#allocation3 + $0x850] sm:$0xff]  ;;  %v2554_v36 = vld [vmem:[#allocation3 + $0x860] sm:$0xff] }
 0x5e4   :  { %2848 = vmatprep.subr.bf16.mxu1 %v2490_v49  ;;  %3020 = vmatprep.subr.bf16.mxu0 %v2492_v7  ;;  %v2560_v49 = vld [vmem:[#allocation3 + $0x890] sm:$0xff]  ;;  %v2562_v7 = vld [vmem:[#allocation3 + $0x8a0] sm:$0xff] }
 0x5e7   :  { %2849 = vmatpush1.bf16.msra.mxu1 %v2489_v37  ;;  %3021 = vmatpush1.bf16.msra.mxu0 %v2491_v59  ;;  %v2559_v37 = vld [vmem:[#allocation3 + $0x888] sm:$0xff]  ;;  %v2561_v59 = vld [vmem:[#allocation3 + $0x898] sm:$0xff] }
 0x5e8   :  { %2850 = vmatprep.subr.bf16.mxu1 %v2497_v47  ;;  %3022 = vmatprep.subr.bf16.mxu0 %v2499_v43  ;;  %v2567_v47 = vld [vmem:[#allocation3 + $0x8c8] sm:$0xff]  ;;  %v2569_v43 = vld [vmem:[#allocation3 + $0x8d8] sm:$0xff] }
 0x5eb   :  { %2851 = vmatpush1.bf16.msra.mxu1 %v2496_v13  ;;  %3023 = vmatpush1.bf16.msra.mxu0 %v2498_v40  ;;  %v2566_v13 = vld [vmem:[#allocation3 + $0x8c0] sm:$0xff]  ;;  %v2568_v40 = vld [vmem:[#allocation3 + $0x8d0] sm:$0xff] }
 0x5ec   :  { %2852 = vmatprep.subr.bf16.mxu1 %v2504_v48  ;;  %3024 = vmatprep.subr.bf16.mxu0 %v2506_v50  ;;  %v2574_v48 = vld [vmem:[#allocation3 + $0x900] sm:$0xff]  ;;  %v2576_v50 = vld [vmem:[#allocation3 + $0x910] sm:$0xff] }
 0x5ef   :  { %2853 = vmatpush1.bf16.msra.mxu1 %v2503_v60  ;;  %3025 = vmatpush1.bf16.msra.mxu0 %v2505_v46  ;;  %v2573_v60 = vld [vmem:[#allocation3 + $0x8f8] sm:$0xff]  ;;  %v2575_v46 = vld [vmem:[#allocation3 + $0x908] sm:$0xff] }
 0x5f0   :  { %2865 = vmatprep.subr.bf16.mxu1 %v2511_v25  ;;  %3037 = vmatprep.subr.bf16.mxu0 %v2513_v52  ;;  %v2581_v25 = vld [vmem:[#allocation3 + $0x938] sm:$0xff]  ;;  %v2583_v52 = vld [vmem:[#allocation3 + $0x948] sm:$0xff] }
 0x5f2   :  { %2855 = vmatmul.mubr.bf16.vlgmr.msra.gmra.mrb[12].mxu1 %v4828_v29  ;;  %3027 = vmatmul.mubr.bf16.vlgmr.msra.gmra.mrb[20].mxu0 %v4828_v29 }
 0x5f3   :  { %2866 = vmatpush1.bf16.msra.mxu1 %v2510_v33  ;;  %3038 = vmatpush1.bf16.msra.mxu0 %v2512_v51  ;;  %v2580_v33 = vld [vmem:[#allocation3 + $0x930] sm:$0xff]  ;;  %v2582_v51 = vld [vmem:[#allocation3 + $0x940] sm:$0xff] }
 0x5f4   :  { %2867 = vmatprep.subr.bf16.mxu1 %v2518_v41  ;;  %3039 = vmatprep.subr.bf16.mxu0 %v2520_v58  ;;  %v2588_v41 = vld [vmem:[#allocation3 + $0x970] sm:$0xff]  ;;  %v2590_v58 = vld [vmem:[#allocation3 + $0x980] sm:$0xff] }
 0x5f5   :  { %2897 = vmatprep.mubr.bf16.mxu1 %v4834_v44  ;;  %3069 = vmatprep.mubr.bf16.mxu0 %v4834_v44 }
 0x5f7   :  { %2868 = vmatpush1.bf16.msra.mxu1 %v2517_v42  ;;  %3040 = vmatpush1.bf16.msra.mxu0 %v2519_v45  ;;  %v2587_v42 = vld [vmem:[#allocation3 + $0x968] sm:$0xff]  ;;  %v2589_v45 = vld [vmem:[#allocation3 + $0x978] sm:$0xff] }
 0x5f8   :  { %2869 = vmatprep.subr.bf16.mxu1 %v2525_v21  ;;  %3041 = vmatprep.subr.bf16.mxu0 %v2527_v2  ;;  %v2595_v21 = vld [vmem:[#allocation3 + $0x9a8] sm:$0xff]  ;;  %v2597_v2 = vld [vmem:[#allocation3 + $0x9b8] sm:$0xff] }
 0x5fb   :  { %2870 = vmatpush1.bf16.msra.mxu1 %v2524_v6  ;;  %3042 = vmatpush1.bf16.msra.mxu0 %v2526_v17  ;;  %v2594_v6 = vld [vmem:[#allocation3 + $0x9a0] sm:$0xff]  ;;  %v2596_v17 = vld [vmem:[#allocation3 + $0x9b0] sm:$0xff] }
 0x5fc   :  { %2871 = vmatprep.subr.bf16.mxu1 %v2532_v24  ;;  %3043 = vmatprep.subr.bf16.mxu0 %v2534_v30  ;;  %v2602_v24 = vld [vmem:[#allocation3 + $0x9e0] sm:$0xff]  ;;  %v2604_v30 = vld [vmem:[#allocation3 + $0x9f0] sm:$0xff] }
 0x5ff   :  { %2872 = vmatpush1.bf16.msra.mxu1 %v2531_v19  ;;  %3044 = vmatpush1.bf16.msra.mxu0 %v2533_v3  ;;  %v2601_v19 = vld [vmem:[#allocation3 + $0x9d8] sm:$0xff]  ;;  %v2603_v3 = vld [vmem:[#allocation3 + $0x9e8] sm:$0xff] }
 0x600   :  { %2873 = vmatprep.subr.bf16.mxu1 %v2539_v10  ;;  %3045 = vmatprep.subr.bf16.mxu0 %v2541_v11  ;;  %v2609_v10 = vld [vmem:[#allocation3 + $0xa18] sm:$0xff]  ;;  %v2611_v11 = vld [vmem:[#allocation3 + $0xa28] sm:$0xff] }
 0x603   :  { %2874 = vmatpush1.bf16.msra.mxu1 %v2538_v28  ;;  %3046 = vmatpush1.bf16.msra.mxu0 %v2540_v0  ;;  %v2608_v28 = vld [vmem:[#allocation3 + $0xa10] sm:$0xff]  ;;  %v2610_v0 = vld [vmem:[#allocation3 + $0xa20] sm:$0xff] }
 0x604   :  { %2875 = vmatprep.subr.bf16.mxu1 %v2546_v56  ;;  %3047 = vmatprep.subr.bf16.mxu0 %v2548_v1  ;;  %v2616_v56 = vld [vmem:[#allocation3 + $0xa50] sm:$0xff]  ;;  %v2618_v1 = vld [vmem:[#allocation3 + $0xa60] sm:$0xff] }
 0x607   :  { %2876 = vmatpush1.bf16.msra.mxu1 %v2545_v31  ;;  %3048 = vmatpush1.bf16.msra.mxu0 %v2547_v5  ;;  %v2615_v31 = vld [vmem:[#allocation3 + $0xa48] sm:$0xff]  ;;  %v2617_v5 = vld [vmem:[#allocation3 + $0xa58] sm:$0xff] }
 0x608   :  { %2877 = vmatprep.subr.bf16.mxu1 %v2553_v23  ;;  %3049 = vmatprep.subr.bf16.mxu0 %v2555_v38  ;;  %v2623_v23 = vld [vmem:[#allocation3 + $0xa88] sm:$0xff]  ;;  %v2625_v38 = vld [vmem:[#allocation3 + $0xa98] sm:$0xff] }
 0x60b   :  { %2878 = vmatpush1.bf16.msra.mxu1 %v2552_v35  ;;  %3050 = vmatpush1.bf16.msra.mxu0 %v2554_v36  ;;  %v4844_v35 = vpack.c.bf16 %v2278_v20, %v2270_v14  ;;  %v2622_v36 = vld [vmem:[#allocation3 + $0xa80] sm:$0xff]  ;;  %v2637_v14 = vld [vmem:[#allocation3 + $0xaf8] sm:$0xff]  ;;  %v2639_v20 = vld [vmem:[#allocation3 + $0xb08] sm:$0xff] }
 0x60c   :  { %2879 = vmatprep.subr.bf16.mxu1 %v2560_v49  ;;  %3051 = vmatprep.subr.bf16.mxu0 %v2562_v7  ;;  %v2624_v49 = vld [vmem:[#allocation3 + $0xa90] sm:$0xff]  ;;  %v2630_v7 = vld [vmem:[#allocation3 + $0xac0] sm:$0xff] }
 0x60f   :  { %2880 = vmatpush1.bf16.msra.mxu1 %v2559_v37  ;;  %3052 = vmatpush1.bf16.msra.mxu0 %v2561_v59  ;;  %v2632_v37 = vld [vmem:[#allocation3 + $0xad0] sm:$0xff]  ;;  %v4850_v59 = vpack.c.bf16 %v2281_v53, %v2273_v16  ;;  %v2646_v53 = vld [vmem:[#allocation3 + $0xb40] sm:$0xff] }
 0x610   :  { %2881 = vmatprep.subr.bf16.mxu1 %v2567_v47  ;;  %3053 = vmatprep.subr.bf16.mxu0 %v2569_v43  ;;  %v2644_v16 = vld [vmem:[#allocation3 + $0xb30] sm:$0xff]  ;;  %v2643_v47 = vld [vmem:[#allocation3 + $0xb28] sm:$0xff]  ;;  %v2645_v43 = vld [vmem:[#allocation3 + $0xb38] sm:$0xff] }
 0x613   :  { %2882 = vmatpush1.bf16.msra.mxu1 %v2566_v13  ;;  %3054 = vmatpush1.bf16.msra.mxu0 %v2568_v40  ;;  %v2651_v13 = vld [vmem:[#allocation3 + $0xb68] sm:$0xff]  ;;  %v2653_v40 = vld [vmem:[#allocation3 + $0xb78] sm:$0xff] }
 0x614   :  { %2883 = vmatprep.subr.bf16.mxu1 %v2574_v48  ;;  %3055 = vmatprep.subr.bf16.mxu0 %v2576_v50  ;;  %v2650_v48 = vld [vmem:[#allocation3 + $0xb60] sm:$0xff]  ;;  %v2652_v50 = vld [vmem:[#allocation3 + $0xb70] sm:$0xff] }
 0x617   :  { %2884 = vmatpush1.bf16.msra.mxu1 %v2573_v60  ;;  %3056 = vmatpush1.bf16.msra.mxu0 %v2575_v46  ;;  %v2658_v60 = vld [vmem:[#allocation3 + $0xba0] sm:$0xff]  ;;  %v2660_v46 = vld [vmem:[#allocation3 + $0xbb0] sm:$0xff] }
 0x618   :  { %2885 = vmatprep.subr.bf16.mxu1 %v2581_v25  ;;  %3057 = vmatprep.subr.bf16.mxu0 %v2583_v52  ;;  %v2657_v25 = vld [vmem:[#allocation3 + $0xb98] sm:$0xff]  ;;  %v2659_v52 = vld [vmem:[#allocation3 + $0xba8] sm:$0xff] }
 0x61b   :  { %2886 = vmatpush1.bf16.msra.mxu1 %v2580_v33  ;;  %3058 = vmatpush1.bf16.msra.mxu0 %v2582_v51  ;;  %v2665_v33 = vld [vmem:[#allocation3 + $0xbd8] sm:$0xff]  ;;  %v2667_v51 = vld [vmem:[#allocation3 + $0xbe8] sm:$0xff] }
 0x61c   :  { %2887 = vmatprep.subr.bf16.mxu1 %v2588_v41  ;;  %3059 = vmatprep.subr.bf16.mxu0 %v2590_v58  ;;  %v2664_v41 = vld [vmem:[#allocation3 + $0xbd0] sm:$0xff]  ;;  %v2666_v58 = vld [vmem:[#allocation3 + $0xbe0] sm:$0xff] }
 0x61f   :  { %2888 = vmatpush1.bf16.msra.mxu1 %v2587_v42  ;;  %3060 = vmatpush1.bf16.msra.mxu0 %v2589_v45  ;;  %v2672_v42 = vld [vmem:[#allocation3 + $0xc10] sm:$0xff]  ;;  %v2674_v45 = vld [vmem:[#allocation3 + $0xc20] sm:$0xff] }
 0x620   :  { %2889 = vmatprep.subr.bf16.mxu1 %v2595_v21  ;;  %3061 = vmatprep.subr.bf16.mxu0 %v2597_v2  ;;  %v2671_v21 = vld [vmem:[#allocation3 + $0xc08] sm:$0xff]  ;;  %v2673_v2 = vld [vmem:[#allocation3 + $0xc18] sm:$0xff] }
 0x623   :  { %2890 = vmatpush1.bf16.msra.mxu1 %v2594_v6  ;;  %3062 = vmatpush1.bf16.msra.mxu0 %v2596_v17  ;;  %v2679_v6 = vld [vmem:[#allocation3 + $0xc48] sm:$0xff]  ;;  %v2681_v17 = vld [vmem:[#allocation3 + $0xc58] sm:$0xff] }
 0x624   :  { %2891 = vmatprep.subr.bf16.mxu1 %v2602_v24  ;;  %3063 = vmatprep.subr.bf16.mxu0 %v2604_v30  ;;  %v2678_v24 = vld [vmem:[#allocation3 + $0xc40] sm:$0xff]  ;;  %v2680_v30 = vld [vmem:[#allocation3 + $0xc50] sm:$0xff] }
 0x627   :  { %2892 = vmatpush1.bf16.msra.mxu1 %v2601_v19  ;;  %3064 = vmatpush1.bf16.msra.mxu0 %v2603_v3  ;;  %v2686_v19 = vld [vmem:[#allocation3 + $0xc80] sm:$0xff]  ;;  %v2688_v3 = vld [vmem:[#allocation3 + $0xc90] sm:$0xff] }
 0x628   :  { %2893 = vmatprep.subr.bf16.mxu1 %v2609_v10  ;;  %3065 = vmatprep.subr.bf16.mxu0 %v2611_v11  ;;  %v2685_v10 = vld [vmem:[#allocation3 + $0xc78] sm:$0xff]  ;;  %v2687_v11 = vld [vmem:[#allocation3 + $0xc88] sm:$0xff] }
 0x62b   :  { %2894 = vmatpush1.bf16.msra.mxu1 %v2608_v28  ;;  %3066 = vmatpush1.bf16.msra.mxu0 %v2610_v0  ;;  %v2693_v28 = vld [vmem:[#allocation3 + $0xcb8] sm:$0xff]  ;;  %v2695_v0 = vld [vmem:[#allocation3 + $0xcc8] sm:$0xff] }
 0x62c   :  { %2895 = vmatprep.subr.bf16.mxu1 %v2616_v56  ;;  %3067 = vmatprep.subr.bf16.mxu0 %v2618_v1  ;;  %v2692_v56 = vld [vmem:[#allocation3 + $0xcb0] sm:$0xff]  ;;  %v2694_v1 = vld [vmem:[#allocation3 + $0xcc0] sm:$0xff] }
 0x62f   :  { %2896 = vmatpush1.bf16.msra.mxu1 %v2615_v31  ;;  %3068 = vmatpush1.bf16.msra.mxu0 %v2617_v5  ;;  %v2700_v31 = vld [vmem:[#allocation3 + $0xcf0] sm:$0xff]  ;;  %v2702_v5 = vld [vmem:[#allocation3 + $0xd00] sm:$0xff] }
 0x630   :  { %2908 = vmatprep.subr.bf16.mxu1 %v2623_v23  ;;  %3080 = vmatprep.subr.bf16.mxu0 %v2625_v38  ;;  %v2699_v23 = vld [vmem:[#allocation3 + $0xce8] sm:$0xff]  ;;  %v2701_v38 = vld [vmem:[#allocation3 + $0xcf8] sm:$0xff] }
 0x632   :  { %2898 = vmatmul.mubr.bf16.vlgmr.msra.gmra.mrb[12].mxu1 %v4844_v35  ;;  %3070 = vmatmul.mubr.bf16.vlgmr.msra.gmra.mrb[20].mxu0 %v4844_v35 }
 0x633   :  { %2909 = vmatpush1.bf16.msra.mxu1 %v2622_v36  ;;  %3081 = vmatpush1.bf16.msra.mxu0 %v2624_v49  ;;  %v2707_v36 = vld [vmem:[#allocation3 + $0xd28] sm:$0xff]  ;;  %v2709_v49 = vld [vmem:[#allocation3 + $0xd38] sm:$0xff] }
 0x634   :  { %2910 = vmatprep.subr.bf16.mxu1 %v2630_v7  ;;  %3082 = vmatprep.subr.bf16.mxu0 %v2632_v37  ;;  %v2706_v7 = vld [vmem:[#allocation3 + $0xd20] sm:$0xff]  ;;  %v2708_v37 = vld [vmem:[#allocation3 + $0xd30] sm:$0xff] }
 0x635   :  { %2940 = vmatprep.mubr.bf16.mxu1 %v4850_v59  ;;  %3112 = vmatprep.mubr.bf16.mxu0 %v4850_v59 }
 0x637   :  { %2911 = vmatpush1.bf16.msra.mxu1 %v2629_v8  ;;  %3083 = vmatpush1.bf16.msra.mxu0 %v2631_v18  ;;  %v2714_v8 = vld [vmem:[#allocation3 + $0xd60] sm:$0xff]  ;;  %v2716_v18 = vld [vmem:[#allocation3 + $0xd70] sm:$0xff] }
 0x638   :  { %2912 = vmatprep.subr.bf16.mxu1 %v2637_v14  ;;  %3084 = vmatprep.subr.bf16.mxu0 %v2639_v20  ;;  %v2713_v14 = vld [vmem:[#allocation3 + $0xd58] sm:$0xff]  ;;  %v2715_v20 = vld [vmem:[#allocation3 + $0xd68] sm:$0xff] }
 0x63b   :  { %2913 = vmatpush1.bf16.msra.mxu1 %v2636_v9  ;;  %3085 = vmatpush1.bf16.msra.mxu0 %v2638_v27  ;;  %v2721_v9 = vld [vmem:[#allocation3 + $0xd98] sm:$0xff]  ;;  %v2723_v27 = vld [vmem:[#allocation3 + $0xda8] sm:$0xff] }
 0x63c   :  { %2914 = vmatprep.subr.bf16.mxu1 %v2644_v16  ;;  %3086 = vmatprep.subr.bf16.mxu0 %v2646_v53  ;;  %v2720_v16 = vld [vmem:[#allocation3 + $0xd90] sm:$0xff]  ;;  %v2722_v53 = vld [vmem:[#allocation3 + $0xda0] sm:$0xff] }
 0x63f   :  { %2915 = vmatpush1.bf16.msra.mxu1 %v2643_v47  ;;  %3087 = vmatpush1.bf16.msra.mxu0 %v2645_v43  ;;  %v2728_v47 = vld [vmem:[#allocation3 + $0xdd0] sm:$0xff]  ;;  %v2730_v43 = vld [vmem:[#allocation3 + $0xde0] sm:$0xff] }
 0x640   :  { %2916 = vmatprep.subr.bf16.mxu1 %v2651_v13  ;;  %3088 = vmatprep.subr.bf16.mxu0 %v2653_v40  ;;  %v2727_v13 = vld [vmem:[#allocation3 + $0xdc8] sm:$0xff]  ;;  %v2729_v40 = vld [vmem:[#allocation3 + $0xdd8] sm:$0xff] }
 0x643   :  { %2917 = vmatpush1.bf16.msra.mxu1 %v2650_v48  ;;  %3089 = vmatpush1.bf16.msra.mxu0 %v2652_v50  ;;  %v2291_v48 = vld [vmem:[#allocation3 + $0x28] sm:$0xff]  ;;  %v2348_v50 = vld [vmem:[#allocation3 + $0x1f0] sm:$0xff] }
 0x644   :  { %2918 = vmatprep.subr.bf16.mxu1 %v2658_v60  ;;  %3090 = vmatprep.subr.bf16.mxu0 %v2660_v46  ;;  %v4860_v60 = vpack.c.bf16 %v2280_v15, %v2272_v26  ;;  %v2290_v46 = vld [vmem:[#allocation3 + $0x20] sm:$0xff]  ;;  %v2305_v26 = vld [vmem:[#allocation3 + $0x98] sm:$0xff] }
 0x645   :  { %v2362_v15 = vld [vmem:[#allocation3 + $0x260] sm:$0xff] }
 0x647   :  { %2919 = vmatpush1.bf16.msra.mxu1 %v2657_v25  ;;  %3091 = vmatpush1.bf16.msra.mxu0 %v2659_v52  ;;  %v2292_v25 = vld [vmem:[#allocation3 + $0x30] sm:$0xff]  ;;  %v2298_v52 = vld [vmem:[#allocation3 + $0x60] sm:$0xff] }
 0x648   :  { %2920 = vmatprep.subr.bf16.mxu1 %v2665_v33  ;;  %3092 = vmatprep.subr.bf16.mxu0 %v2667_v51  ;;  %v2355_v33 = vld [vmem:[#allocation3 + $0x228] sm:$0xff]  ;;  %v2304_v51 = vld [vmem:[#allocation3 + $0x90] sm:$0xff] }
 0x64b   :  { %2921 = vmatpush1.bf16.msra.mxu1 %v2664_v41  ;;  %3093 = vmatpush1.bf16.msra.mxu0 %v2666_v58  ;;  %v2306_v41 = vld [vmem:[#allocation3 + $0xa0] sm:$0xff]  ;;  %v2312_v58 = vld [vmem:[#allocation3 + $0xd0] sm:$0xff] }
 0x64c   :  { %2922 = vmatprep.subr.bf16.mxu1 %v2672_v42  ;;  %3094 = vmatprep.subr.bf16.mxu0 %v2674_v45  ;;  %v2369_v42 = vld [vmem:[#allocation3 + $0x298] sm:$0xff]  ;;  %v2311_v45 = vld [vmem:[#allocation3 + $0xc8] sm:$0xff] }
 0x64f   :  { %2923 = vmatpush1.bf16.msra.mxu1 %v2671_v21  ;;  %3095 = vmatpush1.bf16.msra.mxu0 %v2673_v2  ;;  %v2313_v21 = vld [vmem:[#allocation3 + $0xd8] sm:$0xff]  ;;  %v2319_v2 = vld [vmem:[#allocation3 + $0x108] sm:$0xff] }
 0x650   :  { %2924 = vmatprep.subr.bf16.mxu1 %v2679_v6  ;;  %3096 = vmatprep.subr.bf16.mxu0 %v2681_v17  ;;  %v2376_v6 = vld [vmem:[#allocation3 + $0x2d0] sm:$0xff] }
 0x651   :  { %v2320_v17 = vld [vmem:[#allocation3 + $0x110] sm:$0xff] }
 0x653   :  { %2925 = vmatpush1.bf16.msra.mxu1 %v2678_v24  ;;  %3097 = vmatpush1.bf16.msra.mxu0 %v2680_v30  ;;  %v2326_v24 = vld [vmem:[#allocation3 + $0x140] sm:$0xff]  ;;  %v2383_v30 = vld [vmem:[#allocation3 + $0x308] sm:$0xff] }
 0x654   :  { %2926 = vmatprep.subr.bf16.mxu1 %v2686_v19  ;;  %3098 = vmatprep.subr.bf16.mxu0 %v2688_v3  ;;  %v2325_v19 = vld [vmem:[#allocation3 + $0x138] sm:$0xff]  ;;  %v2327_v3 = vld [vmem:[#allocation3 + $0x148] sm:$0xff] }
 0x657   :  { %2927 = vmatpush1.bf16.msra.mxu1 %v2685_v10  ;;  %3099 = vmatpush1.bf16.msra.mxu0 %v2687_v11  ;;  %v2333_v10 = vld [vmem:[#allocation3 + $0x178] sm:$0xff]  ;;  %v2390_v11 = vld [vmem:[#allocation3 + $0x340] sm:$0xff] }
 0x658   :  { %2928 = vmatprep.subr.bf16.mxu1 %v2693_v28  ;;  %3100 = vmatprep.subr.bf16.mxu0 %v2695_v0  ;;  %v2332_v28 = vld [vmem:[#allocation3 + $0x170] sm:$0xff]  ;;  %v2334_v0 = vld [vmem:[#allocation3 + $0x180] sm:$0xff] }
 0x65b   :  { %2929 = vmatpush1.bf16.msra.mxu1 %v2692_v56  ;;  %3101 = vmatpush1.bf16.msra.mxu0 %v2694_v1  ;;  %v2340_v56 = vld [vmem:[#allocation3 + $0x1b0] sm:$0xff]  ;;  %v2397_v1 = vld [vmem:[#allocation3 + $0x378] sm:$0xff] }
 0x65c   :  { %2930 = vmatprep.subr.bf16.mxu1 %v2700_v31  ;;  %3102 = vmatprep.subr.bf16.mxu0 %v2702_v5  ;;  %v2339_v31 = vld [vmem:[#allocation3 + $0x1a8] sm:$0xff]  ;;  %v2341_v5 = vld [vmem:[#allocation3 + $0x1b8] sm:$0xff] }
 0x65f   :  { %2931 = vmatpush1.bf16.msra.mxu1 %v2699_v23  ;;  %3103 = vmatpush1.bf16.msra.mxu0 %v2701_v38  ;;  %v2347_v23 = vld [vmem:[#allocation3 + $0x1e8] sm:$0xff]  ;;  %v2460_v38 = vld [vmem:[#allocation3 + $0x570] sm:$0xff] }
 0x660   :  { %2932 = vmatprep.subr.bf16.mxu1 %v2707_v36  ;;  %3104 = vmatprep.subr.bf16.mxu0 %v2709_v49  ;;  %v2346_v36 = vld [vmem:[#allocation3 + $0x1e0] sm:$0xff]  ;;  %v2404_v49 = vld [vmem:[#allocation3 + $0x3b0] sm:$0xff] }
 0x663   :  { %2933 = vmatpush1.bf16.msra.mxu1 %v2706_v7  ;;  %3105 = vmatpush1.bf16.msra.mxu0 %v2708_v37  ;;  %v2354_v7 = vld [vmem:[#allocation3 + $0x220] sm:$0xff]  ;;  %v2467_v37 = vld [vmem:[#allocation3 + $0x5a8] sm:$0xff] }
 0x664   :  { %2934 = vmatprep.subr.bf16.mxu1 %v2714_v8  ;;  %3106 = vmatprep.subr.bf16.mxu0 %v2716_v18  ;;  %v2353_v8 = vld [vmem:[#allocation3 + $0x218] sm:$0xff]  ;;  %v2411_v18 = vld [vmem:[#allocation3 + $0x3e8] sm:$0xff] }
 0x667   :  { %2935 = vmatpush1.bf16.msra.mxu1 %v2713_v14  ;;  %3107 = vmatpush1.bf16.msra.mxu0 %v2715_v20  ;;  %v2361_v14 = vld [vmem:[#allocation3 + $0x258] sm:$0xff]  ;;  %v2474_v20 = vld [vmem:[#allocation3 + $0x5e0] sm:$0xff] }
 0x668   :  { %2936 = vmatprep.subr.bf16.mxu1 %v2721_v9  ;;  %3108 = vmatprep.subr.bf16.mxu0 %v2723_v27  ;;  %v2360_v9 = vld [vmem:[#allocation3 + $0x250] sm:$0xff]  ;;  %v2418_v27 = vld [vmem:[#allocation3 + $0x420] sm:$0xff] }
 0x66b   :  { %2937 = vmatpush1.bf16.msra.mxu1 %v2720_v16  ;;  %3109 = vmatpush1.bf16.msra.mxu0 %v2722_v53  ;;  %v2368_v16 = vld [vmem:[#allocation3 + $0x290] sm:$0xff]  ;;  %v2481_v53 = vld [vmem:[#allocation3 + $0x618] sm:$0xff] }
 0x66c   :  { %2938 = vmatprep.subr.bf16.mxu1 %v2728_v47  ;;  %3110 = vmatprep.subr.bf16.mxu0 %v2730_v43  ;;  %v2367_v47 = vld [vmem:[#allocation3 + $0x288] sm:$0xff]  ;;  %v2425_v43 = vld [vmem:[#allocation3 + $0x458] sm:$0xff] }
 0x66f   :  { %2939 = vmatpush1.bf16.msra.mxu1 %v2727_v13  ;;  %3111 = vmatpush1.bf16.msra.mxu0 %v2729_v40  ;;  %v2375_v13 = vld [vmem:[#allocation3 + $0x2c8] sm:$0xff]  ;;  %v2488_v40 = vld [vmem:[#allocation3 + $0x650] sm:$0xff] }
 0x670   :  { %3123 = vmatprep.subr.bf16.mxu1 %v2291_v48  ;;  %3589 = vmatprep.subr.bf16.mxu0 %v2348_v50  ;;  %v2374_v48 = vld [vmem:[#allocation3 + $0x2c0] sm:$0xff]  ;;  %v2432_v50 = vld [vmem:[#allocation3 + $0x490] sm:$0xff] }
 0x672   :  { %2941 = vmatmul.mubr.bf16.vlgmr.msra.gmra.mrb[12].mxu1 %v4860_v60  ;;  %3113 = vmatmul.mubr.bf16.vlgmr.msra.gmra.mrb[20].mxu0 %v4860_v60 }
 0x673   :  { %3124 = vmatpush1.bf16.msra.mxu1 %v2290_v46  ;;  %3590 = vmatpush3.bf16.msra.mxu0 %v2292_v25  ;;  %v2382_v46 = vld [vmem:[#allocation3 + $0x300] sm:$0xff]  ;;  %v2495_v25 = vld [vmem:[#allocation3 + $0x688] sm:$0xff] }
 0x674   :  { %3125 = vmatprep.subr.bf16.mxu1 %v2298_v52  ;;  %3591 = vmatprep.subr.bf16.mxu0 %v2355_v33  ;;  %v2381_v52 = vld [vmem:[#allocation3 + $0x2f8] sm:$0xff]  ;;  %v2439_v33 = vld [vmem:[#allocation3 + $0x4c8] sm:$0xff] }
 0x675   :  { %3155 = vmatprep.mubr.bf16.mxu1 %v4804_v32  ;;  %3327 = vmatprep.mubr.bf16.mxu0 %v4804_v32  ;;  %v2318_v32 = vld [vmem:[#allocation3 + $0x100] sm:$0xff] }
 0x677   :  { %3126 = vmatpush1.bf16.msra.mxu1 %v2297_v12  ;;  %3592 = vmatpush3.bf16.msra.mxu0 %v2299_v22  ;;  %v2389_v12 = vld [vmem:[#allocation3 + $0x338] sm:$0xff]  ;;  %v2502_v22 = vld [vmem:[#allocation3 + $0x6c0] sm:$0xff] }
 0x678   :  { %3127 = vmatprep.subr.bf16.mxu1 %v2305_v26  ;;  %3593 = vmatprep.subr.bf16.mxu0 %v2362_v15  ;;  %v2388_v26 = vld [vmem:[#allocation3 + $0x330] sm:$0xff]  ;;  %v2446_v15 = vld [vmem:[#allocation3 + $0x500] sm:$0xff] }
 0x67b   :  { %3128 = vmatpush1.bf16.msra.mxu1 %v2304_v51  ;;  %3594 = vmatpush3.bf16.msra.mxu0 %v2306_v41  ;;  %v2396_v51 = vld [vmem:[#allocation3 + $0x370] sm:$0xff]  ;;  %v2509_v41 = vld [vmem:[#allocation3 + $0x6f8] sm:$0xff] }
 0x67c   :  { %3129 = vmatprep.subr.bf16.mxu1 %v2312_v58  ;;  %3595 = vmatprep.subr.bf16.mxu0 %v2369_v42  ;;  %v2395_v58 = vld [vmem:[#allocation3 + $0x368] sm:$0xff]  ;;  %v2453_v42 = vld [vmem:[#allocation3 + $0x538] sm:$0xff] }
 0x67f   :  { %3130 = vmatpush1.bf16.msra.mxu1 %v2311_v45  ;;  %3596 = vmatpush3.bf16.msra.mxu0 %v2313_v21  ;;  %v2403_v45 = vld [vmem:[#allocation3 + $0x3a8] sm:$0xff]  ;;  %v2572_v21 = vld [vmem:[#allocation3 + $0x8f0] sm:$0xff] }
 0x680   :  { %3131 = vmatprep.subr.bf16.mxu1 %v2319_v2  ;;  %3597 = vmatprep.subr.bf16.mxu0 %v2376_v6  ;;  %v2402_v2 = vld [vmem:[#allocation3 + $0x3a0] sm:$0xff]  ;;  %v2516_v6 = vld [vmem:[#allocation3 + $0x730] sm:$0xff] }
 0x683   :  { %3132 = vmatpush1.bf16.msra.mxu1 %v2318_v32  ;;  %3598 = vmatpush3.bf16.msra.mxu0 %v2320_v17  ;;  %v2410_v32 = vld [vmem:[#allocation3 + $0x3e0] sm:$0xff]  ;;  %v2579_v17 = vld [vmem:[#allocation3 + $0x928] sm:$0xff] }
 0x684   :  { %3133 = vmatprep.subr.bf16.mxu1 %v2326_v24  ;;  %3599 = vmatprep.subr.bf16.mxu0 %v2383_v30  ;;  %v2409_v24 = vld [vmem:[#allocation3 + $0x3d8] sm:$0xff]  ;;  %v2523_v30 = vld [vmem:[#allocation3 + $0x768] sm:$0xff] }
 0x687   :  { %3134 = vmatpush1.bf16.msra.mxu1 %v2325_v19  ;;  %3600 = vmatpush3.bf16.msra.mxu0 %v2327_v3  ;;  %v2417_v19 = vld [vmem:[#allocation3 + $0x418] sm:$0xff]  ;;  %v2586_v3 = vld [vmem:[#allocation3 + $0x960] sm:$0xff] }
 0x688   :  { %3135 = vmatprep.subr.bf16.mxu1 %v2333_v10  ;;  %3601 = vmatprep.subr.bf16.mxu0 %v2390_v11  ;;  %v2416_v10 = vld [vmem:[#allocation3 + $0x410] sm:$0xff] }
 0x689   :  { %v2424_v11 = vld [vmem:[#allocation3 + $0x450] sm:$0xff] }
 0x68b   :  { %3136 = vmatpush1.bf16.msra.mxu1 %v2332_v28  ;;  %3602 = vmatpush3.bf16.msra.mxu0 %v2334_v0  ;;  %v2593_v28 = vld [vmem:[#allocation3 + $0x998] sm:$0xff]  ;;  %v2423_v0 = vld [vmem:[#allocation3 + $0x448] sm:$0xff] }
 0x68c   :  { %3137 = vmatprep.subr.bf16.mxu1 %v2340_v56  ;;  %3603 = vmatprep.subr.bf16.mxu0 %v2397_v1  ;;  %v2537_v56 = vld [vmem:[#allocation3 + $0x7d8] sm:$0xff]  ;;  %v2431_v1 = vld [vmem:[#allocation3 + $0x488] sm:$0xff] }
 0x68f   :  { %3138 = vmatpush1.bf16.msra.mxu1 %v2339_v31  ;;  %3604 = vmatpush3.bf16.msra.mxu0 %v2341_v5  ;;  %v2600_v31 = vld [vmem:[#allocation3 + $0x9d0] sm:$0xff] }
 0x690   :  { %3139 = vmatprep.subr.bf16.mxu1 %v2347_v23  ;;  %3611 = vmatprep.subr.bf16.mxu0 %v2460_v38  ;;  %v2544_v5 = vld [vmem:[#allocation3 + $0x810] sm:$0xff]  ;;  %v2438_v23 = vld [vmem:[#allocation3 + $0x4c0] sm:$0xff]  ;;  %v2607_v38 = vld [vmem:[#allocation3 + $0xa08] sm:$0xff] }
 0x692   :  { %3328 = vmatmul.mubr.bf16.vlgmr.msra.gmra.mrb[24].mxu0 %v4812_v54 }
 0x693   :  { %3140 = vmatpush1.bf16.msra.mxu1 %v2346_v36  ;;  %3612 = vmatpush3.bf16.msra.mxu0 %v2404_v49  ;;  %v2437_v36 = vld [vmem:[#allocation3 + $0x4b8] sm:$0xff]  ;;  %v2551_v49 = vld [vmem:[#allocation3 + $0x848] sm:$0xff] }
 0x694   :  { %3141 = vmatprep.subr.bf16.mxu1 %v2354_v7  ;;  %3613 = vmatprep.subr.bf16.mxu0 %v2467_v37  ;;  %v2445_v7 = vld [vmem:[#allocation3 + $0x4f8] sm:$0xff]  ;;  %v2614_v37 = vld [vmem:[#allocation3 + $0xa40] sm:$0xff] }
 0x695   :  { %3368 = vmatprep.mubr.bf16.mxu0 %v4818_v34 }
 0x697   :  { %3142 = vmatpush1.bf16.msra.mxu1 %v2353_v8  ;;  %3614 = vmatpush3.bf16.msra.mxu0 %v2411_v18  ;;  %v2444_v8 = vld [vmem:[#allocation3 + $0x4f0] sm:$0xff]  ;;  %v2558_v18 = vld [vmem:[#allocation3 + $0x880] sm:$0xff] }
 0x698   :  { %3143 = vmatprep.subr.bf16.mxu1 %v2361_v14  ;;  %3615 = vmatprep.subr.bf16.mxu0 %v2474_v20  ;;  %v2452_v14 = vld [vmem:[#allocation3 + $0x530] sm:$0xff]  ;;  %v2621_v20 = vld [vmem:[#allocation3 + $0xa78] sm:$0xff] }
 0x69b   :  { %3144 = vmatpush1.bf16.msra.mxu1 %v2360_v9  ;;  %3616 = vmatpush3.bf16.msra.mxu0 %v2418_v27  ;;  %v2451_v9 = vld [vmem:[#allocation3 + $0x528] sm:$0xff]  ;;  %v2565_v27 = vld [vmem:[#allocation3 + $0x8b8] sm:$0xff] }
 0x69c   :  { %3145 = vmatprep.subr.bf16.mxu1 %v2368_v16  ;;  %3617 = vmatprep.subr.bf16.mxu0 %v2481_v53  ;;  %v2459_v16 = vld [vmem:[#allocation3 + $0x568] sm:$0xff]  ;;  %v2684_v53 = vld [vmem:[#allocation3 + $0xc70] sm:$0xff] }
 0x69f   :  { %3146 = vmatpush1.bf16.msra.mxu1 %v2367_v47  ;;  %3618 = vmatpush3.bf16.msra.mxu0 %v2425_v43  ;;  %v2458_v47 = vld [vmem:[#allocation3 + $0x560] sm:$0xff]  ;;  %v2628_v43 = vld [vmem:[#allocation3 + $0xab0] sm:$0xff] }
 0x6a0   :  { %3147 = vmatprep.subr.bf16.mxu1 %v2375_v13  ;;  %3619 = vmatprep.subr.bf16.mxu0 %v2488_v40  ;;  %v2466_v13 = vld [vmem:[#allocation3 + $0x5a0] sm:$0xff]  ;;  %v2691_v40 = vld [vmem:[#allocation3 + $0xca8] sm:$0xff] }
 0x6a3   :  { %3148 = vmatpush1.bf16.msra.mxu1 %v2374_v48  ;;  %3620 = vmatpush3.bf16.msra.mxu0 %v2432_v50  ;;  %v2465_v48 = vld [vmem:[#allocation3 + $0x598] sm:$0xff]  ;;  %v2635_v50 = vld [vmem:[#allocation3 + $0xae8] sm:$0xff] }
 0x6a4   :  { %3149 = vmatprep.subr.bf16.mxu1 %v2382_v46  ;;  %3621 = vmatprep.subr.bf16.mxu0 %v2495_v25  ;;  %v2473_v46 = vld [vmem:[#allocation3 + $0x5d8] sm:$0xff]  ;;  %v2698_v25 = vld [vmem:[#allocation3 + $0xce0] sm:$0xff] }
 0x6a7   :  { %3150 = vmatpush1.bf16.msra.mxu1 %v2381_v52  ;;  %3622 = vmatpush3.bf16.msra.mxu0 %v2439_v33  ;;  %v2472_v52 = vld [vmem:[#allocation3 + $0x5d0] sm:$0xff]  ;;  %v2642_v33 = vld [vmem:[#allocation3 + $0xb20] sm:$0xff] }
 0x6a8   :  { %3151 = vmatprep.subr.bf16.mxu1 %v2389_v12  ;;  %3623 = vmatprep.subr.bf16.mxu0 %v2502_v22  ;;  %v2480_v12 = vld [vmem:[#allocation3 + $0x610] sm:$0xff]  ;;  %v2705_v22 = vld [vmem:[#allocation3 + $0xd18] sm:$0xff] }
 0x6ab   :  { %3152 = vmatpush1.bf16.msra.mxu1 %v2388_v26  ;;  %3624 = vmatpush3.bf16.msra.mxu0 %v2446_v15  ;;  %v2479_v26 = vld [vmem:[#allocation3 + $0x608] sm:$0xff]  ;;  %v2649_v15 = vld [vmem:[#allocation3 + $0xb58] sm:$0xff] }
 0x6ac   :  { %3153 = vmatprep.subr.bf16.mxu1 %v2396_v51  ;;  %3625 = vmatprep.subr.bf16.mxu0 %v2509_v41  ;;  %v2487_v51 = vld [vmem:[#allocation3 + $0x648] sm:$0xff]  ;;  %v2712_v41 = vld [vmem:[#allocation3 + $0xd50] sm:$0xff] }
 0x6af   :  { %3154 = vmatpush1.bf16.msra.mxu1 %v2395_v58  ;;  %3626 = vmatpush3.bf16.msra.mxu0 %v2453_v42  ;;  %v2486_v58 = vld [vmem:[#allocation3 + $0x640] sm:$0xff]  ;;  %v2656_v42 = vld [vmem:[#allocation3 + $0xb90] sm:$0xff] }
 0x6b0   :  { %3166 = vmatprep.subr.bf16.mxu1 %v2403_v45  ;;  %3633 = vmatprep.subr.bf16.mxu0 %v2572_v21  ;;  %v2494_v45 = vld [vmem:[#allocation3 + $0x680] sm:$0xff]  ;;  %v2719_v21 = vld [vmem:[#allocation3 + $0xd88] sm:$0xff] }
 0x6b2   :  { %3156 = vmatmul.mubr.bf16.vlgmr.msra.gmra.mrb[16].mxu1 %v4812_v54  ;;  %3369 = vmatmul.mubr.bf16.vlgmr.msra.gmra.mrb[28].mxu0 %v4828_v29  ;;  %v2530_v54 = vld [vmem:[#allocation3 + $0x7a0] sm:$0xff] }
 0x6b3   :  { %3167 = vmatpush1.bf16.msra.mxu1 %v2402_v2  ;;  %3634 = vmatpush3.bf16.msra.mxu0 %v2516_v6  ;;  %v2493_v2 = vld [vmem:[#allocation3 + $0x678] sm:$0xff]  ;;  %v2663_v6 = vld [vmem:[#allocation3 + $0xbc8] sm:$0xff] }
 0x6b4   :  { %3168 = vmatprep.subr.bf16.mxu1 %v2410_v32  ;;  %3635 = vmatprep.subr.bf16.mxu0 %v2579_v17  ;;  %v2501_v32 = vld [vmem:[#allocation3 + $0x6b8] sm:$0xff]  ;;  %v2726_v17 = vld [vmem:[#allocation3 + $0xdc0] sm:$0xff] }
 0x6b5   :  { %3198 = vmatprep.mubr.bf16.mxu1 %v4818_v34  ;;  %3409 = vmatprep.mubr.bf16.mxu0 %v4834_v44  ;;  %v2430_v34 = vld [vmem:[#allocation3 + $0x480] sm:$0xff] }
 0x6b7   :  { %3169 = vmatpush1.bf16.msra.mxu1 %v2409_v24  ;;  %3636 = vmatpush3.bf16.msra.mxu0 %v2523_v30  ;;  %v2500_v24 = vld [vmem:[#allocation3 + $0x6b0] sm:$0xff]  ;;  %v2670_v30 = vld [vmem:[#allocation3 + $0xc00] sm:$0xff] }
 0x6b8   :  { %3170 = vmatprep.subr.bf16.mxu1 %v2417_v19  ;;  %3637 = vmatprep.subr.bf16.mxu0 %v2586_v3  ;;  %v2508_v19 = vld [vmem:[#allocation3 + $0x6f0] sm:$0xff]  ;;  %v2733_v3 = vld [vmem:[#allocation3 + $0xdf8] sm:$0xff] }
 0x6bb   :  { %3171 = vmatpush1.bf16.msra.mxu1 %v2416_v10  ;;  %3638 = vmatpush3.bf16.msra.mxu0 %v2530_v54  ;;  %v2507_v10 = vld [vmem:[#allocation3 + $0x6e8] sm:$0xff]  ;;  %v2677_v54 = vld [vmem:[#allocation3 + $0xc38] sm:$0xff] }
 0x6bc   :  { %3172 = vmatprep.subr.bf16.mxu1 %v2424_v11  ;;  %3639 = vmatprep.subr.bf16.mxu0 %v2593_v28  ;;  %v2515_v11 = vld [vmem:[#allocation3 + $0x728] sm:$0xff]  ;;  %v2514_v28 = vld [vmem:[#allocation3 + $0x720] sm:$0xff] }
 0x6bf   :  { %3173 = vmatpush1.bf16.msra.mxu1 %v2423_v0  ;;  %3640 = vmatpush3.bf16.msra.mxu0 %v2537_v56  ;;  %v2522_v0 = vld [vmem:[#allocation3 + $0x760] sm:$0xff]  ;;  %v2521_v56 = vld [vmem:[#allocation3 + $0x758] sm:$0xff] }
 0x6c0   :  { %3174 = vmatprep.subr.bf16.mxu1 %v2431_v1  ;;  %3641 = vmatprep.subr.bf16.mxu0 %v2600_v31  ;;  %v2529_v1 = vld [vmem:[#allocation3 + $0x798] sm:$0xff]  ;;  %v2528_v31 = vld [vmem:[#allocation3 + $0x790] sm:$0xff] }
 0x6c3   :  { %3175 = vmatpush1.bf16.msra.mxu1 %v2430_v34  ;;  %3642 = vmatpush3.bf16.msra.mxu0 %v2544_v5  ;;  %v2536_v34 = vld [vmem:[#allocation3 + $0x7d0] sm:$0xff]  ;;  %v2535_v5 = vld [vmem:[#allocation3 + $0x7c8] sm:$0xff] }
 0x6c4   :  { %3176 = vmatprep.subr.bf16.mxu1 %v2438_v23  ;;  %3643 = vmatprep.subr.bf16.mxu0 %v2607_v38  ;;  %v2543_v23 = vld [vmem:[#allocation3 + $0x808] sm:$0xff]  ;;  %v2542_v38 = vld [vmem:[#allocation3 + $0x800] sm:$0xff] }
 0x6c7   :  { %3177 = vmatpush1.bf16.msra.mxu1 %v2437_v36  ;;  %3644 = vmatpush3.bf16.msra.mxu0 %v2551_v49  ;;  %v2549_v36 = vld [vmem:[#allocation3 + $0x838] sm:$0xff] }
 0x6c8   :  { %3178 = vmatprep.subr.bf16.mxu1 %v2445_v7  ;;  %3645 = vmatprep.subr.bf16.mxu0 %v2614_v37  ;;  %v2557_v49 = vld [vmem:[#allocation3 + $0x878] sm:$0xff]  ;;  %v2564_v7 = vld [vmem:[#allocation3 + $0x8b0] sm:$0xff]  ;;  %v2563_v37 = vld [vmem:[#allocation3 + $0x8a8] sm:$0xff] }
 0x6cb   :  { %3179 = vmatpush1.bf16.msra.mxu1 %v2444_v8  ;;  %3646 = vmatpush3.bf16.msra.mxu0 %v2558_v18  ;;  %v2571_v8 = vld [vmem:[#allocation3 + $0x8e8] sm:$0xff]  ;;  %v2570_v18 = vld [vmem:[#allocation3 + $0x8e0] sm:$0xff] }
 0x6cc   :  { %3180 = vmatprep.subr.bf16.mxu1 %v2452_v14  ;;  %3647 = vmatprep.subr.bf16.mxu0 %v2621_v20  ;;  %v2578_v14 = vld [vmem:[#allocation3 + $0x920] sm:$0xff]  ;;  %v2577_v20 = vld [vmem:[#allocation3 + $0x918] sm:$0xff] }
 0x6cf   :  { %3181 = vmatpush1.bf16.msra.mxu1 %v2451_v9  ;;  %3648 = vmatpush3.bf16.msra.mxu0 %v2565_v27  ;;  %v2585_v9 = vld [vmem:[#allocation3 + $0x958] sm:$0xff]  ;;  %v2584_v27 = vld [vmem:[#allocation3 + $0x950] sm:$0xff] }
 0x6d0   :  { %3182 = vmatprep.subr.bf16.mxu1 %v2459_v16  ;;  %3655 = vmatprep.subr.bf16.mxu0 %v2684_v53  ;;  %v2592_v16 = vld [vmem:[#allocation3 + $0x990] sm:$0xff]  ;;  %v2591_v53 = vld [vmem:[#allocation3 + $0x988] sm:$0xff] }
 0x6d2   :  { %3410 = vmatmul.mubr.bf16.vlgmr.msra.gmra.mrb[32].mxu0 %v4844_v35 }
 0x6d3   :  { %3183 = vmatpush1.bf16.msra.mxu1 %v2458_v47  ;;  %3656 = vmatpush3.bf16.msra.mxu0 %v2628_v43  ;;  %v2599_v47 = vld [vmem:[#allocation3 + $0x9c8] sm:$0xff]  ;;  %v2598_v43 = vld [vmem:[#allocation3 + $0x9c0] sm:$0xff] }
 0x6d4   :  { %3184 = vmatprep.subr.bf16.mxu1 %v2466_v13  ;;  %3657 = vmatprep.subr.bf16.mxu0 %v2691_v40  ;;  %v2606_v13 = vld [vmem:[#allocation3 + $0xa00] sm:$0xff]  ;;  %v2605_v40 = vld [vmem:[#allocation3 + $0x9f8] sm:$0xff] }
 0x6d5   :  { %3450 = vmatprep.mubr.bf16.mxu0 %v4850_v59 }
 0x6d7   :  { %3185 = vmatpush1.bf16.msra.mxu1 %v2465_v48  ;;  %3658 = vmatpush3.bf16.msra.mxu0 %v2635_v50  ;;  %v2613_v48 = vld [vmem:[#allocation3 + $0xa38] sm:$0xff]  ;;  %v2612_v50 = vld [vmem:[#allocation3 + $0xa30] sm:$0xff] }
 0x6d8   :  { %3186 = vmatprep.subr.bf16.mxu1 %v2473_v46  ;;  %3659 = vmatprep.subr.bf16.mxu0 %v2698_v25  ;;  %v2620_v46 = vld [vmem:[#allocation3 + $0xa70] sm:$0xff]  ;;  %v2619_v25 = vld [vmem:[#allocation3 + $0xa68] sm:$0xff] }
 0x6db   :  { %3187 = vmatpush1.bf16.msra.mxu1 %v2472_v52  ;;  %3660 = vmatpush3.bf16.msra.mxu0 %v2642_v33  ;;  %v2627_v52 = vld [vmem:[#allocation3 + $0xaa8] sm:$0xff]  ;;  %v2626_v33 = vld [vmem:[#allocation3 + $0xaa0] sm:$0xff] }
 0x6dc   :  { %3188 = vmatprep.subr.bf16.mxu1 %v2480_v12  ;;  %3661 = vmatprep.subr.bf16.mxu0 %v2705_v22  ;;  %v2634_v12 = vld [vmem:[#allocation3 + $0xae0] sm:$0xff]  ;;  %v2633_v22 = vld [vmem:[#allocation3 + $0xad8] sm:$0xff] }
 0x6df   :  { %3189 = vmatpush1.bf16.msra.mxu1 %v2479_v26  ;;  %3662 = vmatpush3.bf16.msra.mxu0 %v2649_v15  ;;  %v2641_v26 = vld [vmem:[#allocation3 + $0xb18] sm:$0xff]  ;;  %v2640_v15 = vld [vmem:[#allocation3 + $0xb10] sm:$0xff] }
 0x6e0   :  { %3190 = vmatprep.subr.bf16.mxu1 %v2487_v51  ;;  %3663 = vmatprep.subr.bf16.mxu0 %v2712_v41  ;;  %v2648_v51 = vld [vmem:[#allocation3 + $0xb50] sm:$0xff]  ;;  %v2647_v41 = vld [vmem:[#allocation3 + $0xb48] sm:$0xff] }
 0x6e3   :  { %3191 = vmatpush1.bf16.msra.mxu1 %v2486_v58  ;;  %3664 = vmatpush3.bf16.msra.mxu0 %v2656_v42  ;;  %v2655_v58 = vld [vmem:[#allocation3 + $0xb88] sm:$0xff] }
 0x6e4   :  { %3192 = vmatprep.subr.bf16.mxu1 %v2494_v45  ;;  %3665 = vmatprep.subr.bf16.mxu0 %v2719_v21  ;;  %v4879_v42 = vld [vmem:[#allocation19] sm:$0xff]  ;;  %v2654_v45 = vld [vmem:[#allocation3 + $0xb80] sm:$0xff] }
 0x6e5   :  { %v2755_v21 = vrot.slane %v4879_v42, %v4520_v62 }
 0x6e7   :  { %3193 = vmatpush1.bf16.msra.mxu1 %v2493_v2  ;;  %3666 = vmatpush3.bf16.msra.mxu0 %v2663_v6  ;;  %v2751_v2 = vrot.slane %v4879_v42, %v4456_v57  ;;  %v2759_v6 = vrot.slane %v4879_v42, %v4523_v63  ;;  %v2668_v63 = vld [vmem:[#allocation3 + $0xbf0] sm:$0xff] }
 0x6e8   :  { %3194 = vmatprep.subr.bf16.mxu1 %v2501_v32  ;;  %3667 = vmatprep.subr.bf16.mxu0 %v2726_v17  ;;  %v2661_v32 = vld [vmem:[#allocation3 + $0xbb8] sm:$0xff] }
 0x6eb   :  { %3195 = vmatpush1.bf16.msra.mxu1 %v2500_v24  ;;  %3668 = vmatpush3.bf16.msra.mxu0 %v2670_v30  ;;  %v2669_v30 = vld [vmem:[#allocation3 + $0xbf8] sm:$0xff] }
 0x6ec   :  { %3196 = vmatprep.subr.bf16.mxu1 %v2508_v19  ;;  %3669 = vmatprep.subr.bf16.mxu0 %v2733_v3 }
 0x6ef   :  { %3197 = vmatpush1.bf16.msra.mxu1 %v2507_v10  ;;  %3670 = vmatpush3.bf16.msra.mxu0 %v2677_v54 }
 0x6f0   :  { %3209 = vmatprep.subr.bf16.mxu1 %v2515_v11 }
 0x6f2   :  { %3199 = vmatmul.mubr.bf16.vlgmr.msra.gmra.mrb[16].mxu1 %v4828_v29  ;;  %3451 = vmatmul.mubr.bf16.vlgmr.msra.gmra.mrb[36].mxu0 %v4860_v60  ;;  %v2550_v29 = vld [vmem:[#allocation3 + $0x840] sm:$0xff] }
 0x6f3   :  { %3210 = vmatpush1.bf16.msra.mxu1 %v2514_v28  ;;  %3241 = vmatprep.mubr.bf16.mxu1 %v4834_v44  ;;  %v2556_v44 = vld [vmem:[#allocation3 + $0x870] sm:$0xff] }
 0x6f4   :  { %3211 = vmatprep.subr.bf16.mxu1 %v2522_v0 }
 0x6f7   :  { %3212 = vmatpush1.bf16.msra.mxu1 %v2521_v56 }
 0x6f8   :  { %3213 = vmatprep.subr.bf16.mxu1 %v2529_v1 }
 0x6fb   :  { %3214 = vmatpush1.bf16.msra.mxu1 %v2528_v31  ;;  %v2676_v31 = vld [vmem:[#allocation3 + $0xc30] sm:$0xff] }
 0x6fc   :  { %3215 = vmatprep.subr.bf16.mxu1 %v2536_v34 }
 0x6ff   :  { %3216 = vmatpush1.bf16.msra.mxu1 %v2535_v5 }
 0x700   :  { %3217 = vmatprep.subr.bf16.mxu1 %v2543_v23  ;;  %v2675_v23 = vld [vmem:[#allocation3 + $0xc28] sm:$0xff] }
 0x703   :  { %3218 = vmatpush1.bf16.msra.mxu1 %v2542_v38  ;;  %v2683_v38 = vld [vmem:[#allocation3 + $0xc68] sm:$0xff] }
 0x704   :  { %3219 = vmatprep.subr.bf16.mxu1 %v2550_v29  ;;  %v2682_v29 = vld [vmem:[#allocation3 + $0xc60] sm:$0xff] }
 0x707   :  { %3220 = vmatpush1.bf16.msra.mxu1 %v2549_v36  ;;  %v2690_v36 = vld [vmem:[#allocation3 + $0xca0] sm:$0xff] }
 0x708   :  { %3221 = vmatprep.subr.bf16.mxu1 %v2557_v49 }
 0x70b   :  { %3222 = vmatpush1.bf16.msra.mxu1 %v2556_v44 }
 0x70c   :  { %3223 = vmatprep.subr.bf16.mxu1 %v2564_v7 }
 0x70f   :  { %3224 = vmatpush1.bf16.msra.mxu1 %v2563_v37  ;;  %v2689_v37 = vld [vmem:[#allocation3 + $0xc98] sm:$0xff] }
 0x710   :  { %3225 = vmatprep.subr.bf16.mxu1 %v2571_v8 }
 0x713   :  { %3226 = vmatpush1.bf16.msra.mxu1 %v2570_v18  ;;  %v2697_v18 = vld [vmem:[#allocation3 + $0xcd8] sm:$0xff] }
 0x714   :  { %3227 = vmatprep.subr.bf16.mxu1 %v2578_v14 }
 0x717   :  { %3228 = vmatpush1.bf16.msra.mxu1 %v2577_v20 }
 0x718   :  { %3229 = vmatprep.subr.bf16.mxu1 %v2585_v9 }
 0x71b   :  { %3230 = vmatpush1.bf16.msra.mxu1 %v2584_v27  ;;  %v2696_v27 = vld [vmem:[#allocation3 + $0xcd0] sm:$0xff] }
 0x71c   :  { %3231 = vmatprep.subr.bf16.mxu1 %v2592_v16 }
 0x71f   :  { %3232 = vmatpush1.bf16.msra.mxu1 %v2591_v53  ;;  %v2704_v53 = vld [vmem:[#allocation3 + $0xd10] sm:$0xff] }
 0x720   :  { %3233 = vmatprep.subr.bf16.mxu1 %v2599_v47  ;;  %v2703_v47 = vld [vmem:[#allocation3 + $0xd08] sm:$0xff] }
 0x723   :  { %3234 = vmatpush1.bf16.msra.mxu1 %v2598_v43  ;;  %v2711_v43 = vld [vmem:[#allocation3 + $0xd48] sm:$0xff] }
 0x724   :  { %3235 = vmatprep.subr.bf16.mxu1 %v2606_v13  ;;  %v2710_v13 = vld [vmem:[#allocation3 + $0xd40] sm:$0xff] }
 0x727   :  { %3236 = vmatpush1.bf16.msra.mxu1 %v2605_v40  ;;  %v2718_v40 = vld [vmem:[#allocation3 + $0xd80] sm:$0xff] }
 0x728   :  { %3237 = vmatprep.subr.bf16.mxu1 %v2613_v48  ;;  %v2717_v48 = vld [vmem:[#allocation3 + $0xd78] sm:$0xff] }
 0x72b   :  { %3238 = vmatpush1.bf16.msra.mxu1 %v2612_v50  ;;  %v2725_v50 = vld [vmem:[#allocation3 + $0xdb8] sm:$0xff] }
 0x72c   :  { %3239 = vmatprep.subr.bf16.mxu1 %v2620_v46 }
 0x72f   :  { %3240 = vmatpush1.bf16.msra.mxu1 %v2619_v25 }
 0x730   :  { %3252 = vmatprep.subr.bf16.mxu1 %v2627_v52 }
 0x732   :  { %3242 = vmatmul.mubr.bf16.vlgmr.msra.gmra.mrb[16].mxu1 %v4844_v35  ;;  %v2662_v35 = vld [vmem:[#allocation3 + $0xbc0] sm:$0xff] }
 0x733   :  { %3253 = vmatpush1.bf16.msra.mxu1 %v2626_v33  ;;  %3284 = vmatprep.mubr.bf16.mxu1 %v4850_v59  ;;  %v2747_v59 = vrot.slane %v4879_v42, %v4453_v55 }
 0x734   :  { %3254 = vmatprep.subr.bf16.mxu1 %v2634_v12  ;;  %v2724_v12 = vld [vmem:[#allocation3 + $0xdb0] sm:$0xff] }
 0x737   :  { %3255 = vmatpush1.bf16.msra.mxu1 %v2633_v22 }
 0x738   :  { %3256 = vmatprep.subr.bf16.mxu1 %v2641_v26  ;;  %v2732_v26 = vld [vmem:[#allocation3 + $0xdf0] sm:$0xff] }
 0x73b   :  { %3257 = vmatpush1.bf16.msra.mxu1 %v2640_v15 }
 0x73c   :  { %3258 = vmatprep.subr.bf16.mxu1 %v2648_v51  ;;  %v2731_v51 = vld [vmem:[#allocation3 + $0xde8] sm:$0xff] }
 0x73f   :  { %3259 = vmatpush1.bf16.msra.mxu1 %v2647_v41  ;;  %v2771_v41 = vrot.slane %v4879_v42, %v4719_v4 }
 0x740   :  { %3260 = vmatprep.subr.bf16.mxu1 %v2655_v58 }
 0x743   :  { %3261 = vmatpush1.bf16.msra.mxu1 %v2654_v45 }
 0x744   :  { %3262 = vmatprep.subr.bf16.mxu1 %v2662_v35 }
 0x745   :  { %v2942_v17 = vpop.f32.mrb[12].mxu1  ;;  %v3114_v24 = vpop.f32.mrb[20].mxu0 }
 0x746   :  { %v3681_v19 = vadd.f32 %v2942_v17, %v2747_v59  ;;  %v3685_v3 = vadd.f32 %v3114_v24, %v2755_v21  ;;  %v2944_v10 = vpop.f32.mrb[13].mxu1  ;;  %v3116_v54 = vpop.f32.mrb[21].mxu0 }
 0x747   :  { %v3682_v55 = vadd.f32 %v2944_v10, %v2751_v2  ;;  %v3686_v11 = vadd.f32 %v3116_v54, %v2759_v6  ;;  %v2946_v28 = vpop.f32.mrb[14].mxu1  ;;  %v3118_v62 = vpop.f32.mrb[22].mxu0  ;;  %3263 = vmatpush1.bf16.msra.mxu1 %v2661_v32 }
 0x748   :  { %3908 = vtanh.f32 %v3681_v19  ;;  %v3683_v0 = vadd.f32 %v2946_v28, %v2747_v59  ;;  %v2948_v57 = vpop.f32.mrb[15].mxu1  ;;  %v3120_v56 = vpop.f32.mrb[23].mxu0  ;;  %3264 = vmatprep.subr.bf16.mxu1 %v2669_v30  ;;  %v3687_v1 = vadd.f32 %v3118_v62, %v2755_v21 }
 0x749   :  { %3910 = vtanh.f32 %v3685_v3  ;;  %v3684_v34 = vadd.f32 %v2948_v57, %v2751_v2  ;;  %v3688_v5 = vadd.f32 %v3120_v56, %v2759_v6 }
 0x74a   :  { %3912 = vtanh.f32 %v3682_v55 }
 0x74b   :  { %3914 = vtanh.f32 %v3686_v11  ;;  %3265 = vmatpush1.bf16.msra.mxu1 %v2668_v63 }
 0x74c   :  { %3916 = vtanh.f32 %v3683_v0  ;;  %3266 = vmatprep.subr.bf16.mxu1 %v2676_v31 }
 0x74d   :  { %3918 = vtanh.f32 %v3687_v1 }
 0x74e   :  { %3920 = vtanh.f32 %v3684_v34 }
 0x74f   :  { %3922 = vtanh.f32 %v3688_v5  ;;  %3267 = vmatpush1.bf16.msra.mxu1 %v2675_v23  ;;  %v2763_v5 = vrot.slane %v4879_v42, %v4713_v61  ;;  %v2767_v23 = vrot.slane %v4879_v42, %v4716_v39 }
 0x750   :  { %3268 = vmatprep.subr.bf16.mxu1 %v2683_v38 }
 0x752   :  { %v3909_v49 = vpop.eup %3908 }
 0x753   :  { %v3911_v44 = vpop.eup %3910  ;;  %3473 = vst [vmem:[%s4952_s14] sm:$0xff] %v3909_v49  ;;  %3269 = vmatpush1.bf16.msra.mxu1 %v2682_v29 }
 0x754   :  { %v3913_v7 = vpop.eup %3912  ;;  %3475 = vst [vmem:[%s4952_s14 + $0x10] sm:$0xff] %v3911_v44  ;;  %3270 = vmatprep.subr.bf16.mxu1 %v2690_v36 }
 0x755   :  { %v3915_v8 = vpop.eup %3914  ;;  %3474 = vst [vmem:[%s4952_s14 + $0x8] sm:$0xff] %v3913_v7 }
 0x756   :  { %v3917_v14 = vpop.eup %3916  ;;  %3476 = vst [vmem:[%s4952_s14 + $0x18] sm:$0xff] %v3915_v8 }
 0x757   :  { %v3919_v20 = vpop.eup %3918  ;;  %3480 = vst [vmem:[%s4952_s14 + $0x38] sm:$0xff] %v3917_v14  ;;  %3271 = vmatpush1.bf16.msra.mxu1 %v2689_v37 }
 0x758   :  { %v3921_v9 = vpop.eup %3920  ;;  %3482 = vst [vmem:[%s4952_s14 + $0x48] sm:$0xff] %v3919_v20  ;;  %3272 = vmatprep.subr.bf16.mxu1 %v2697_v18 }
 0x759   :  { %v3923_v16 = vpop.eup %3922  ;;  %3481 = vst [vmem:[%s4952_s14 + $0x40] sm:$0xff] %v3921_v9 }
 0x75a   :  { %3483 = vst [vmem:[%s4952_s14 + $0x50] sm:$0xff] %v3923_v16 }
 0x75b   :  { %3273 = vmatpush1.bf16.msra.mxu1 %v2696_v27 }
 0x75c   :  { %3274 = vmatprep.subr.bf16.mxu1 %v2704_v53 }
 0x75f   :  { %3275 = vmatpush1.bf16.msra.mxu1 %v2703_v47 }
 0x760   :  { %3276 = vmatprep.subr.bf16.mxu1 %v2711_v43 }
 0x763   :  { %3277 = vmatpush1.bf16.msra.mxu1 %v2710_v13 }
 0x764   :  { %3278 = vmatprep.subr.bf16.mxu1 %v2718_v40 }
 0x765   :  { %v3605_v46 = vpop.f32.mrb[24].mxu0 }
 0x766   :  { %v3606_v25 = vpop.f32.mrb[25].mxu0 }
 0x767   :  { %3279 = vmatpush1.bf16.msra.mxu1 %v2717_v48  ;;  %v3607_v52 = vadd.f32 %v3606_v25, %v3605_v46  ;;  %v3608_v33 = vpop.f32.mrb[26].mxu0 }
 0x768   :  { %3280 = vmatprep.subr.bf16.mxu1 %v2725_v50  ;;  %v3609_v22 = vpop.f32.mrb[27].mxu0 }
 0x769   :  { %v3610_v15 = vadd.f32 %v3609_v22, %v3608_v33  ;;  %v3330_v58 = vadd.f32 %v3607_v52, %v2771_v41 }
 0x76b   :  { %3281 = vmatpush1.bf16.msra.mxu1 %v2724_v12  ;;  %v3333_v59 = vadd.f32 %v3610_v15, %v2771_v41 }
 0x76c   :  { %3282 = vmatprep.subr.bf16.mxu1 %v2732_v26 }
 0x76f   :  { %3283 = vmatpush1.bf16.msra.mxu1 %v2731_v51 }
 0x772   :  { %3285 = vmatmul.mubr.bf16.vlgmr.msra.gmra.mrb[16].mxu1 %v4860_v60 }
 0x785   :  { %v3627_v45 = vpop.f32.mrb[28].mxu0 }
 0x786   :  { %v3628_v35 = vpop.f32.mrb[29].mxu0 }
 0x787   :  { %v3629_v21 = vadd.f32 %v3628_v35, %v3627_v45  ;;  %v3630_v2 = vpop.f32.mrb[30].mxu0 }
 0x788   :  { %v3631_v6 = vpop.f32.mrb[31].mxu0 }
 0x789   :  { %v3371_v32 = vadd.f32 %v3629_v21, %v3330_v58  ;;  %v3632_v17 = vadd.f32 %v3631_v6, %v3630_v2 }
 0x78b   :  { %v3374_v24 = vadd.f32 %v3632_v17, %v3333_v59 }
 0x7a5   :  { %v3649_v30 = vpop.f32.mrb[32].mxu0 }
 0x7a6   :  { %v3650_v19 = vpop.f32.mrb[33].mxu0 }
 0x7a7   :  { %v3651_v3 = vadd.f32 %v3650_v19, %v3649_v30  ;;  %v3652_v10 = vpop.f32.mrb[34].mxu0 }
 0x7a8   :  { %v3653_v54 = vpop.f32.mrb[35].mxu0 }
 0x7a9   :  { %v3412_v55 = vadd.f32 %v3651_v3, %v3371_v32  ;;  %v3654_v60 = vadd.f32 %v3653_v54, %v3652_v10 }
 0x7ab   :  { %v3415_v11 = vadd.f32 %v3654_v60, %v3374_v24 }
 0x7c5   :  { %v3671_v28 = vpop.f32.mrb[36].mxu0 }
 0x7c6   :  { %v3672_v4 = vpop.f32.mrb[37].mxu0 }
 0x7c7   :  { %v3673_v62 = vadd.f32 %v3672_v4, %v3671_v28  ;;  %v3674_v0 = vpop.f32.mrb[38].mxu0 }
 0x7c8   :  { %v3675_v57 = vpop.f32.mrb[39].mxu0 }
 0x7c9   :  { %v3453_v56 = vadd.f32 %v3673_v62, %v3412_v55  ;;  %v3676_v63 = vadd.f32 %v3675_v57, %v3674_v0 }
 0x7cb   :  { %3924 = vtanh.f32 %v3453_v56  ;;  %v3456_v1 = vadd.f32 %v3676_v63, %v3415_v11 }
 0x7cd   :  { %3926 = vtanh.f32 %v3456_v1 }
 0x7d5   :  { %v3925_v31 = vpop.eup %3924 }
 0x7d6   :  { %3479 = vst [vmem:[%s4952_s14 + $0x30] sm:$0xff] %v3925_v31 }
 0x7d7   :  { %v3927_v34 = vpop.eup %3926 }
 0x7d8   :  { %3486 = vst [vmem:[%s4952_s14 + $0x68] sm:$0xff] %v3927_v34 }
 0x845   :  { %v3286_v38 = vpop.f32.mrb[16].mxu1 }
 0x846   :  { %v3689_v29 = vadd.f32 %v3286_v38, %v2763_v5  ;;  %v3288_v36 = vpop.f32.mrb[17].mxu1 }
 0x847   :  { %v3690_v49 = vadd.f32 %v3288_v36, %v2767_v23  ;;  %v3290_v44 = vpop.f32.mrb[18].mxu1 }
 0x848   :  { %3928 = vtanh.f32 %v3689_v29  ;;  %v3691_v7 = vadd.f32 %v3290_v44, %v2763_v5  ;;  %v3292_v37 = vpop.f32.mrb[19].mxu1 }
 0x849   :  { %3930 = vtanh.f32 %v3690_v49  ;;  %v3692_v8 = vadd.f32 %v3292_v37, %v2767_v23 }
 0x84a   :  { %3932 = vtanh.f32 %v3691_v7 }
 0x84b   :  { %3934 = vtanh.f32 %v3692_v8 }
 0x852   :  { %v3929_v18 = vpop.eup %3928 }
 0x853   :  { %v3931_v14 = vpop.eup %3930  ;;  %3477 = vst [vmem:[%s4952_s14 + $0x20] sm:$0xff] %v3929_v18 }
 0x854   :  { %v3933_v61 = vpop.eup %3932  ;;  %3478 = vst [vmem:[%s4952_s14 + $0x28] sm:$0xff] %v3931_v14 }
 0x855   :  { %v3935_v39 = vpop.eup %3934  ;;  %3484 = vst [vmem:[%s4952_s14 + $0x58] sm:$0xff] %v3933_v61 }
 0x856   :  { %3485 = vst [vmem:[%s4952_s14 + $0x60] sm:$0xff] %v3935_v39 }
 0x857   :  { %3491 = vsyncpa [#allocation6], 1 }
 0x858   :  { %3492 = vsyncpa [#allocation8], 1 }
 0x859   :  { %3493 = vsyncpa [#allocation11], 1 }
 0x85a   :  { %3494 = vsyncpa [#allocation14], 1 }
 0x85b   :  { %3495 = vsyncpa [#allocation17], 1 }
 0x85c   :  { %3496 = vsyncpa [#allocation20], 1 }
 0x85d   :  { %3497 = vsyncmov [#allocation4] }
 0x860   :  { %s3498_s17 = vpop.sfrf %3497 }
 0x861   :  { %p3587_p10 = scmp.ne.s32.totalorder %s3498_s17, 0 }
 0x863   :  { %3502 = shalt.err (%p3587_p10)  }
 0x864   :  { %3504 = vsyncmov [#allocation4 + $0x1] }
 0x867   :  { %s3505_s4 = vpop.sfrf %3504 }
 0x868   :  { %p3588_p11 = scmp.ne.s32.totalorder %s3505_s4, 0 }
 0x86a   :  { %3509 = shalt.err (%p3588_p11)  }

</bundles_post_ra>
